<compile_context>
chip_gen: v5e
topology: v5e:2x2
jax: 0.10.0
libtpu: 0.0.40
codegen_flags: <defaults>
</compile_context>

<pallas_src>
import functools
import math

import jax
import jax.numpy as jnp
from jax import lax
from jax.experimental import pallas as pl
from jax.experimental.pallas import tpu as pltpu


# ------------------------------ small helpers ------------------------------ #

def _round_up(x, m):
    return ((x + m - 1) // m) * m


def _pick_tile(size, candidates, prefer_multi):
    """Largest candidate dividing `size`; prefer one giving >=2 blocks."""
    divs = [c for c in candidates if size % c == 0]
    if not divs:
        return size
    if prefer_multi:
        multi = [c for c in divs if size // c >= 2]
        if multi:
            return max(multi)
    return max(divs)


# ------------------------- fused tiled matmul kernel ------------------------ #
# o = act(x @ w + bias), bf16 inputs, f32 accumulate, grid (M, N, K) tiles.

def _fused_matmul_kernel(x_ref, w_ref, b_ref, o_ref, acc_ref, *, relu):
    k = pl.program_id(2)

    @pl.when(k == 0)
    def _():
        acc_ref[...] = jnp.zeros_like(acc_ref)

    acc_ref[...] += jnp.dot(x_ref[...], w_ref[...],
                            preferred_element_type=jnp.float32)

    @pl.when(k == pl.num_programs(2) - 1)
    def _():
        r = acc_ref[...] + b_ref[...]
        if relu:
            r = jnp.maximum(r, 0.0)
        o_ref[...] = r.astype(o_ref.dtype)


def fused_matmul(x, w, bias, *, relu, out_dtype=jnp.bfloat16):
    """act((x @ w) + bias);  x:(M,K)  w:(K,N)  bias:(N,)."""
    M, K = x.shape
    K2, N = w.shape
    assert K == K2

    Kp = _round_up(K, 128)
    Np = _round_up(N, 128)
    if M >= 128:
        Mp = _round_up(M, 128)
        tm = _pick_tile(Mp, (512, 256, 128), prefer_multi=True)
    else:
        Mp = _round_up(M, 8)
        tm = Mp
    tk = _pick_tile(Kp, (512, 256, 128), prefer_multi=False)
    tn = _pick_tile(Np, (256, 128), prefer_multi=False)

    xp = jnp.pad(x.astype(jnp.bfloat16), ((0, Mp - M), (0, Kp - K)))
    wp = jnp.pad(w.astype(jnp.bfloat16), ((0, Kp - K), (0, Np - N)))
    bp = jnp.pad(bias.astype(jnp.float32), (0, Np - N)).reshape(1, Np)

    out_bytes = jnp.dtype(out_dtype).itemsize
    vmem_est = (2 * (tm * tk * 2 + tk * tn * 2 + tn * 4 + tm * tn * out_bytes)
                + tm * tn * 4)
    vmem_limit = max(2 * vmem_est, 32 * 1024 * 1024)

    out = pl.pallas_call(
        functools.partial(_fused_matmul_kernel, relu=relu),
        out_shape=jax.ShapeDtypeStruct((Mp, Np), out_dtype),
        grid_spec=pltpu.PrefetchScalarGridSpec(
            num_scalar_prefetch=0,
            grid=(Mp // tm, Np // tn, Kp // tk),
            in_specs=[
                pl.BlockSpec((tm, tk), lambda m, n, k: (m, k)),
                pl.BlockSpec((tk, tn), lambda m, n, k: (k, n)),
                pl.BlockSpec((1, tn), lambda m, n, k: (0, n)),
            ],
            out_specs=pl.BlockSpec((tm, tn), lambda m, n, k: (m, n)),
            scratch_shapes=[pltpu.VMEM((tm, tn), jnp.float32)],
        ),
        compiler_params=pltpu.CompilerParams(
            dimension_semantics=("parallel", "parallel", "arbitrary"),
            vmem_limit_bytes=vmem_limit,
        ),
    )(xp, wp, bp)
    return out[:M, :N]


# -------------------- dilated 3x3 conv + BN + ReLU kernel ------------------- #
# One grid step = one output row of one sample.  The whole (max-)padded sample
# stays resident in VMEM across the H axis (constant block index), and the 9
# taps are 9 small shifted MXU matmuls accumulated in f32 registers.

def _dilated_conv_kernel(xp_ref, w_ref, b_ref, o_ref, *, d, off, W):
    h = pl.program_id(1)
    cp = w_ref.shape[2]
    acc = jnp.zeros((W, cp), jnp.float32)
    for kh in range(3):
        row = xp_ref[h + kh * d + off]                 # (Wp, Cin)
        for kw in range(3):
            start = kw * d + off
            tap = row[start:start + W, :]              # (W, Cin)
            acc = acc + jnp.dot(tap, w_ref[kh * 3 + kw],
                                preferred_element_type=jnp.float32)
    r = jnp.maximum(acc + b_ref[...], 0.0)
    o_ref[...] = r.astype(o_ref.dtype)


def dilated_conv3x3(xp, w9, bias, *, d, pad_max, H, W, m_rows):
    """'same' dilated 3x3 conv (padding == dilation) + folded-BN + ReLU.

    xp:   (N, Hp, Wp, Cin) bf16, zero padded by pad_max on each spatial side.
    w9:   (9, Cin, Cp) bf16, taps ordered (kh, kw), BN scale folded in.
    bias: (Cp,) f32.
    Returns (m_rows, Cp) bf16; rows [0, N*H*W) hold the NHWC-flattened output.
    """
    N, Hp, Wp, Cin = xp.shape
    Cp = w9.shape[2]
    assert Hp == H + 2 * pad_max and Wp == W + 2 * pad_max
    assert W % 8 == 0, "W must be a multiple of 8 for the row-block store"
    assert m_rows % W == 0
    off = pad_max - d
    b2 = bias.astype(jnp.float32).reshape(1, Cp)

    vmem_est = (2 * (Hp * Wp * Cin * 2 + 9 * Cin * Cp * 2 + Cp * 4 + W * Cp * 2)
                + W * Cp * 4)
    vmem_limit = max(2 * vmem_est, 32 * 1024 * 1024)

    kernel = functools.partial(_dilated_conv_kernel, d=d, off=off, W=W)
    return pl.pallas_call(
        kernel,
        out_shape=jax.ShapeDtypeStruct((m_rows, Cp), jnp.bfloat16),
        grid_spec=pltpu.PrefetchScalarGridSpec(
            num_scalar_prefetch=0,
            grid=(N, H),
            in_specs=[
                pl.BlockSpec((None, Hp, Wp, Cin), lambda n, h: (n, 0, 0, 0)),
                pl.BlockSpec((9, Cin, Cp), lambda n, h: (0, 0, 0)),
                pl.BlockSpec((1, Cp), lambda n, h: (0, 0)),
            ],
            out_specs=pl.BlockSpec((W, Cp), lambda n, h: (n * H + h, 0)),
        ),
        compiler_params=pltpu.CompilerParams(
            dimension_semantics=("parallel", "arbitrary"),
            vmem_limit_bytes=vmem_limit,
        ),
    )(xp, w9, b2)


# ---------------- final 1x1 conv over the 5 branches (no concat) ------------ #

def _final_conv_kernel(b1_ref, b2_ref, b3_ref, b4_ref, b5_ref,
                       w_ref, bias_ref, o_ref):
    branches = (b1_ref, b2_ref, b3_ref, b4_ref, b5_ref)
    acc = jnp.dot(branches[0][...], w_ref[0], preferred_element_type=jnp.float32)
    for i in range(1, 5):
        acc = acc + jnp.dot(branches[i][...], w_ref[i],
                            preferred_element_type=jnp.float32)
    o_ref[...] = (acc + bias_ref[...]).astype(o_ref.dtype)


def final_conv1x1(branches, w_stack, bias, *, out_dtype=jnp.float32):
    """out = concat(branches, -1) @ vstack(w) + bias, without materializing the concat."""
    Mp, Cp = branches[0].shape
    n_br, Cp2, Coutp = w_stack.shape
    assert n_br == 5 and Cp2 == Cp
    tm = _pick_tile(Mp, (512, 256, 128), prefer_multi=True) if Mp >= 128 else Mp
    tn = _pick_tile(Coutp, (256, 128), prefer_multi=False)
    b2 = bias.astype(jnp.float32).reshape(1, Coutp)

    vmem_est = 2 * (5 * tm * Cp * 2 + 5 * Cp * tn * 2 + tn * 4 + tm * tn * 4)
    vmem_limit = max(2 * vmem_est, 32 * 1024 * 1024)

    branch_spec = pl.BlockSpec((tm, Cp), lambda m, n: (m, 0))
    return pl.pallas_call(
        _final_conv_kernel,
        out_shape=jax.ShapeDtypeStruct((Mp, Coutp), out_dtype),
        grid_spec=pltpu.PrefetchScalarGridSpec(
            num_scalar_prefetch=0,
            grid=(Mp // tm, Coutp // tn),
            in_specs=[branch_spec] * 5 + [
                pl.BlockSpec((5, Cp, tn), lambda m, n: (0, 0, n)),
                pl.BlockSpec((1, tn), lambda m, n: (0, n)),
            ],
            out_specs=pl.BlockSpec((tm, tn), lambda m, n: (m, n)),
        ),
        compiler_params=pltpu.CompilerParams(
            dimension_semantics=("parallel", "parallel"),
            vmem_limit_bytes=vmem_limit,
        ),
    )(*branches, w_stack, b2)


# ------------------------------ JAX glue ----------------------------------- #

def _fold_bn(w_oihw, conv_bias, bn, eps=1e-5):
    """Fold eval-mode BN into the conv: returns (scaled weight, new bias)."""
    gamma, beta, mean, var = bn
    scale = gamma / jnp.sqrt(var + eps)
    w = w_oihw * scale[:, None, None, None]
    b = (conv_bias - mean) * scale + beta
    return w, b


def _bilinear_weights(out_size, in_size):
    """Row interpolation matrix for bilinear, align_corners=False."""
    i = jnp.arange(out_size, dtype=jnp.float32)
    src = (i + 0.5) * (in_size / out_size) - 0.5
    src = jnp.clip(src, 0.0, in_size - 1.0)
    i0 = jnp.floor(src).astype(jnp.int32)
    i1 = jnp.minimum(i0 + 1, in_size - 1)
    frac = src - i0.astype(jnp.float32)
    w = jnp.zeros((out_size, in_size), jnp.float32)
    w = w.at[jnp.arange(out_size), i0].add(1.0 - frac)
    w = w.at[jnp.arange(out_size), i1].add(frac)
    return w


# ------------------------------ ASPP forward ------------------------------- #

def aspp_forward(x_nchw, params):
    N, Cin, H, W = x_nchw.shape
    C = Cin // 4
    assert H % 4 == 0 and W % 4 == 0, "adaptive pool(4) assumed divisible here"
    assert W % 8 == 0

    Cp = _round_up(C, 128)                      # lane-dense branch channels
    M = N * H * W
    Mp = _round_up(M, math.lcm(512, W))         # divisible by tiles and by W

    x_nhwc = jnp.transpose(x_nchw, (0, 2, 3, 1)).astype(jnp.float32)
    x_bf = x_nhwc.astype(jnp.bfloat16)
    x_flat = jnp.pad(x_bf.reshape(M, Cin), ((0, Mp - M), (0, 0)))

    def pad_cout(w2d, b):
        return (jnp.pad(w2d, ((0, 0), (0, Cp - C))), jnp.pad(b, (0, Cp - C)))

    # branch 1: 1x1 conv + BN + ReLU
    w1, b1 = _fold_bn(params['w1'], params['b1'], params['bn1'])
    w1, b1 = pad_cout(w1.reshape(C, Cin).T, b1)
    br1 = fused_matmul(x_flat, w1, b1, relu=True, out_dtype=jnp.bfloat16)

    # branches 2-4: dilated 3x3 conv + BN + ReLU (one shared max-padded input)
    pad_max = 18
    xp = jnp.pad(x_bf, ((0, 0), (pad_max, pad_max), (pad_max, pad_max), (0, 0)))
    dil = []
    for d, key in ((6, 'r6'), (12, 'r12'), (18, 'r18')):
        wd, bd = _fold_bn(params['w' + key], params['b' + key],
                          params['bn' + key])
        wd = wd.transpose(2, 3, 1, 0).reshape(9, Cin, C)      # (kh,kw,cin,cout)
        wd = jnp.pad(wd, ((0, 0), (0, 0), (0, Cp - C))).astype(jnp.bfloat16)
        bd = jnp.pad(bd, (0, Cp - C))
        dil.append(dilated_conv3x3(xp, wd, bd, d=d, pad_max=pad_max,
                                   H=H, W=W, m_rows=Mp))

    # branch 5: adaptive avg pool 4x4 -> 1x1 conv+BN+ReLU -> bilinear upsample
    # TODO(synk): pool + separable upsample kept in plain JAX (tiny work).
    ph, pw = H // 4, W // 4
    pooled = x_nhwc.reshape(N, 4, ph, 4, pw, Cin).mean(axis=(2, 4))  # (N,4,4,Cin)
    wp_, bp_ = _fold_bn(params['wp'], params['bp'], params['bnp'])
    wp_, bp_ = pad_cout(wp_.reshape(C, Cin).T, bp_)
    x5s = fused_matmul(pooled.reshape(N * 16, Cin), wp_, bp_,
                       relu=True, out_dtype=jnp.float32)             # (N*16, Cp)
    x5s = x5s.reshape(N, 4, 4, Cp)
    Urow = _bilinear_weights(H, 4)
    Ucol = _bilinear_weights(W, 4)
    x5 = jnp.einsum('hi,wj,nijc->nhwc', Urow, Ucol, x5s)             # (N,H,W,Cp)
    x5 = x5.astype(jnp.bfloat16).reshape(M, Cp)
    if Mp > M:
        x5 = jnp.pad(x5, ((0, Mp - M), (0, 0)))

    # final 1x1 conv over the (never-materialized) concat.  The extra ReLU on
    # the concat is an identity: every branch is already post-ReLU and the
    # padded channels are exact zeros.
    Cout = params['wf'].shape[0]
    Coutp = _round_up(Cout, 128)
    wf = params['wf'].reshape(Cout, 5 * C)
    wf_stack = jnp.stack(
        [jnp.pad(wf[:, i * C:(i + 1) * C].T, ((0, Cp - C), (0, Coutp - Cout)))
         for i in range(5)], axis=0).astype(jnp.bfloat16)            # (5,Cp,Coutp)
    bf = jnp.pad(params['bf'], (0, Coutp - Cout))

    out = final_conv1x1([br1] + dil + [x5], wf_stack, bf)            # (Mp,Coutp) f32
    out = out[:M, :Cout].reshape(N, H, W, Cout)
    return jnp.transpose(out, (0, 3, 1, 2))


# ---------------------------- pure-JAX reference --------------------------- #

def aspp_reference(x, params):
    N, Cin, H, W = x.shape

    def conv(inp, w, b, d=1, pad=0):
        y = lax.conv_general_dilated(inp, w, (1, 1), [(pad, pad), (pad, pad)],
                                     rhs_dilation=(d, d),
                                     dimension_numbers=('NCHW', 'OIHW', 'NCHW'))
        return y + b[None, :, None, None]

    def bnrelu(y, bnp):
        gamma, beta, mean, var = bnp
        s = gamma / jnp.sqrt(var + 1e-5)
        y = (y - mean[None, :, None, None]) * s[None, :, None, None] \
            + beta[None, :, None, None]
        return jnp.maximum(y, 0.0)

    x1 = bnrelu(conv(x, params['w1'], params['b1']), params['bn1'])
    x2 = bnrelu(conv(x, params['wr6'], params['br6'], d=6, pad=6), params['bnr6'])
    x3 = bnrelu(conv(x, params['wr12'], params['br12'], d=12, pad=12), params['bnr12'])
    x4 = bnrelu(conv(x, params['wr18'], params['br18'], d=18, pad=18), params['bnr18'])
    pooled = x.reshape(N, Cin, 4, H // 4, 4, W // 4).mean(axis=(3, 5))
    x5 = bnrelu(conv(pooled, params['wp'], params['bp']), params['bnp'])
    Urow = _bilinear_weights(H, 4)
    Ucol = _bilinear_weights(W, 4)
    x5 = jnp.einsum('hi,wj,ncij->nchw', Urow, Ucol, x5)
    cat = jnp.maximum(jnp.concatenate([x1, x2, x3, x4, x5], axis=1), 0.0)
    return conv(cat, params['wf'], params['bf'])


# ------------------------------- params ------------------------------------ #

def init_params(key, inchannel, outchannel):
    C = inchannel // 4
    ks = iter(jax.random.split(key, 32))

    def conv_w(co, ci, kh, kw):
        return 0.1 * jax.random.normal(next(ks), (co, ci, kh, kw), jnp.float32)

    def conv_b(co):
        return 0.1 * jax.random.normal(next(ks), (co,), jnp.float32)

    def bn(c):
        gamma = 1.0 + 0.1 * jax.random.normal(next(ks), (c,), jnp.float32)
        beta = 0.1 * jax.random.normal(next(ks), (c,), jnp.float32)
        mean = 0.1 * jax.random.normal(next(ks), (c,), jnp.float32)
        var = 0.5 + 0.5 * jnp.abs(jax.random.normal(next(ks), (c,), jnp.float32))
        return (gamma, beta, mean, var)

    return {
        'w1': conv_w(C, inchannel, 1, 1), 'b1': conv_b(C), 'bn1': bn(C),
        'wr6': conv_w(C, inchannel, 3, 3), 'br6': conv_b(C), 'bnr6': bn(C),
        'wr12': conv_w(C, inchannel, 3, 3), 'br12': conv_b(C), 'bnr12': bn(C),
        'wr18': conv_w(C, inchannel, 3, 3), 'br18': conv_b(C), 'bnr18': bn(C),
        'wp': conv_w(C, inchannel, 1, 1), 'bp': conv_b(C), 'bnp': bn(C),
        'wf': conv_w(outchannel, 5 * C, 1, 1), 'bf': conv_b(outchannel),
    }


# --------------------------------- main ------------------------------------ #

if __name__ == "__main__":
    key = jax.random.PRNGKey(0)
    kx, kp = jax.random.split(key)

    inchannel, outchannel = 8, 16
    N, H, W = 2, 16, 16

    x = jax.random.normal(kx, (N, inchannel, H, W), jnp.float32)
    params = init_params(kp, inchannel, outchannel)

    aspp = jax.jit(aspp_forward)
    out = jax.block_until_ready(aspp(x, params))
    assert out.shape == (N, outchannel, H, W)

    ref = aspp_reference(x, params)
    err = float(jnp.max(jnp.abs(out - ref)))
    assert err < 5e-2, f"mismatch vs reference: {err}"   # bf16 MXU tolerance

    print("KERNEL_OK")
</pallas_src>

<mosaic_0001>
module attributes {stable_mosaic.version = 11 : i64} {
  func.func @_fused_matmul_kernel(%arg0: i32, %arg1: i32, %arg2: i32, %arg3: memref<256x128xbf16, #tpu.memory_space<vmem>>, %arg4: memref<128x128xbf16, #tpu.memory_space<vmem>>, %arg5: memref<1x128xf32, #tpu.memory_space<vmem>>, %arg6: memref<256x128xbf16, #tpu.memory_space<vmem>>, %arg7: memref<256x128xf32, #tpu.memory_space<vmem>>) attributes {dimension_semantics = [#tpu.dimension_semantics<parallel>, #tpu.dimension_semantics<parallel>, #tpu.dimension_semantics<arbitrary>], iteration_bounds = array<i64: 2, 1, 1>, scalar_prefetch = 0 : i64, scratch_operands = 1 : i64, tpu.core_type = #tpu.core_type<tc>, window_params = [{transform_indices = @transform_0, window_bounds = array<i64: 256, 128>}, {transform_indices = @transform_1, window_bounds = array<i64: 128, 128>}, {transform_indices = @transform_2, window_bounds = array<i64: 1, 128>}, {transform_indices = @transform_3, window_bounds = array<i64: 256, 128>}]} {
    %c0_i32 = arith.constant 0 : i32
    %0 = arith.cmpi eq, %arg2, %c0_i32 : i32
    %1 = arith.extui %0 : i1 to i32
    %c0_i32_0 = arith.constant 0 : i32
    %2 = arith.cmpi ne, %1, %c0_i32_0 : i32
    scf.if %2 {
      %cst_10 = arith.constant 0.000000e+00 : f32
      %12 = vector.broadcast %cst_10 : f32 to vector<256x128xf32>
      %c0_11 = arith.constant 0 : index
      %c0_12 = arith.constant 0 : index
      %13 = vector.load %arg7[%c0_11, %c0_12] : memref<256x128xf32, #tpu.memory_space<vmem>>, vector<256x128xf32>
      tpu.vector_store %arg7[%c0_11, %c0_12], %12 {strides = array<i32>} : memref<256x128xf32, #tpu.memory_space<vmem>>, vector<256x128xf32>,
    } else {
    }
    %c0 = arith.constant 0 : index
    %c0_1 = arith.constant 0 : index
    %3 = vector.load %arg7[%c0, %c0_1] : memref<256x128xf32, #tpu.memory_space<vmem>>, vector<256x128xf32>
    %c0_2 = arith.constant 0 : index
    %c0_3 = arith.constant 0 : index
    %4 = vector.load %arg3[%c0_2, %c0_3] : memref<256x128xbf16, #tpu.memory_space<vmem>>, vector<256x128xbf16>
    %c0_4 = arith.constant 0 : index
    %c0_5 = arith.constant 0 : index
    %5 = vector.load %arg4[%c0_4, %c0_5] : memref<128x128xbf16, #tpu.memory_space<vmem>>, vector<128x128xbf16>
    %cst = arith.constant dense<0.000000e+00> : vector<256x128xf32>
    %6 = tpu.matmul %4, %5, %cst {dimension_numbers = #tpu.dot_dimension_numbers<[1], [0], [0], [1], [0, 0, 1, 1], [], []>} : vector<256x128xbf16>, vector<128x128xbf16>, vector<256x128xf32> -> vector<256x128xf32>
    %7 = arith.addf %3, %6 : vector<256x128xf32>
    %c0_6 = arith.constant 0 : index
    %c0_7 = arith.constant 0 : index
    %8 = vector.load %arg7[%c0_6, %c0_7] : memref<256x128xf32, #tpu.memory_space<vmem>>, vector<256x128xf32>
    tpu.vector_store %arg7[%c0_6, %c0_7], %7 {strides = array<i32>} : memref<256x128xf32, #tpu.memory_space<vmem>>, vector<256x128xf32>,
    %c0_i32_8 = arith.constant 0 : i32
    %9 = arith.cmpi eq, %arg2, %c0_i32_8 : i32
    %10 = arith.extui %9 : i1 to i32
    %c0_i32_9 = arith.constant 0 : i32
    %11 = arith.cmpi ne, %10, %c0_i32_9 : i32
    scf.if %11 {
      %c0_10 = arith.constant 0 : index
      %c0_11 = arith.constant 0 : index
      %12 = vector.load %arg7[%c0_10, %c0_11] : memref<256x128xf32, #tpu.memory_space<vmem>>, vector<256x128xf32>
      %c0_12 = arith.constant 0 : index
      %c0_13 = arith.constant 0 : index
      %13 = vector.load %arg5[%c0_12, %c0_13] : memref<1x128xf32, #tpu.memory_space<vmem>>, vector<1x128xf32>
      %14 = vector.broadcast %13 : vector<1x128xf32> to vector<256x128xf32>
      %15 = arith.addf %12, %14 : vector<256x128xf32>
      %cst_14 = arith.constant 0.000000e+00 : f32
      %16 = vector.broadcast %cst_14 : f32 to vector<256x128xf32>
      %17 = arith.maximumf %15, %16 : vector<256x128xf32>
      %18 = arith.truncf %17 : vector<256x128xf32> to vector<256x128xbf16>
      %c0_15 = arith.constant 0 : index
      %c0_16 = arith.constant 0 : index
      %19 = vector.load %arg6[%c0_15, %c0_16] : memref<256x128xbf16, #tpu.memory_space<vmem>>, vector<256x128xbf16>
      tpu.vector_store %arg6[%c0_15, %c0_16], %18 {strides = array<i32>} : memref<256x128xbf16, #tpu.memory_space<vmem>>, vector<256x128xbf16>,
    } else {
    }
    return
  }
  func.func @transform_0(%arg0: i32, %arg1: i32, %arg2: i32) -> (i32, i32) {
    %c0_i32 = arith.constant 0 : i32
    return %arg0, %arg2 : i32, i32
  }
  func.func @transform_1(%arg0: i32, %arg1: i32, %arg2: i32) -> (i32, i32) {
    %c0_i32 = arith.constant 0 : i32
    return %arg2, %arg1 : i32, i32
  }
  func.func @transform_2(%arg0: i32, %arg1: i32, %arg2: i32) -> (i32, i32) {
    %c0_i32 = arith.constant 0 : i32
    %c0_i32_0 = arith.constant 0 : i32
    return %c0_i32, %arg1 : i32, i32
  }
  func.func @transform_3(%arg0: i32, %arg1: i32, %arg2: i32) -> (i32, i32) {
    %c0_i32 = arith.constant 0 : i32
    return %arg0, %arg1 : i32, i32
  }
}

module attributes {stable_mosaic.version = 11 : i64} {
  func.func @_dilated_conv_kernel(%arg0: i32, %arg1: i32, %arg2: memref<1x52x52x8xbf16, #tpu.memory_space<vmem>>, %arg3: memref<9x8x128xbf16, #tpu.memory_space<vmem>>, %arg4: memref<1x128xf32, #tpu.memory_space<vmem>>, %arg5: memref<16x128xbf16, #tpu.memory_space<vmem>>) attributes {dimension_semantics = [#tpu.dimension_semantics<parallel>, #tpu.dimension_semantics<arbitrary>], iteration_bounds = array<i64: 2, 16>, scalar_prefetch = 0 : i64, scratch_operands = 0 : i64, tpu.core_type = #tpu.core_type<tc>, window_params = [{transform_indices = @transform_0, window_bounds = array<i64: 1, 52, 52, 8>}, {pipeline_mode = #tpu.pipeline_mode<synchronous>, transform_indices = @transform_1, window_bounds = array<i64: 9, 8, 128>}, {pipeline_mode = #tpu.pipeline_mode<synchronous>, transform_indices = @transform_2, window_bounds = array<i64: 1, 128>}, {transform_indices = @transform_3, window_bounds = array<i64: 16, 128>}]} {
    %cst = arith.constant 0.000000e+00 : f32
    %0 = vector.broadcast %cst : f32 to vector<16x128xf32>
    %c0_i32 = arith.constant 0 : i32
    %1 = arith.addi %arg1, %c0_i32 : i32
    %c12_i32 = arith.constant 12 : i32
    %2 = arith.addi %1, %c12_i32 : i32
    %c0 = arith.constant 0 : index
    %3 = arith.index_cast %2 : i32 to index
    %c0_0 = arith.constant 0 : index
    %c0_1 = arith.constant 0 : index
    %4 = vector.load %arg2[%c0, %3, %c0_0, %c0_1] : memref<1x52x52x8xbf16, #tpu.memory_space<vmem>>, vector<1x1x52x8xbf16>
    %5 = vector.shape_cast %4 : vector<1x1x52x8xbf16> to vector<52x8xbf16>
    %6 = vector.extract_strided_slice %5 {offsets = [12, 0], sizes = [16, 8], strides = [1, 1]} : vector<52x8xbf16> to vector<16x8xbf16>
    %c0_2 = arith.constant 0 : index
    %c0_3 = arith.constant 0 : index
    %c0_4 = arith.constant 0 : index
    %7 = vector.load %arg3[%c0_2, %c0_3, %c0_4] : memref<9x8x128xbf16, #tpu.memory_space<vmem>>, vector<1x8x128xbf16>
    %8 = vector.shape_cast %7 : vector<1x8x128xbf16> to vector<8x128xbf16>
    %cst_5 = arith.constant dense<0.000000e+00> : vector<16x128xf32>
    %9 = tpu.matmul %6, %8, %cst_5 {dimension_numbers = #tpu.dot_dimension_numbers<[1], [0], [0], [1], [0, 0, 1, 1], [], []>} : vector<16x8xbf16>, vector<8x128xbf16>, vector<16x128xf32> -> vector<16x128xf32>
    %10 = arith.addf %0, %9 : vector<16x128xf32>
    %11 = vector.extract_strided_slice %5 {offsets = [18, 0], sizes = [16, 8], strides = [1, 1]} : vector<52x8xbf16> to vector<16x8xbf16>
    %c1 = arith.constant 1 : index
    %c0_6 = arith.constant 0 : index
    %c0_7 = arith.constant 0 : index
    %12 = vector.load %arg3[%c1, %c0_6, %c0_7] : memref<9x8x128xbf16, #tpu.memory_space<vmem>>, vector<1x8x128xbf16>
    %13 = vector.shape_cast %12 : vector<1x8x128xbf16> to vector<8x128xbf16>
    %cst_8 = arith.constant dense<0.000000e+00> : vector<16x128xf32>
    %14 = tpu.matmul %11, %13, %cst_8 {dimension_numbers = #tpu.dot_dimension_numbers<[1], [0], [0], [1], [0, 0, 1, 1], [], []>} : vector<16x8xbf16>, vector<8x128xbf16>, vector<16x128xf32> -> vector<16x128xf32>
    %15 = arith.addf %10, %14 : vector<16x128xf32>
    %16 = vector.extract_strided_slice %5 {offsets = [24, 0], sizes = [16, 8], strides = [1, 1]} : vector<52x8xbf16> to vector<16x8xbf16>
    %c2 = arith.constant 2 : index
    %c0_9 = arith.constant 0 : index
    %c0_10 = arith.constant 0 : index
    %17 = vector.load %arg3[%c2, %c0_9, %c0_10] : memref<9x8x128xbf16, #tpu.memory_space<vmem>>, vector<1x8x128xbf16>
    %18 = vector.shape_cast %17 : vector<1x8x128xbf16> to vector<8x128xbf16>
    %cst_11 = arith.constant dense<0.000000e+00> : vector<16x128xf32>
    %19 = tpu.matmul %16, %18, %cst_11 {dimension_numbers = #tpu.dot_dimension_numbers<[1], [0], [0], [1], [0, 0, 1, 1], [], []>} : vector<16x8xbf16>, vector<8x128xbf16>, vector<16x128xf32> -> vector<16x128xf32>
    %20 = arith.addf %15, %19 : vector<16x128xf32>
    %c6_i32 = arith.constant 6 : i32
    %21 = arith.addi %arg1, %c6_i32 : i32
    %c12_i32_12 = arith.constant 12 : i32
    %22 = arith.addi %21, %c12_i32_12 : i32
    %c0_13 = arith.constant 0 : index
    %23 = arith.index_cast %22 : i32 to index
    %c0_14 = arith.constant 0 : index
    %c0_15 = arith.constant 0 : index
    %24 = vector.load %arg2[%c0_13, %23, %c0_14, %c0_15] : memref<1x52x52x8xbf16, #tpu.memory_space<vmem>>, vector<1x1x52x8xbf16>
    %25 = vector.shape_cast %24 : vector<1x1x52x8xbf16> to vector<52x8xbf16>
    %26 = vector.extract_strided_slice %25 {offsets = [12, 0], sizes = [16, 8], strides = [1, 1]} : vector<52x8xbf16> to vector<16x8xbf16>
    %c3 = arith.constant 3 : index
    %c0_16 = arith.constant 0 : index
    %c0_17 = arith.constant 0 : index
    %27 = vector.load %arg3[%c3, %c0_16, %c0_17] : memref<9x8x128xbf16, #tpu.memory_space<vmem>>, vector<1x8x128xbf16>
    %28 = vector.shape_cast %27 : vector<1x8x128xbf16> to vector<8x128xbf16>
    %cst_18 = arith.constant dense<0.000000e+00> : vector<16x128xf32>
    %29 = tpu.matmul %26, %28, %cst_18 {dimension_numbers = #tpu.dot_dimension_numbers<[1], [0], [0], [1], [0, 0, 1, 1], [], []>} : vector<16x8xbf16>, vector<8x128xbf16>, vector<16x128xf32> -> vector<16x128xf32>
    %30 = arith.addf %20, %29 : vector<16x128xf32>
    %31 = vector.extract_strided_slice %25 {offsets = [18, 0], sizes = [16, 8], strides = [1, 1]} : vector<52x8xbf16> to vector<16x8xbf16>
    %c4 = arith.constant 4 : index
    %c0_19 = arith.constant 0 : index
    %c0_20 = arith.constant 0 : index
    %32 = vector.load %arg3[%c4, %c0_19, %c0_20] : memref<9x8x128xbf16, #tpu.memory_space<vmem>>, vector<1x8x128xbf16>
    %33 = vector.shape_cast %32 : vector<1x8x128xbf16> to vector<8x128xbf16>
    %cst_21 = arith.constant dense<0.000000e+00> : vector<16x128xf32>
    %34 = tpu.matmul %31, %33, %cst_21 {dimension_numbers = #tpu.dot_dimension_numbers<[1], [0], [0], [1], [0, 0, 1, 1], [], []>} : vector<16x8xbf16>, vector<8x128xbf16>, vector<16x128xf32> -> vector<16x128xf32>
    %35 = arith.addf %30, %34 : vector<16x128xf32>
    %36 = vector.extract_strided_slice %25 {offsets = [24, 0], sizes = [16, 8], strides = [1, 1]} : vector<52x8xbf16> to vector<16x8xbf16>
    %c5 = arith.constant 5 : index
    %c0_22 = arith.constant 0 : index
    %c0_23 = arith.constant 0 : index
    %37 = vector.load %arg3[%c5, %c0_22, %c0_23] : memref<9x8x128xbf16, #tpu.memory_space<vmem>>, vector<1x8x128xbf16>
    %38 = vector.shape_cast %37 : vector<1x8x128xbf16> to vector<8x128xbf16>
    %cst_24 = arith.constant dense<0.000000e+00> : vector<16x128xf32>
    %39 = tpu.matmul %36, %38, %cst_24 {dimension_numbers = #tpu.dot_dimension_numbers<[1], [0], [0], [1], [0, 0, 1, 1], [], []>} : vector<16x8xbf16>, vector<8x128xbf16>, vector<16x128xf32> -> vector<16x128xf32>
    %40 = arith.addf %35, %39 : vector<16x128xf32>
    %c12_i32_25 = arith.constant 12 : i32
    %41 = arith.addi %arg1, %c12_i32_25 : i32
    %c12_i32_26 = arith.constant 12 : i32
    %42 = arith.addi %41, %c12_i32_26 : i32
    %c0_27 = arith.constant 0 : index
    %43 = arith.index_cast %42 : i32 to index
    %c0_28 = arith.constant 0 : index
    %c0_29 = arith.constant 0 : index
    %44 = vector.load %arg2[%c0_27, %43, %c0_28, %c0_29] : memref<1x52x52x8xbf16, #tpu.memory_space<vmem>>, vector<1x1x52x8xbf16>
    %45 = vector.shape_cast %44 : vector<1x1x52x8xbf16> to vector<52x8xbf16>
    %46 = vector.extract_strided_slice %45 {offsets = [12, 0], sizes = [16, 8], strides = [1, 1]} : vector<52x8xbf16> to vector<16x8xbf16>
    %c6 = arith.constant 6 : index
    %c0_30 = arith.constant 0 : index
    %c0_31 = arith.constant 0 : index
    %47 = vector.load %arg3[%c6, %c0_30, %c0_31] : memref<9x8x128xbf16, #tpu.memory_space<vmem>>, vector<1x8x128xbf16>
    %48 = vector.shape_cast %47 : vector<1x8x128xbf16> to vector<8x128xbf16>
    %cst_32 = arith.constant dense<0.000000e+00> : vector<16x128xf32>
    %49 = tpu.matmul %46, %48, %cst_32 {dimension_numbers = #tpu.dot_dimension_numbers<[1], [0], [0], [1], [0, 0, 1, 1], [], []>} : vector<16x8xbf16>, vector<8x128xbf16>, vector<16x128xf32> -> vector<16x128xf32>
    %50 = arith.addf %40, %49 : vector<16x128xf32>
    %51 = vector.extract_strided_slice %45 {offsets = [18, 0], sizes = [16, 8], strides = [1, 1]} : vector<52x8xbf16> to vector<16x8xbf16>
    %c7 = arith.constant 7 : index
    %c0_33 = arith.constant 0 : index
    %c0_34 = arith.constant 0 : index
    %52 = vector.load %arg3[%c7, %c0_33, %c0_34] : memref<9x8x128xbf16, #tpu.memory_space<vmem>>, vector<1x8x128xbf16>
    %53 = vector.shape_cast %52 : vector<1x8x128xbf16> to vector<8x128xbf16>
    %cst_35 = arith.constant dense<0.000000e+00> : vector<16x128xf32>
    %54 = tpu.matmul %51, %53, %cst_35 {dimension_numbers = #tpu.dot_dimension_numbers<[1], [0], [0], [1], [0, 0, 1, 1], [], []>} : vector<16x8xbf16>, vector<8x128xbf16>, vector<16x128xf32> -> vector<16x128xf32>
    %55 = arith.addf %50, %54 : vector<16x128xf32>
    %56 = vector.extract_strided_slice %45 {offsets = [24, 0], sizes = [16, 8], strides = [1, 1]} : vector<52x8xbf16> to vector<16x8xbf16>
    %c8 = arith.constant 8 : index
    %c0_36 = arith.constant 0 : index
    %c0_37 = arith.constant 0 : index
    %57 = vector.load %arg3[%c8, %c0_36, %c0_37] : memref<9x8x128xbf16, #tpu.memory_space<vmem>>, vector<1x8x128xbf16>
    %58 = vector.shape_cast %57 : vector<1x8x128xbf16> to vector<8x128xbf16>
    %cst_38 = arith.constant dense<0.000000e+00> : vector<16x128xf32>
    %59 = tpu.matmul %56, %58, %cst_38 {dimension_numbers = #tpu.dot_dimension_numbers<[1], [0], [0], [1], [0, 0, 1, 1], [], []>} : vector<16x8xbf16>, vector<8x128xbf16>, vector<16x128xf32> -> vector<16x128xf32>
    %60 = arith.addf %55, %59 : vector<16x128xf32>
    %c0_39 = arith.constant 0 : index
    %c0_40 = arith.constant 0 : index
    %61 = vector.load %arg4[%c0_39, %c0_40] : memref<1x128xf32, #tpu.memory_space<vmem>>, vector<1x128xf32>
    %62 = vector.broadcast %61 : vector<1x128xf32> to vector<16x128xf32>
    %63 = arith.addf %60, %62 : vector<16x128xf32>
    %cst_41 = arith.constant 0.000000e+00 : f32
    %64 = vector.broadcast %cst_41 : f32 to vector<16x128xf32>
    %65 = arith.maximumf %63, %64 : vector<16x128xf32>
    %66 = arith.truncf %65 : vector<16x128xf32> to vector<16x128xbf16>
    %c0_42 = arith.constant 0 : index
    %c0_43 = arith.constant 0 : index
    %67 = vector.load %arg5[%c0_42, %c0_43] : memref<16x128xbf16, #tpu.memory_space<vmem>>, vector<16x128xbf16>
    tpu.vector_store %arg5[%c0_42, %c0_43], %66 {strides = array<i32>} : memref<16x128xbf16, #tpu.memory_space<vmem>>, vector<16x128xbf16>,
    return
  }
  func.func @transform_0(%arg0: i32, %arg1: i32) -> (i32, i32, i32, i32) {
    %c0_i32 = arith.constant 0 : i32
    %c0_i32_0 = arith.constant 0 : i32
    %c0_i32_1 = arith.constant 0 : i32
    %c0_i32_2 = arith.constant 0 : i32
    return %arg0, %c0_i32, %c0_i32_0, %c0_i32_1 : i32, i32, i32, i32
  }
  func.func @transform_1(%arg0: i32, %arg1: i32) -> (i32, i32, i32) {
    %c0_i32 = arith.constant 0 : i32
    %c0_i32_0 = arith.constant 0 : i32
    %c0_i32_1 = arith.constant 0 : i32
    %c0_i32_2 = arith.constant 0 : i32
    return %c0_i32, %c0_i32_0, %c0_i32_1 : i32, i32, i32
  }
  func.func @transform_2(%arg0: i32, %arg1: i32) -> (i32, i32) {
    %c0_i32 = arith.constant 0 : i32
    %c0_i32_0 = arith.constant 0 : i32
    %c0_i32_1 = arith.constant 0 : i32
    return %c0_i32, %c0_i32_0 : i32, i32
  }
  func.func @transform_3(%arg0: i32, %arg1: i32) -> (i32, i32) {
    %c16_i32 = arith.constant 16 : i32
    %0 = arith.muli %arg0, %c16_i32 : i32
    %1 = arith.addi %0, %arg1 : i32
    %c0_i32 = arith.constant 0 : i32
    %c0_i32_0 = arith.constant 0 : i32
    return %1, %c0_i32 : i32, i32
  }
}

module attributes {stable_mosaic.version = 11 : i64} {
  func.func @_dilated_conv_kernel(%arg0: i32, %arg1: i32, %arg2: memref<1x52x52x8xbf16, #tpu.memory_space<vmem>>, %arg3: memref<9x8x128xbf16, #tpu.memory_space<vmem>>, %arg4: memref<1x128xf32, #tpu.memory_space<vmem>>, %arg5: memref<16x128xbf16, #tpu.memory_space<vmem>>) attributes {dimension_semantics = [#tpu.dimension_semantics<parallel>, #tpu.dimension_semantics<arbitrary>], iteration_bounds = array<i64: 2, 16>, scalar_prefetch = 0 : i64, scratch_operands = 0 : i64, tpu.core_type = #tpu.core_type<tc>, window_params = [{transform_indices = @transform_0, window_bounds = array<i64: 1, 52, 52, 8>}, {pipeline_mode = #tpu.pipeline_mode<synchronous>, transform_indices = @transform_1, window_bounds = array<i64: 9, 8, 128>}, {pipeline_mode = #tpu.pipeline_mode<synchronous>, transform_indices = @transform_2, window_bounds = array<i64: 1, 128>}, {transform_indices = @transform_3, window_bounds = array<i64: 16, 128>}]} {
    %cst = arith.constant 0.000000e+00 : f32
    %0 = vector.broadcast %cst : f32 to vector<16x128xf32>
    %c0_i32 = arith.constant 0 : i32
    %1 = arith.addi %arg1, %c0_i32 : i32
    %c6_i32 = arith.constant 6 : i32
    %2 = arith.addi %1, %c6_i32 : i32
    %c0 = arith.constant 0 : index
    %3 = arith.index_cast %2 : i32 to index
    %c0_0 = arith.constant 0 : index
    %c0_1 = arith.constant 0 : index
    %4 = vector.load %arg2[%c0, %3, %c0_0, %c0_1] : memref<1x52x52x8xbf16, #tpu.memory_space<vmem>>, vector<1x1x52x8xbf16>
    %5 = vector.shape_cast %4 : vector<1x1x52x8xbf16> to vector<52x8xbf16>
    %6 = vector.extract_strided_slice %5 {offsets = [6, 0], sizes = [16, 8], strides = [1, 1]} : vector<52x8xbf16> to vector<16x8xbf16>
    %c0_2 = arith.constant 0 : index
    %c0_3 = arith.constant 0 : index
    %c0_4 = arith.constant 0 : index
    %7 = vector.load %arg3[%c0_2, %c0_3, %c0_4] : memref<9x8x128xbf16, #tpu.memory_space<vmem>>, vector<1x8x128xbf16>
    %8 = vector.shape_cast %7 : vector<1x8x128xbf16> to vector<8x128xbf16>
    %cst_5 = arith.constant dense<0.000000e+00> : vector<16x128xf32>
    %9 = tpu.matmul %6, %8, %cst_5 {dimension_numbers = #tpu.dot_dimension_numbers<[1], [0], [0], [1], [0, 0, 1, 1], [], []>} : vector<16x8xbf16>, vector<8x128xbf16>, vector<16x128xf32> -> vector<16x128xf32>
    %10 = arith.addf %0, %9 : vector<16x128xf32>
    %11 = vector.extract_strided_slice %5 {offsets = [18, 0], sizes = [16, 8], strides = [1, 1]} : vector<52x8xbf16> to vector<16x8xbf16>
    %c1 = arith.constant 1 : index
    %c0_6 = arith.constant 0 : index
    %c0_7 = arith.constant 0 : index
    %12 = vector.load %arg3[%c1, %c0_6, %c0_7] : memref<9x8x128xbf16, #tpu.memory_space<vmem>>, vector<1x8x128xbf16>
    %13 = vector.shape_cast %12 : vector<1x8x128xbf16> to vector<8x128xbf16>
    %cst_8 = arith.constant dense<0.000000e+00> : vector<16x128xf32>
    %14 = tpu.matmul %11, %13, %cst_8 {dimension_numbers = #tpu.dot_dimension_numbers<[1], [0], [0], [1], [0, 0, 1, 1], [], []>} : vector<16x8xbf16>, vector<8x128xbf16>, vector<16x128xf32> -> vector<16x128xf32>
    %15 = arith.addf %10, %14 : vector<16x128xf32>
    %16 = vector.extract_strided_slice %5 {offsets = [30, 0], sizes = [16, 8], strides = [1, 1]} : vector<52x8xbf16> to vector<16x8xbf16>
    %c2 = arith.constant 2 : index
    %c0_9 = arith.constant 0 : index
    %c0_10 = arith.constant 0 : index
    %17 = vector.load %arg3[%c2, %c0_9, %c0_10] : memref<9x8x128xbf16, #tpu.memory_space<vmem>>, vector<1x8x128xbf16>
    %18 = vector.shape_cast %17 : vector<1x8x128xbf16> to vector<8x128xbf16>
    %cst_11 = arith.constant dense<0.000000e+00> : vector<16x128xf32>
    %19 = tpu.matmul %16, %18, %cst_11 {dimension_numbers = #tpu.dot_dimension_numbers<[1], [0], [0], [1], [0, 0, 1, 1], [], []>} : vector<16x8xbf16>, vector<8x128xbf16>, vector<16x128xf32> -> vector<16x128xf32>
    %20 = arith.addf %15, %19 : vector<16x128xf32>
    %c12_i32 = arith.constant 12 : i32
    %21 = arith.addi %arg1, %c12_i32 : i32
    %c6_i32_12 = arith.constant 6 : i32
    %22 = arith.addi %21, %c6_i32_12 : i32
    %c0_13 = arith.constant 0 : index
    %23 = arith.index_cast %22 : i32 to index
    %c0_14 = arith.constant 0 : index
    %c0_15 = arith.constant 0 : index
    %24 = vector.load %arg2[%c0_13, %23, %c0_14, %c0_15] : memref<1x52x52x8xbf16, #tpu.memory_space<vmem>>, vector<1x1x52x8xbf16>
    %25 = vector.shape_cast %24 : vector<1x1x52x8xbf16> to vector<52x8xbf16>
    %26 = vector.extract_strided_slice %25 {offsets = [6, 0], sizes = [16, 8], strides = [1, 1]} : vector<52x8xbf16> to vector<16x8xbf16>
    %c3 = arith.constant 3 : index
    %c0_16 = arith.constant 0 : index
    %c0_17 = arith.constant 0 : index
    %27 = vector.load %arg3[%c3, %c0_16, %c0_17] : memref<9x8x128xbf16, #tpu.memory_space<vmem>>, vector<1x8x128xbf16>
    %28 = vector.shape_cast %27 : vector<1x8x128xbf16> to vector<8x128xbf16>
    %cst_18 = arith.constant dense<0.000000e+00> : vector<16x128xf32>
    %29 = tpu.matmul %26, %28, %cst_18 {dimension_numbers = #tpu.dot_dimension_numbers<[1], [0], [0], [1], [0, 0, 1, 1], [], []>} : vector<16x8xbf16>, vector<8x128xbf16>, vector<16x128xf32> -> vector<16x128xf32>
    %30 = arith.addf %20, %29 : vector<16x128xf32>
    %31 = vector.extract_strided_slice %25 {offsets = [18, 0], sizes = [16, 8], strides = [1, 1]} : vector<52x8xbf16> to vector<16x8xbf16>
    %c4 = arith.constant 4 : index
    %c0_19 = arith.constant 0 : index
    %c0_20 = arith.constant 0 : index
    %32 = vector.load %arg3[%c4, %c0_19, %c0_20] : memref<9x8x128xbf16, #tpu.memory_space<vmem>>, vector<1x8x128xbf16>
    %33 = vector.shape_cast %32 : vector<1x8x128xbf16> to vector<8x128xbf16>
    %cst_21 = arith.constant dense<0.000000e+00> : vector<16x128xf32>
    %34 = tpu.matmul %31, %33, %cst_21 {dimension_numbers = #tpu.dot_dimension_numbers<[1], [0], [0], [1], [0, 0, 1, 1], [], []>} : vector<16x8xbf16>, vector<8x128xbf16>, vector<16x128xf32> -> vector<16x128xf32>
    %35 = arith.addf %30, %34 : vector<16x128xf32>
    %36 = vector.extract_strided_slice %25 {offsets = [30, 0], sizes = [16, 8], strides = [1, 1]} : vector<52x8xbf16> to vector<16x8xbf16>
    %c5 = arith.constant 5 : index
    %c0_22 = arith.constant 0 : index
    %c0_23 = arith.constant 0 : index
    %37 = vector.load %arg3[%c5, %c0_22, %c0_23] : memref<9x8x128xbf16, #tpu.memory_space<vmem>>, vector<1x8x128xbf16>
    %38 = vector.shape_cast %37 : vector<1x8x128xbf16> to vector<8x128xbf16>
    %cst_24 = arith.constant dense<0.000000e+00> : vector<16x128xf32>
    %39 = tpu.matmul %36, %38, %cst_24 {dimension_numbers = #tpu.dot_dimension_numbers<[1], [0], [0], [1], [0, 0, 1, 1], [], []>} : vector<16x8xbf16>, vector<8x128xbf16>, vector<16x128xf32> -> vector<16x128xf32>
    %40 = arith.addf %35, %39 : vector<16x128xf32>
    %c24_i32 = arith.constant 24 : i32
    %41 = arith.addi %arg1, %c24_i32 : i32
    %c6_i32_25 = arith.constant 6 : i32
    %42 = arith.addi %41, %c6_i32_25 : i32
    %c0_26 = arith.constant 0 : index
    %43 = arith.index_cast %42 : i32 to index
    %c0_27 = arith.constant 0 : index
    %c0_28 = arith.constant 0 : index
    %44 = vector.load %arg2[%c0_26, %43, %c0_27, %c0_28] : memref<1x52x52x8xbf16, #tpu.memory_space<vmem>>, vector<1x1x52x8xbf16>
    %45 = vector.shape_cast %44 : vector<1x1x52x8xbf16> to vector<52x8xbf16>
    %46 = vector.extract_strided_slice %45 {offsets = [6, 0], sizes = [16, 8], strides = [1, 1]} : vector<52x8xbf16> to vector<16x8xbf16>
    %c6 = arith.constant 6 : index
    %c0_29 = arith.constant 0 : index
    %c0_30 = arith.constant 0 : index
    %47 = vector.load %arg3[%c6, %c0_29, %c0_30] : memref<9x8x128xbf16, #tpu.memory_space<vmem>>, vector<1x8x128xbf16>
    %48 = vector.shape_cast %47 : vector<1x8x128xbf16> to vector<8x128xbf16>
    %cst_31 = arith.constant dense<0.000000e+00> : vector<16x128xf32>
    %49 = tpu.matmul %46, %48, %cst_31 {dimension_numbers = #tpu.dot_dimension_numbers<[1], [0], [0], [1], [0, 0, 1, 1], [], []>} : vector<16x8xbf16>, vector<8x128xbf16>, vector<16x128xf32> -> vector<16x128xf32>
    %50 = arith.addf %40, %49 : vector<16x128xf32>
    %51 = vector.extract_strided_slice %45 {offsets = [18, 0], sizes = [16, 8], strides = [1, 1]} : vector<52x8xbf16> to vector<16x8xbf16>
    %c7 = arith.constant 7 : index
    %c0_32 = arith.constant 0 : index
    %c0_33 = arith.constant 0 : index
    %52 = vector.load %arg3[%c7, %c0_32, %c0_33] : memref<9x8x128xbf16, #tpu.memory_space<vmem>>, vector<1x8x128xbf16>
    %53 = vector.shape_cast %52 : vector<1x8x128xbf16> to vector<8x128xbf16>
    %cst_34 = arith.constant dense<0.000000e+00> : vector<16x128xf32>
    %54 = tpu.matmul %51, %53, %cst_34 {dimension_numbers = #tpu.dot_dimension_numbers<[1], [0], [0], [1], [0, 0, 1, 1], [], []>} : vector<16x8xbf16>, vector<8x128xbf16>, vector<16x128xf32> -> vector<16x128xf32>
    %55 = arith.addf %50, %54 : vector<16x128xf32>
    %56 = vector.extract_strided_slice %45 {offsets = [30, 0], sizes = [16, 8], strides = [1, 1]} : vector<52x8xbf16> to vector<16x8xbf16>
    %c8 = arith.constant 8 : index
    %c0_35 = arith.constant 0 : index
    %c0_36 = arith.constant 0 : index
    %57 = vector.load %arg3[%c8, %c0_35, %c0_36] : memref<9x8x128xbf16, #tpu.memory_space<vmem>>, vector<1x8x128xbf16>
    %58 = vector.shape_cast %57 : vector<1x8x128xbf16> to vector<8x128xbf16>
    %cst_37 = arith.constant dense<0.000000e+00> : vector<16x128xf32>
    %59 = tpu.matmul %56, %58, %cst_37 {dimension_numbers = #tpu.dot_dimension_numbers<[1], [0], [0], [1], [0, 0, 1, 1], [], []>} : vector<16x8xbf16>, vector<8x128xbf16>, vector<16x128xf32> -> vector<16x128xf32>
    %60 = arith.addf %55, %59 : vector<16x128xf32>
    %c0_38 = arith.constant 0 : index
    %c0_39 = arith.constant 0 : index
    %61 = vector.load %arg4[%c0_38, %c0_39] : memref<1x128xf32, #tpu.memory_space<vmem>>, vector<1x128xf32>
    %62 = vector.broadcast %61 : vector<1x128xf32> to vector<16x128xf32>
    %63 = arith.addf %60, %62 : vector<16x128xf32>
    %cst_40 = arith.constant 0.000000e+00 : f32
    %64 = vector.broadcast %cst_40 : f32 to vector<16x128xf32>
    %65 = arith.maximumf %63, %64 : vector<16x128xf32>
    %66 = arith.truncf %65 : vector<16x128xf32> to vector<16x128xbf16>
    %c0_41 = arith.constant 0 : index
    %c0_42 = arith.constant 0 : index
    %67 = vector.load %arg5[%c0_41, %c0_42] : memref<16x128xbf16, #tpu.memory_space<vmem>>, vector<16x128xbf16>
    tpu.vector_store %arg5[%c0_41, %c0_42], %66 {strides = array<i32>} : memref<16x128xbf16, #tpu.memory_space<vmem>>, vector<16x128xbf16>,
    return
  }
  func.func @transform_0(%arg0: i32, %arg1: i32) -> (i32, i32, i32, i32) {
    %c0_i32 = arith.constant 0 : i32
    %c0_i32_0 = arith.constant 0 : i32
    %c0_i32_1 = arith.constant 0 : i32
    %c0_i32_2 = arith.constant 0 : i32
    return %arg0, %c0_i32, %c0_i32_0, %c0_i32_1 : i32, i32, i32, i32
  }
  func.func @transform_1(%arg0: i32, %arg1: i32) -> (i32, i32, i32) {
    %c0_i32 = arith.constant 0 : i32
    %c0_i32_0 = arith.constant 0 : i32
    %c0_i32_1 = arith.constant 0 : i32
    %c0_i32_2 = arith.constant 0 : i32
    return %c0_i32, %c0_i32_0, %c0_i32_1 : i32, i32, i32
  }
  func.func @transform_2(%arg0: i32, %arg1: i32) -> (i32, i32) {
    %c0_i32 = arith.constant 0 : i32
    %c0_i32_0 = arith.constant 0 : i32
    %c0_i32_1 = arith.constant 0 : i32
    return %c0_i32, %c0_i32_0 : i32, i32
  }
  func.func @transform_3(%arg0: i32, %arg1: i32) -> (i32, i32) {
    %c16_i32 = arith.constant 16 : i32
    %0 = arith.muli %arg0, %c16_i32 : i32
    %1 = arith.addi %0, %arg1 : i32
    %c0_i32 = arith.constant 0 : i32
    %c0_i32_0 = arith.constant 0 : i32
    return %1, %c0_i32 : i32, i32
  }
}

module attributes {stable_mosaic.version = 11 : i64} {
  func.func @_dilated_conv_kernel(%arg0: i32, %arg1: i32, %arg2: memref<1x52x52x8xbf16, #tpu.memory_space<vmem>>, %arg3: memref<9x8x128xbf16, #tpu.memory_space<vmem>>, %arg4: memref<1x128xf32, #tpu.memory_space<vmem>>, %arg5: memref<16x128xbf16, #tpu.memory_space<vmem>>) attributes {dimension_semantics = [#tpu.dimension_semantics<parallel>, #tpu.dimension_semantics<arbitrary>], iteration_bounds = array<i64: 2, 16>, scalar_prefetch = 0 : i64, scratch_operands = 0 : i64, tpu.core_type = #tpu.core_type<tc>, window_params = [{transform_indices = @transform_0, window_bounds = array<i64: 1, 52, 52, 8>}, {pipeline_mode = #tpu.pipeline_mode<synchronous>, transform_indices = @transform_1, window_bounds = array<i64: 9, 8, 128>}, {pipeline_mode = #tpu.pipeline_mode<synchronous>, transform_indices = @transform_2, window_bounds = array<i64: 1, 128>}, {transform_indices = @transform_3, window_bounds = array<i64: 16, 128>}]} {
    %cst = arith.constant 0.000000e+00 : f32
    %0 = vector.broadcast %cst : f32 to vector<16x128xf32>
    %c0_i32 = arith.constant 0 : i32
    %1 = arith.addi %arg1, %c0_i32 : i32
    %c0_i32_0 = arith.constant 0 : i32
    %2 = arith.addi %1, %c0_i32_0 : i32
    %c0 = arith.constant 0 : index
    %3 = arith.index_cast %2 : i32 to index
    %c0_1 = arith.constant 0 : index
    %c0_2 = arith.constant 0 : index
    %4 = vector.load %arg2[%c0, %3, %c0_1, %c0_2] : memref<1x52x52x8xbf16, #tpu.memory_space<vmem>>, vector<1x1x52x8xbf16>
    %5 = vector.shape_cast %4 : vector<1x1x52x8xbf16> to vector<52x8xbf16>
    %6 = vector.extract_strided_slice %5 {offsets = [0, 0], sizes = [16, 8], strides = [1, 1]} : vector<52x8xbf16> to vector<16x8xbf16>
    %c0_3 = arith.constant 0 : index
    %c0_4 = arith.constant 0 : index
    %c0_5 = arith.constant 0 : index
    %7 = vector.load %arg3[%c0_3, %c0_4, %c0_5] : memref<9x8x128xbf16, #tpu.memory_space<vmem>>, vector<1x8x128xbf16>
    %8 = vector.shape_cast %7 : vector<1x8x128xbf16> to vector<8x128xbf16>
    %cst_6 = arith.constant dense<0.000000e+00> : vector<16x128xf32>
    %9 = tpu.matmul %6, %8, %cst_6 {dimension_numbers = #tpu.dot_dimension_numbers<[1], [0], [0], [1], [0, 0, 1, 1], [], []>} : vector<16x8xbf16>, vector<8x128xbf16>, vector<16x128xf32> -> vector<16x128xf32>
    %10 = arith.addf %0, %9 : vector<16x128xf32>
    %11 = vector.extract_strided_slice %5 {offsets = [18, 0], sizes = [16, 8], strides = [1, 1]} : vector<52x8xbf16> to vector<16x8xbf16>
    %c1 = arith.constant 1 : index
    %c0_7 = arith.constant 0 : index
    %c0_8 = arith.constant 0 : index
    %12 = vector.load %arg3[%c1, %c0_7, %c0_8] : memref<9x8x128xbf16, #tpu.memory_space<vmem>>, vector<1x8x128xbf16>
    %13 = vector.shape_cast %12 : vector<1x8x128xbf16> to vector<8x128xbf16>
    %cst_9 = arith.constant dense<0.000000e+00> : vector<16x128xf32>
    %14 = tpu.matmul %11, %13, %cst_9 {dimension_numbers = #tpu.dot_dimension_numbers<[1], [0], [0], [1], [0, 0, 1, 1], [], []>} : vector<16x8xbf16>, vector<8x128xbf16>, vector<16x128xf32> -> vector<16x128xf32>
    %15 = arith.addf %10, %14 : vector<16x128xf32>
    %16 = vector.extract_strided_slice %5 {offsets = [36, 0], sizes = [16, 8], strides = [1, 1]} : vector<52x8xbf16> to vector<16x8xbf16>
    %c2 = arith.constant 2 : index
    %c0_10 = arith.constant 0 : index
    %c0_11 = arith.constant 0 : index
    %17 = vector.load %arg3[%c2, %c0_10, %c0_11] : memref<9x8x128xbf16, #tpu.memory_space<vmem>>, vector<1x8x128xbf16>
    %18 = vector.shape_cast %17 : vector<1x8x128xbf16> to vector<8x128xbf16>
    %cst_12 = arith.constant dense<0.000000e+00> : vector<16x128xf32>
    %19 = tpu.matmul %16, %18, %cst_12 {dimension_numbers = #tpu.dot_dimension_numbers<[1], [0], [0], [1], [0, 0, 1, 1], [], []>} : vector<16x8xbf16>, vector<8x128xbf16>, vector<16x128xf32> -> vector<16x128xf32>
    %20 = arith.addf %15, %19 : vector<16x128xf32>
    %c18_i32 = arith.constant 18 : i32
    %21 = arith.addi %arg1, %c18_i32 : i32
    %c0_i32_13 = arith.constant 0 : i32
    %22 = arith.addi %21, %c0_i32_13 : i32
    %c0_14 = arith.constant 0 : index
    %23 = arith.index_cast %22 : i32 to index
    %c0_15 = arith.constant 0 : index
    %c0_16 = arith.constant 0 : index
    %24 = vector.load %arg2[%c0_14, %23, %c0_15, %c0_16] : memref<1x52x52x8xbf16, #tpu.memory_space<vmem>>, vector<1x1x52x8xbf16>
    %25 = vector.shape_cast %24 : vector<1x1x52x8xbf16> to vector<52x8xbf16>
    %26 = vector.extract_strided_slice %25 {offsets = [0, 0], sizes = [16, 8], strides = [1, 1]} : vector<52x8xbf16> to vector<16x8xbf16>
    %c3 = arith.constant 3 : index
    %c0_17 = arith.constant 0 : index
    %c0_18 = arith.constant 0 : index
    %27 = vector.load %arg3[%c3, %c0_17, %c0_18] : memref<9x8x128xbf16, #tpu.memory_space<vmem>>, vector<1x8x128xbf16>
    %28 = vector.shape_cast %27 : vector<1x8x128xbf16> to vector<8x128xbf16>
    %cst_19 = arith.constant dense<0.000000e+00> : vector<16x128xf32>
    %29 = tpu.matmul %26, %28, %cst_19 {dimension_numbers = #tpu.dot_dimension_numbers<[1], [0], [0], [1], [0, 0, 1, 1], [], []>} : vector<16x8xbf16>, vector<8x128xbf16>, vector<16x128xf32> -> vector<16x128xf32>
    %30 = arith.addf %20, %29 : vector<16x128xf32>
    %31 = vector.extract_strided_slice %25 {offsets = [18, 0], sizes = [16, 8], strides = [1, 1]} : vector<52x8xbf16> to vector<16x8xbf16>
    %c4 = arith.constant 4 : index
    %c0_20 = arith.constant 0 : index
    %c0_21 = arith.constant 0 : index
    %32 = vector.load %arg3[%c4, %c0_20, %c0_21] : memref<9x8x128xbf16, #tpu.memory_space<vmem>>, vector<1x8x128xbf16>
    %33 = vector.shape_cast %32 : vector<1x8x128xbf16> to vector<8x128xbf16>
    %cst_22 = arith.constant dense<0.000000e+00> : vector<16x128xf32>
    %34 = tpu.matmul %31, %33, %cst_22 {dimension_numbers = #tpu.dot_dimension_numbers<[1], [0], [0], [1], [0, 0, 1, 1], [], []>} : vector<16x8xbf16>, vector<8x128xbf16>, vector<16x128xf32> -> vector<16x128xf32>
    %35 = arith.addf %30, %34 : vector<16x128xf32>
    %36 = vector.extract_strided_slice %25 {offsets = [36, 0], sizes = [16, 8], strides = [1, 1]} : vector<52x8xbf16> to vector<16x8xbf16>
    %c5 = arith.constant 5 : index
    %c0_23 = arith.constant 0 : index
    %c0_24 = arith.constant 0 : index
    %37 = vector.load %arg3[%c5, %c0_23, %c0_24] : memref<9x8x128xbf16, #tpu.memory_space<vmem>>, vector<1x8x128xbf16>
    %38 = vector.shape_cast %37 : vector<1x8x128xbf16> to vector<8x128xbf16>
    %cst_25 = arith.constant dense<0.000000e+00> : vector<16x128xf32>
    %39 = tpu.matmul %36, %38, %cst_25 {dimension_numbers = #tpu.dot_dimension_numbers<[1], [0], [0], [1], [0, 0, 1, 1], [], []>} : vector<16x8xbf16>, vector<8x128xbf16>, vector<16x128xf32> -> vector<16x128xf32>
    %40 = arith.addf %35, %39 : vector<16x128xf32>
    %c36_i32 = arith.constant 36 : i32
    %41 = arith.addi %arg1, %c36_i32 : i32
    %c0_i32_26 = arith.constant 0 : i32
    %42 = arith.addi %41, %c0_i32_26 : i32
    %c0_27 = arith.constant 0 : index
    %43 = arith.index_cast %42 : i32 to index
    %c0_28 = arith.constant 0 : index
    %c0_29 = arith.constant 0 : index
    %44 = vector.load %arg2[%c0_27, %43, %c0_28, %c0_29] : memref<1x52x52x8xbf16, #tpu.memory_space<vmem>>, vector<1x1x52x8xbf16>
    %45 = vector.shape_cast %44 : vector<1x1x52x8xbf16> to vector<52x8xbf16>
    %46 = vector.extract_strided_slice %45 {offsets = [0, 0], sizes = [16, 8], strides = [1, 1]} : vector<52x8xbf16> to vector<16x8xbf16>
    %c6 = arith.constant 6 : index
    %c0_30 = arith.constant 0 : index
    %c0_31 = arith.constant 0 : index
    %47 = vector.load %arg3[%c6, %c0_30, %c0_31] : memref<9x8x128xbf16, #tpu.memory_space<vmem>>, vector<1x8x128xbf16>
    %48 = vector.shape_cast %47 : vector<1x8x128xbf16> to vector<8x128xbf16>
    %cst_32 = arith.constant dense<0.000000e+00> : vector<16x128xf32>
    %49 = tpu.matmul %46, %48, %cst_32 {dimension_numbers = #tpu.dot_dimension_numbers<[1], [0], [0], [1], [0, 0, 1, 1], [], []>} : vector<16x8xbf16>, vector<8x128xbf16>, vector<16x128xf32> -> vector<16x128xf32>
    %50 = arith.addf %40, %49 : vector<16x128xf32>
    %51 = vector.extract_strided_slice %45 {offsets = [18, 0], sizes = [16, 8], strides = [1, 1]} : vector<52x8xbf16> to vector<16x8xbf16>
    %c7 = arith.constant 7 : index
    %c0_33 = arith.constant 0 : index
    %c0_34 = arith.constant 0 : index
    %52 = vector.load %arg3[%c7, %c0_33, %c0_34] : memref<9x8x128xbf16, #tpu.memory_space<vmem>>, vector<1x8x128xbf16>
    %53 = vector.shape_cast %52 : vector<1x8x128xbf16> to vector<8x128xbf16>
    %cst_35 = arith.constant dense<0.000000e+00> : vector<16x128xf32>
    %54 = tpu.matmul %51, %53, %cst_35 {dimension_numbers = #tpu.dot_dimension_numbers<[1], [0], [0], [1], [0, 0, 1, 1], [], []>} : vector<16x8xbf16>, vector<8x128xbf16>, vector<16x128xf32> -> vector<16x128xf32>
    %55 = arith.addf %50, %54 : vector<16x128xf32>
    %56 = vector.extract_strided_slice %45 {offsets = [36, 0], sizes = [16, 8], strides = [1, 1]} : vector<52x8xbf16> to vector<16x8xbf16>
    %c8 = arith.constant 8 : index
    %c0_36 = arith.constant 0 : index
    %c0_37 = arith.constant 0 : index
    %57 = vector.load %arg3[%c8, %c0_36, %c0_37] : memref<9x8x128xbf16, #tpu.memory_space<vmem>>, vector<1x8x128xbf16>
    %58 = vector.shape_cast %57 : vector<1x8x128xbf16> to vector<8x128xbf16>
    %cst_38 = arith.constant dense<0.000000e+00> : vector<16x128xf32>
    %59 = tpu.matmul %56, %58, %cst_38 {dimension_numbers = #tpu.dot_dimension_numbers<[1], [0], [0], [1], [0, 0, 1, 1], [], []>} : vector<16x8xbf16>, vector<8x128xbf16>, vector<16x128xf32> -> vector<16x128xf32>
    %60 = arith.addf %55, %59 : vector<16x128xf32>
    %c0_39 = arith.constant 0 : index
    %c0_40 = arith.constant 0 : index
    %61 = vector.load %arg4[%c0_39, %c0_40] : memref<1x128xf32, #tpu.memory_space<vmem>>, vector<1x128xf32>
    %62 = vector.broadcast %61 : vector<1x128xf32> to vector<16x128xf32>
    %63 = arith.addf %60, %62 : vector<16x128xf32>
    %cst_41 = arith.constant 0.000000e+00 : f32
    %64 = vector.broadcast %cst_41 : f32 to vector<16x128xf32>
    %65 = arith.maximumf %63, %64 : vector<16x128xf32>
    %66 = arith.truncf %65 : vector<16x128xf32> to vector<16x128xbf16>
    %c0_42 = arith.constant 0 : index
    %c0_43 = arith.constant 0 : index
    %67 = vector.load %arg5[%c0_42, %c0_43] : memref<16x128xbf16, #tpu.memory_space<vmem>>, vector<16x128xbf16>
    tpu.vector_store %arg5[%c0_42, %c0_43], %66 {strides = array<i32>} : memref<16x128xbf16, #tpu.memory_space<vmem>>, vector<16x128xbf16>,
    return
  }
  func.func @transform_0(%arg0: i32, %arg1: i32) -> (i32, i32, i32, i32) {
    %c0_i32 = arith.constant 0 : i32
    %c0_i32_0 = arith.constant 0 : i32
    %c0_i32_1 = arith.constant 0 : i32
    %c0_i32_2 = arith.constant 0 : i32
    return %arg0, %c0_i32, %c0_i32_0, %c0_i32_1 : i32, i32, i32, i32
  }
  func.func @transform_1(%arg0: i32, %arg1: i32) -> (i32, i32, i32) {
    %c0_i32 = arith.constant 0 : i32
    %c0_i32_0 = arith.constant 0 : i32
    %c0_i32_1 = arith.constant 0 : i32
    %c0_i32_2 = arith.constant 0 : i32
    return %c0_i32, %c0_i32_0, %c0_i32_1 : i32, i32, i32
  }
  func.func @transform_2(%arg0: i32, %arg1: i32) -> (i32, i32) {
    %c0_i32 = arith.constant 0 : i32
    %c0_i32_0 = arith.constant 0 : i32
    %c0_i32_1 = arith.constant 0 : i32
    return %c0_i32, %c0_i32_0 : i32, i32
  }
  func.func @transform_3(%arg0: i32, %arg1: i32) -> (i32, i32) {
    %c16_i32 = arith.constant 16 : i32
    %0 = arith.muli %arg0, %c16_i32 : i32
    %1 = arith.addi %0, %arg1 : i32
    %c0_i32 = arith.constant 0 : i32
    %c0_i32_0 = arith.constant 0 : i32
    return %1, %c0_i32 : i32, i32
  }
}

module attributes {stable_mosaic.version = 11 : i64} {
  func.func @_fused_matmul_kernel(%arg0: i32, %arg1: i32, %arg2: i32, %arg3: memref<32x128xbf16, #tpu.memory_space<vmem>>, %arg4: memref<128x128xbf16, #tpu.memory_space<vmem>>, %arg5: memref<1x128xf32, #tpu.memory_space<vmem>>, %arg6: memref<32x128xf32, #tpu.memory_space<vmem>>, %arg7: memref<32x128xf32, #tpu.memory_space<vmem>>) attributes {dimension_semantics = [#tpu.dimension_semantics<parallel>, #tpu.dimension_semantics<parallel>, #tpu.dimension_semantics<arbitrary>], iteration_bounds = array<i64: 1, 1, 1>, scalar_prefetch = 0 : i64, scratch_operands = 1 : i64, tpu.core_type = #tpu.core_type<tc>, window_params = [{transform_indices = @transform_0, window_bounds = array<i64: 32, 128>}, {transform_indices = @transform_1, window_bounds = array<i64: 128, 128>}, {transform_indices = @transform_2, window_bounds = array<i64: 1, 128>}, {transform_indices = @transform_3, window_bounds = array<i64: 32, 128>}]} {
    %c0_i32 = arith.constant 0 : i32
    %0 = arith.cmpi eq, %arg2, %c0_i32 : i32
    %1 = arith.extui %0 : i1 to i32
    %c0_i32_0 = arith.constant 0 : i32
    %2 = arith.cmpi ne, %1, %c0_i32_0 : i32
    scf.if %2 {
      %cst_10 = arith.constant 0.000000e+00 : f32
      %12 = vector.broadcast %cst_10 : f32 to vector<32x128xf32>
      %c0_11 = arith.constant 0 : index
      %c0_12 = arith.constant 0 : index
      %13 = vector.load %arg7[%c0_11, %c0_12] : memref<32x128xf32, #tpu.memory_space<vmem>>, vector<32x128xf32>
      tpu.vector_store %arg7[%c0_11, %c0_12], %12 {strides = array<i32>} : memref<32x128xf32, #tpu.memory_space<vmem>>, vector<32x128xf32>,
    } else {
    }
    %c0 = arith.constant 0 : index
    %c0_1 = arith.constant 0 : index
    %3 = vector.load %arg7[%c0, %c0_1] : memref<32x128xf32, #tpu.memory_space<vmem>>, vector<32x128xf32>
    %c0_2 = arith.constant 0 : index
    %c0_3 = arith.constant 0 : index
    %4 = vector.load %arg3[%c0_2, %c0_3] : memref<32x128xbf16, #tpu.memory_space<vmem>>, vector<32x128xbf16>
    %c0_4 = arith.constant 0 : index
    %c0_5 = arith.constant 0 : index
    %5 = vector.load %arg4[%c0_4, %c0_5] : memref<128x128xbf16, #tpu.memory_space<vmem>>, vector<128x128xbf16>
    %cst = arith.constant dense<0.000000e+00> : vector<32x128xf32>
    %6 = tpu.matmul %4, %5, %cst {dimension_numbers = #tpu.dot_dimension_numbers<[1], [0], [0], [1], [0, 0, 1, 1], [], []>} : vector<32x128xbf16>, vector<128x128xbf16>, vector<32x128xf32> -> vector<32x128xf32>
    %7 = arith.addf %3, %6 : vector<32x128xf32>
    %c0_6 = arith.constant 0 : index
    %c0_7 = arith.constant 0 : index
    %8 = vector.load %arg7[%c0_6, %c0_7] : memref<32x128xf32, #tpu.memory_space<vmem>>, vector<32x128xf32>
    tpu.vector_store %arg7[%c0_6, %c0_7], %7 {strides = array<i32>} : memref<32x128xf32, #tpu.memory_space<vmem>>, vector<32x128xf32>,
    %c0_i32_8 = arith.constant 0 : i32
    %9 = arith.cmpi eq, %arg2, %c0_i32_8 : i32
    %10 = arith.extui %9 : i1 to i32
    %c0_i32_9 = arith.constant 0 : i32
    %11 = arith.cmpi ne, %10, %c0_i32_9 : i32
    scf.if %11 {
      %c0_10 = arith.constant 0 : index
      %c0_11 = arith.constant 0 : index
      %12 = vector.load %arg7[%c0_10, %c0_11] : memref<32x128xf32, #tpu.memory_space<vmem>>, vector<32x128xf32>
      %c0_12 = arith.constant 0 : index
      %c0_13 = arith.constant 0 : index
      %13 = vector.load %arg5[%c0_12, %c0_13] : memref<1x128xf32, #tpu.memory_space<vmem>>, vector<1x128xf32>
      %14 = vector.broadcast %13 : vector<1x128xf32> to vector<32x128xf32>
      %15 = arith.addf %12, %14 : vector<32x128xf32>
      %cst_14 = arith.constant 0.000000e+00 : f32
      %16 = vector.broadcast %cst_14 : f32 to vector<32x128xf32>
      %17 = arith.maximumf %15, %16 : vector<32x128xf32>
      %c0_15 = arith.constant 0 : index
      %c0_16 = arith.constant 0 : index
      %18 = vector.load %arg6[%c0_15, %c0_16] : memref<32x128xf32, #tpu.memory_space<vmem>>, vector<32x128xf32>
      tpu.vector_store %arg6[%c0_15, %c0_16], %17 {strides = array<i32>} : memref<32x128xf32, #tpu.memory_space<vmem>>, vector<32x128xf32>,
    } else {
    }
    return
  }
  func.func @transform_0(%arg0: i32, %arg1: i32, %arg2: i32) -> (i32, i32) {
    %c0_i32 = arith.constant 0 : i32
    return %arg0, %arg2 : i32, i32
  }
  func.func @transform_1(%arg0: i32, %arg1: i32, %arg2: i32) -> (i32, i32) {
    %c0_i32 = arith.constant 0 : i32
    return %arg2, %arg1 : i32, i32
  }
  func.func @transform_2(%arg0: i32, %arg1: i32, %arg2: i32) -> (i32, i32) {
    %c0_i32 = arith.constant 0 : i32
    %c0_i32_0 = arith.constant 0 : i32
    return %c0_i32, %arg1 : i32, i32
  }
  func.func @transform_3(%arg0: i32, %arg1: i32, %arg2: i32) -> (i32, i32) {
    %c0_i32 = arith.constant 0 : i32
    return %arg0, %arg1 : i32, i32
  }
}

module attributes {stable_mosaic.version = 11 : i64} {
  func.func @_final_conv_kernel(%arg0: i32, %arg1: i32, %arg2: memref<256x128xbf16, #tpu.memory_space<vmem>>, %arg3: memref<256x128xbf16, #tpu.memory_space<vmem>>, %arg4: memref<256x128xbf16, #tpu.memory_space<vmem>>, %arg5: memref<256x128xbf16, #tpu.memory_space<vmem>>, %arg6: memref<256x128xbf16, #tpu.memory_space<vmem>>, %arg7: memref<5x128x128xbf16, #tpu.memory_space<vmem>>, %arg8: memref<1x128xf32, #tpu.memory_space<vmem>>, %arg9: memref<256x128xf32, #tpu.memory_space<vmem>>) attributes {dimension_semantics = [#tpu.dimension_semantics<parallel>, #tpu.dimension_semantics<parallel>], iteration_bounds = array<i64: 2, 1>, scalar_prefetch = 0 : i64, scratch_operands = 0 : i64, tpu.core_type = #tpu.core_type<tc>, window_params = [{transform_indices = @transform_0, window_bounds = array<i64: 256, 128>}, {transform_indices = @transform_1, window_bounds = array<i64: 256, 128>}, {transform_indices = @transform_2, window_bounds = array<i64: 256, 128>}, {transform_indices = @transform_3, window_bounds = array<i64: 256, 128>}, {transform_indices = @transform_4, window_bounds = array<i64: 256, 128>}, {transform_indices = @transform_5, window_bounds = array<i64: 5, 128, 128>}, {transform_indices = @transform_6, window_bounds = array<i64: 1, 128>}, {transform_indices = @transform_7, window_bounds = array<i64: 256, 128>}]} {
    %c0 = arith.constant 0 : index
    %c0_0 = arith.constant 0 : index
    %0 = vector.load %arg2[%c0, %c0_0] : memref<256x128xbf16, #tpu.memory_space<vmem>>, vector<256x128xbf16>
    %c0_1 = arith.constant 0 : index
    %c0_2 = arith.constant 0 : index
    %c0_3 = arith.constant 0 : index
    %1 = vector.load %arg7[%c0_1, %c0_2, %c0_3] : memref<5x128x128xbf16, #tpu.memory_space<vmem>>, vector<1x128x128xbf16>
    %2 = vector.shape_cast %1 : vector<1x128x128xbf16> to vector<128x128xbf16>
    %cst = arith.constant dense<0.000000e+00> : vector<256x128xf32>
    %3 = tpu.matmul %0, %2, %cst {dimension_numbers = #tpu.dot_dimension_numbers<[1], [0], [0], [1], [0, 0, 1, 1], [], []>} : vector<256x128xbf16>, vector<128x128xbf16>, vector<256x128xf32> -> vector<256x128xf32>
    %c0_4 = arith.constant 0 : index
    %c0_5 = arith.constant 0 : index
    %4 = vector.load %arg3[%c0_4, %c0_5] : memref<256x128xbf16, #tpu.memory_space<vmem>>, vector<256x128xbf16>
    %c1 = arith.constant 1 : index
    %c0_6 = arith.constant 0 : index
    %c0_7 = arith.constant 0 : index
    %5 = vector.load %arg7[%c1, %c0_6, %c0_7] : memref<5x128x128xbf16, #tpu.memory_space<vmem>>, vector<1x128x128xbf16>
    %6 = vector.shape_cast %5 : vector<1x128x128xbf16> to vector<128x128xbf16>
    %cst_8 = arith.constant dense<0.000000e+00> : vector<256x128xf32>
    %7 = tpu.matmul %4, %6, %cst_8 {dimension_numbers = #tpu.dot_dimension_numbers<[1], [0], [0], [1], [0, 0, 1, 1], [], []>} : vector<256x128xbf16>, vector<128x128xbf16>, vector<256x128xf32> -> vector<256x128xf32>
    %8 = arith.addf %3, %7 : vector<256x128xf32>
    %c0_9 = arith.constant 0 : index
    %c0_10 = arith.constant 0 : index
    %9 = vector.load %arg4[%c0_9, %c0_10] : memref<256x128xbf16, #tpu.memory_space<vmem>>, vector<256x128xbf16>
    %c2 = arith.constant 2 : index
    %c0_11 = arith.constant 0 : index
    %c0_12 = arith.constant 0 : index
    %10 = vector.load %arg7[%c2, %c0_11, %c0_12] : memref<5x128x128xbf16, #tpu.memory_space<vmem>>, vector<1x128x128xbf16>
    %11 = vector.shape_cast %10 : vector<1x128x128xbf16> to vector<128x128xbf16>
    %cst_13 = arith.constant dense<0.000000e+00> : vector<256x128xf32>
    %12 = tpu.matmul %9, %11, %cst_13 {dimension_numbers = #tpu.dot_dimension_numbers<[1], [0], [0], [1], [0, 0, 1, 1], [], []>} : vector<256x128xbf16>, vector<128x128xbf16>, vector<256x128xf32> -> vector<256x128xf32>
    %13 = arith.addf %8, %12 : vector<256x128xf32>
    %c0_14 = arith.constant 0 : index
    %c0_15 = arith.constant 0 : index
    %14 = vector.load %arg5[%c0_14, %c0_15] : memref<256x128xbf16, #tpu.memory_space<vmem>>, vector<256x128xbf16>
    %c3 = arith.constant 3 : index
    %c0_16 = arith.constant 0 : index
    %c0_17 = arith.constant 0 : index
    %15 = vector.load %arg7[%c3, %c0_16, %c0_17] : memref<5x128x128xbf16, #tpu.memory_space<vmem>>, vector<1x128x128xbf16>
    %16 = vector.shape_cast %15 : vector<1x128x128xbf16> to vector<128x128xbf16>
    %cst_18 = arith.constant dense<0.000000e+00> : vector<256x128xf32>
    %17 = tpu.matmul %14, %16, %cst_18 {dimension_numbers = #tpu.dot_dimension_numbers<[1], [0], [0], [1], [0, 0, 1, 1], [], []>} : vector<256x128xbf16>, vector<128x128xbf16>, vector<256x128xf32> -> vector<256x128xf32>
    %18 = arith.addf %13, %17 : vector<256x128xf32>
    %c0_19 = arith.constant 0 : index
    %c0_20 = arith.constant 0 : index
    %19 = vector.load %arg6[%c0_19, %c0_20] : memref<256x128xbf16, #tpu.memory_space<vmem>>, vector<256x128xbf16>
    %c4 = arith.constant 4 : index
    %c0_21 = arith.constant 0 : index
    %c0_22 = arith.constant 0 : index
    %20 = vector.load %arg7[%c4, %c0_21, %c0_22] : memref<5x128x128xbf16, #tpu.memory_space<vmem>>, vector<1x128x128xbf16>
    %21 = vector.shape_cast %20 : vector<1x128x128xbf16> to vector<128x128xbf16>
    %cst_23 = arith.constant dense<0.000000e+00> : vector<256x128xf32>
    %22 = tpu.matmul %19, %21, %cst_23 {dimension_numbers = #tpu.dot_dimension_numbers<[1], [0], [0], [1], [0, 0, 1, 1], [], []>} : vector<256x128xbf16>, vector<128x128xbf16>, vector<256x128xf32> -> vector<256x128xf32>
    %23 = arith.addf %18, %22 : vector<256x128xf32>
    %c0_24 = arith.constant 0 : index
    %c0_25 = arith.constant 0 : index
    %24 = vector.load %arg8[%c0_24, %c0_25] : memref<1x128xf32, #tpu.memory_space<vmem>>, vector<1x128xf32>
    %25 = vector.broadcast %24 : vector<1x128xf32> to vector<256x128xf32>
    %26 = arith.addf %23, %25 : vector<256x128xf32>
    %c0_26 = arith.constant 0 : index
    %c0_27 = arith.constant 0 : index
    %27 = vector.load %arg9[%c0_26, %c0_27] : memref<256x128xf32, #tpu.memory_space<vmem>>, vector<256x128xf32>
    tpu.vector_store %arg9[%c0_26, %c0_27], %26 {strides = array<i32>} : memref<256x128xf32, #tpu.memory_space<vmem>>, vector<256x128xf32>,
    return
  }
  func.func @transform_0(%arg0: i32, %arg1: i32) -> (i32, i32) {
    %c0_i32 = arith.constant 0 : i32
    %c0_i32_0 = arith.constant 0 : i32
    return %arg0, %c0_i32 : i32, i32
  }
  func.func @transform_1(%arg0: i32, %arg1: i32) -> (i32, i32) {
    %c0_i32 = arith.constant 0 : i32
    %c0_i32_0 = arith.constant 0 : i32
    return %arg0, %c0_i32 : i32, i32
  }
  func.func @transform_2(%arg0: i32, %arg1: i32) -> (i32, i32) {
    %c0_i32 = arith.constant 0 : i32
    %c0_i32_0 = arith.constant 0 : i32
    return %arg0, %c0_i32 : i32, i32
  }
  func.func @transform_3(%arg0: i32, %arg1: i32) -> (i32, i32) {
    %c0_i32 = arith.constant 0 : i32
    %c0_i32_0 = arith.constant 0 : i32
    return %arg0, %c0_i32 : i32, i32
  }
  func.func @transform_4(%arg0: i32, %arg1: i32) -> (i32, i32) {
    %c0_i32 = arith.constant 0 : i32
    %c0_i32_0 = arith.constant 0 : i32
    return %arg0, %c0_i32 : i32, i32
  }
  func.func @transform_5(%arg0: i32, %arg1: i32) -> (i32, i32, i32) {
    %c0_i32 = arith.constant 0 : i32
    %c0_i32_0 = arith.constant 0 : i32
    %c0_i32_1 = arith.constant 0 : i32
    return %c0_i32, %c0_i32_0, %arg1 : i32, i32, i32
  }
  func.func @transform_6(%arg0: i32, %arg1: i32) -> (i32, i32) {
    %c0_i32 = arith.constant 0 : i32
    %c0_i32_0 = arith.constant 0 : i32
    return %c0_i32, %arg1 : i32, i32
  }
  func.func @transform_7(%arg0: i32, %arg1: i32) -> (i32, i32) {
    %c0_i32 = arith.constant 0 : i32
    return %arg0, %arg1 : i32, i32
  }
}

</mosaic_0001>

<bundles_post_ra>
// kernel: aspp_forward.7
= control target key start
LH: loop header
LB: loop body
LE: loop exit
PB: predicated region body
PF: predicated region fallthrough
CT: control target
= control target key end

     0   :  { %s765_s12 = smov 0   ;;  %s767_s13 = smov 0   ;;  %s890_s0 = inlined_call_operand.vmem [shape: bf16[2,52,52,8], index: 0, kind: input, shape index: {}]   ;;  %s891_s1 = inlined_call_operand.vmem [shape: bf16[9,8,128], index: 1, kind: input, shape index: {}]   ;;  %s892_s2 = inlined_call_operand.vmem [shape: f32[1,128], index: 2, kind: input, shape index: {}]   ;;  %s893_s3 = inlined_call_operand.vmem [shape: bf16[512,128], index: 3, kind: output, shape index: {}]  }
   0x1   :  { %s769_s14 = smov 0   ;;  %s771_s15 = smov 0  }
   0x2   :  { %s773_s16 = smov 0  }
   0x3 LB: > { %s22_s17 = sadd.s32 1, %s735_s14  ;;  %s25_s18 = sadd.s32 1, %s739_s15  ;;  %s743_s16 = sphi %s773_s16, %s13_s16   ;;  %s739_s15 = sphi %s771_s15, %s897_s15   ;;  %s735_s14 = sphi %s769_s14, %s896_s14   ;;  %s731_s13 = sphi %s767_s13, %s895_s13   ;;  %s727_s12 = sphi %s765_s12, %s894_s12  }
   0x4   : > { %p23_p0 = scmp.ge.s32.totalorder %s22_s17, 16  ;;  %p592_p1 = scmp.ge.s32.totalorder %s743_s16, 1 }
   0x5   : > { %p153_p2 = scmp.lt.s32.totalorder %s743_s16, 33 }
   0x6   : > { %s899_s17 = smov (%p23_p0, %s22_s17), 0  ;;  %s901_s18 = smov (!%p23_p0, %s25_s18), %s739_s15 }
   0x7   : > { %p154_p3 = pnand %p592_p1, %p153_p2  ;;  %p27_p4 = scmp.ge.s32.totalorder %s901_s18, 2 }
   0x8   : > { %p179_p5 = scmp.lt.s32.totalorder (!%p154_p3), %s731_s13, 1  ;;  %s541_s28 = smul.u32 (!%p154_p3), 28, %s727_s12 }
   0x9   : > { %s903_s18 = smov (%p27_p4, %s901_s18), 0  ;;  %157 = sbr.rel (%p154_p3) target bundleno = 204 (0xcc), region = 32 }
   0xa   : > { %s594_s24 = sshll.u32 (!%p154_p3), %s731_s13, 4 }
   0xe   : > { %vm222_vm0 = vcmask 1043456   ;;  %v604_v0 = vld [vmem:[%s891_s1 + $0x8] sm:$0xf]  ;;  %v601_v1 = vld [vmem:[%s891_s1 + $0x4] sm:$0xf]  ;;  %s180_s25 = scalar_select %p179_p5, %s731_s13, 1 }
   0xf   : > { %v275_v2 = vsel %vm222_vm0, %v604_v0, 0  ;;  %v224_v3 = vsel %vm222_vm0, %v601_v1, 0  ;;  %v203_v4 = vld [vmem:[%s891_s1] sm:$0xf]  ;;  %v610_v6 = vld [vmem:[%s891_s1 + $0xc] sm:$0xf] }
  0x10   : > { %284 = vmatpush.bf16.msra.mxu2 %v275_v2  ;;  %233 = vmatpush.bf16.msra.mxu0 %v224_v3  ;;  %v252_v5 = vsel %vm222_vm0, %v203_v4, 0  ;;  %v318_v7 = vsel %vm222_vm0, %v610_v6, 0  ;;  %v612_v8 = vld [vmem:[%s891_s1 + $0x10] sm:$0xf]  ;;  %v620_v9 = vld [vmem:[%s891_s1 + $0x18] sm:$0xf] }
  0x11   : > { %261 = vmatpush.bf16.msra.mxu1 %v252_v5  ;;  %s663_s6 = smul.u32 1456, %s180_s25  ;;  %327 = vmatpush.bf16.msra.mxu3 %v318_v7  ;;  %v349_v10 = vsel %vm222_vm0, %v612_v8, 0  ;;  %v417_v11 = vsel %vm222_vm0, %v620_v9, 0  ;;  %v622_v12 = vld [vmem:[%s891_s1 + $0x1c] sm:$0xf]  ;;  %vm218_vm1 = vcmask 64512   ;;  %s185_s25 = sadd.s32 %s727_s12, %s594_s24 }
  0x12   : > { %v448_v13 = vsel %vm222_vm0, %v622_v12, 0  ;;  %v614_v14 = vld [vmem:[%s891_s1 + $0x14] sm:$0xf]  ;;  %v624_v30 = vld [vmem:[%s891_s1 + $0x20] sm:$0xf]  ;;  %vm214_vm2 = vcmask 1046528  }
  0x13   : > { %s183_s20 = scalar_lea.vmem %s890_s0, %s663_s6  ;;  %v374_v15 = vsel %vm222_vm0, %v614_v14, 0  ;;  %vm244_vm3 = vcmask 1045504   ;;  %v473_v38 = vsel %vm222_vm0, %v624_v30, 0  ;;  %s595_s26 = sshll.u32 %s185_s25, 1 }
  0x14   : > { %358 = vmatpush.bf16.msrb.mxu0 %v349_v10  ;;  %426 = vmatpush.bf16.msrb.mxu2 %v417_v11  ;;  %s837_s21 = scalar_lea.vmem %s183_s20, %s541_s28  ;;  %p187_p6 = scmp.lt.s32.totalorder %s595_s26, 63 }
  0x15   : > { %457 = vmatpush.bf16.msrb.mxu3 %v448_v13  ;;  %383 = vmatpush.bf16.msrb.mxu1 %v374_v15  ;;  %v645_v16 = vld [vmem:[%s837_s21 + $0x158] sm:$0xff]   ;;  %v600_v17 = vld [vmem:[%s837_s21 + $0x160] sm:$0xf]  ;;  %v651_v29 = vld [vmem:[%s837_s21 + $0x2a8] sm:$0xff]  }
  0x16   : > { %v652_v18 = vld [vmem:[%s837_s21 + $0x154] sm:$0xff]   ;;  %v631_v19 = vunpack.c.h.b16 %v645_v16  ;;  %v211_v20 = vunpack.c.l.b16 %v600_v17  ;;  %v650_v21 = vld [vmem:[%s837_s21 + $0x200] sm:$0xff]   ;;  %v215_v23 = vrot.slane %v645_v16, 1  ;;  %v639_v36 = vunpack.c.h.b16 %v651_v29  ;;  %v609_v37 = vld [vmem:[%s837_s21 + $0x208] sm:$0xf]  ;;  %s905_s26 = smov (!%p187_p6, %s595_s26), 63 }
  0x17   : > { %v661_v22 = vld [vmem:[%s837_s21 + $0x1fc] sm:$0xff]   ;;  %v635_v24 = vunpack.c.h.b16 %v650_v21  ;;  %v245_v28 = vrot.slane %v652_v18, 2  ;;  %v619_v41 = vld [vmem:[%s837_s21 + $0x2b0] sm:$0xf]  ;;  %v339_v43 = vunpack.c.l.b16 %v609_v37  ;;  %v662_v44 = vld [vmem:[%s837_s21 + $0x2a4] sm:$0xff]   ;;  %v342_v51 = vrot.slane %v650_v21, 1 }
  0x18   : > { %v270_v25 = vpack.c.b16 %v211_v20, %v631_v19  ;;  %v213_v26 = vpack.c.b16 %v211_v20, %v211_v20  ;;  %v243_v27 = vpack.c.b16 %v631_v19, %v631_v19  ;;  %v311_v32 = vrot.slane %v661_v22, 2  ;;  %s596_s12 = sshll.u32 %s905_s26, 2 }
  0x19   : > { %v310_v31 = vpack.c.b16 %v635_v24, %v635_v24  ;;  %v409_v45 = vpack.c.b16 %v639_v36, %v639_v36  ;;  %v438_v46 = vunpack.c.l.b16 %v619_v41  ;;  %v341_v47 = vpack.c.b16 %v339_v43, %v339_v43  ;;  %s190_s30 = scalar_lea.vmem %s893_s3, %s596_s12 }
  0x1a   : > { %605 = vmatmul.msk.bf16.vlgmr.msra.gmra.mxu2 %vm218_vm1, %v270_v25  ;;  %v216_v33 = vrot.slane %v213_v26, 1  ;;  %v246_v34 = vrot.slane %v243_v27, 2  ;;  %v410_v48 = vrot.slane %v662_v44, 2  ;;  %v441_v54 = vrot.slane %v651_v29, 1  ;;  %v704_v27 = vld [vmem:[%s892_s2] ss:$0 sm:$0xff] }
  0x1b   : > { %v312_v35 = vrot.slane %v310_v31, 2  ;;  %v411_v49 = vrot.slane %v409_v45, 2  ;;  %v440_v50 = vpack.c.b16 %v438_v46, %v438_v46  ;;  %v343_v52 = vrot.slane %v341_v47, 1 }
  0x1c   : > { %v217_v39 = vsel %vm214_vm2, %v215_v23, %v216_v33  ;;  %v247_v40 = vsel %vm244_vm3, %v245_v28, %v246_v34  ;;  %v369_v56 = vpack.c.b16 %v339_v43, %v635_v24  ;;  %v468_v59 = vpack.c.b16 %v438_v46, %v639_v36 }
  0x1d   : > { %602 = vmatmul.msk.bf16.vlgmr.msra.gmra.mxu0 %vm218_vm1, %v217_v39  ;;  %603 = vmatmul.msk.bf16.vlgmr.msra.gmra.mxu1 %vm218_vm1, %v247_v40  ;;  %v313_v42 = vsel %vm244_vm3, %v311_v32, %v312_v35  ;;  %v412_v53 = vsel %vm244_vm3, %v410_v48, %v411_v49  ;;  %v442_v55 = vrot.slane %v440_v50, 1  ;;  %v344_v57 = vsel %vm214_vm2, %v342_v51, %v343_v52 }
  0x1e   : > { %611 = vmatmul.msk.bf16.vlgmr.msra.gmra.mxu3 %vm218_vm1, %v313_v42  ;;  %482 = vmatpush.bf16.msra.mxu0 %v473_v38 }
  0x1f   : > { %v443_v58 = vsel %vm214_vm2, %v441_v54, %v442_v55 }
  0x2a   : > { %621 = vmatmul.msk.bf16.vlgmr.msrb.gmra.mxu2 %vm218_vm1, %v412_v53 }
  0x2d   : > { %613 = vmatmul.msk.bf16.vlgmr.msrb.gmra.mxu0 %vm218_vm1, %v344_v57  ;;  %615 = vmatmul.msk.bf16.vlgmr.msrb.gmra.mxu1 %vm218_vm1, %v369_v56 }
  0x2e   : > { %623 = vmatmul.msk.bf16.vlgmr.msrb.gmra.mxu3 %vm218_vm1, %v443_v58 }
  0x3d   : > { %625 = vmatmul.msk.bf16.vlgmr.msra.gmra.mxu0 %vm218_vm1, %v468_v59 }
  0x9a   : > { %v235_v60 = vpop.f32.mrf.mxu0  ;;  %v263_v61 = vpop.f32.mrf.mxu1 }
  0x9b   : > { %v264_v3 = vadd.f32 %v263_v61, %v235_v60 }
  0x9d   : > { %v286_v62 = vpop.f32.mrf.mxu2 }
  0x9e   : > { %v291_v6 = vadd.f32 %v286_v62, %v264_v3 }
  0xa1   : > { %v329_v63 = vpop.f32.mrf.mxu3 }
  0xa2   : > { %v237_v0 = vpop.f32.mrf.mxu0  ;;  %v265_v1 = vpop.f32.mrf.mxu1  ;;  %v334_v9 = vadd.f32 %v329_v63, %v291_v6 }
  0xa3   : > { %v266_v7 = vadd.f32 %v265_v1, %v237_v0 }
  0xa5   : > { %v288_v2 = vpop.f32.mrf.mxu2 }
  0xa6   : > { %v292_v10 = vadd.f32 %v288_v2, %v266_v7 }
  0xa9   : > { %v331_v4 = vpop.f32.mrf.mxu3 }
  0xaa   : > { %v360_v5 = vpop.f32.mrf.mxu0  ;;  %v385_v8 = vpop.f32.mrf.mxu1  ;;  %v335_v14 = vadd.f32 %v331_v4, %v292_v10 }
  0xab   : > { %v365_v12 = vadd.f32 %v360_v5, %v334_v9 }
  0xad   : > { %v428_v11 = vpop.f32.mrf.mxu2  ;;  %v390_v16 = vadd.f32 %v385_v8, %v365_v12 }
  0xaf   : > { %v433_v19 = vadd.f32 %v428_v11, %v390_v16 }
  0xb1   : > { %v459_v15 = vpop.f32.mrf.mxu3 }
  0xb2   : > { %v362_v13 = vpop.f32.mrf.mxu0  ;;  %v387_v18 = vpop.f32.mrf.mxu1  ;;  %v464_v23 = vadd.f32 %v459_v15, %v433_v19 }
  0xb3   : > { %v366_v17 = vadd.f32 %v362_v13, %v335_v14 }
  0xb5   : > { %v391_v20 = vadd.f32 %v387_v18, %v366_v17  ;;  %v430_v21 = vpop.f32.mrf.mxu2 }
  0xb7   : > { %v434_v24 = vadd.f32 %v430_v21, %v391_v20 }
  0xb9   : > { %v461_v25 = vpop.f32.mrf.mxu3 }
  0xba   : > { %v484_v22 = vpop.f32.mrf.mxu0  ;;  %v465_v28 = vadd.f32 %v461_v25, %v434_v24 }
  0xbb   : > { %v489_v26 = vadd.f32 %v484_v22, %v464_v23 }
  0xbd   : > { %v495_v30 = vadd.f32 %v704_v27, %v489_v26 }
  0xbf   : > { %v497_v33 = vmax.f32 %v495_v30, 0.0 }
  0xc2   : > { %v486_v29 = vpop.f32.mrf.mxu0 }
  0xc3   : > { %v490_v31 = vadd.f32 %v486_v29, %v465_v28 }
  0xc5   : > { %v496_v32 = vadd.f32 %v704_v27, %v490_v31 }
  0xc7   : > { %v498_v34 = vmax.f32 %v496_v32, 0.0 }
  0xc9   : > { %v643_v35 = vpack.c.bf16 %v498_v34, %v497_v33 }
  0xcb   : > { %644 = vst [vmem:[%s190_s30] sm:$0xff] %v643_v35  }
  0xcc PF: > { %s13_s16 = sadd.s32 1, %s743_s16   ;;  %s894_s12 = smov %s735_s14 }
  0xcd   : > { %p10_p7 = scmp.ge.s32.totalorder %s13_s16, 34   ;;  %s895_s13 = smov %s739_s15 }
  0xce   : > { %s896_s14 = smov %s899_s17  ;;  %s897_s15 = smov %s903_s18 }
  0xcf   :  { %12 = sbr.rel (!%p10_p7) target bundleno = 3 (0x3), region = 73 }

// kernel: aspp_forward.8
= control target key start
LH: loop header
LB: loop body
LE: loop exit
PB: predicated region body
PF: predicated region fallthrough
CT: control target
= control target key end

     0   :  { %s816_s12 = smov 0   ;;  %s818_s13 = smov 0   ;;  %s944_s0 = inlined_call_operand.vmem [shape: bf16[2,52,52,8], index: 0, kind: input, shape index: {}]   ;;  %s945_s1 = inlined_call_operand.vmem [shape: bf16[9,8,128], index: 1, kind: input, shape index: {}]   ;;  %s946_s2 = inlined_call_operand.vmem [shape: f32[1,128], index: 2, kind: input, shape index: {}]   ;;  %s947_s3 = inlined_call_operand.vmem [shape: bf16[512,128], index: 3, kind: output, shape index: {}]  }
   0x1   :  { %s820_s14 = smov 0   ;;  %s822_s15 = smov 0  }
   0x2   :  { %s824_s16 = smov 0  }
   0x3 LB: > { %s22_s17 = sadd.s32 1, %s786_s14  ;;  %s25_s18 = sadd.s32 1, %s790_s15  ;;  %s794_s16 = sphi %s824_s16, %s13_s16   ;;  %s790_s15 = sphi %s822_s15, %s951_s15   ;;  %s786_s14 = sphi %s820_s14, %s950_s14   ;;  %s782_s13 = sphi %s818_s13, %s949_s13   ;;  %s778_s12 = sphi %s816_s12, %s948_s12  }
   0x4   : > { %p23_p0 = scmp.ge.s32.totalorder %s22_s17, 16  ;;  %p622_p1 = scmp.ge.s32.totalorder %s794_s16, 1 }
   0x5   : > { %p153_p2 = scmp.lt.s32.totalorder %s794_s16, 33 }
   0x6   : > { %s953_s17 = smov (%p23_p0, %s22_s17), 0  ;;  %s955_s18 = smov (!%p23_p0, %s25_s18), %s790_s15 }
   0x7   : > { %p154_p3 = pnand %p622_p1, %p153_p2  ;;  %p27_p4 = scmp.ge.s32.totalorder %s955_s18, 2 }
   0x8   : > { %p179_p5 = scmp.lt.s32.totalorder (!%p154_p3), %s782_s13, 1  ;;  %s571_s28 = smul.u32 (!%p154_p3), 28, %s778_s12 }
   0x9   : > { %s957_s18 = smov (%p27_p4, %s955_s18), 0  ;;  %157 = sbr.rel (%p154_p3) target bundleno = 204 (0xcc), region = 32 }
   0xa   : > { %s624_s24 = sshll.u32 (!%p154_p3), %s782_s13, 4 }
   0xb   : > { %s185_s25 = sadd.s32 (!%p154_p3), %s778_s12, %s624_s24 }
   0xc   : > { %s625_s26 = sshll.u32 (!%p154_p3), %s185_s25, 1 }
   0xd   : > { %p187_p6 = scmp.lt.s32.totalorder (!%p154_p3), %s625_s26, 63 }
   0xe   : > { %v633_v0 = vld [vmem:[%s945_s1 + $0x4] sm:$0xf]  ;;  %vm224_vm0 = vcmask 1043456   ;;  %v205_v1 = vld [vmem:[%s945_s1] sm:$0xf]  ;;  %s180_s27 = scalar_select %p179_p5, %s782_s13, 1 }
   0xf   : > { %v226_v2 = vsel %vm224_vm0, %v633_v0, 0  ;;  %v256_v3 = vsel %vm224_vm0, %v205_v1, 0  ;;  %v640_v4 = vld [vmem:[%s945_s1 + $0x8] sm:$0xf]  ;;  %v648_v5 = vld [vmem:[%s945_s1 + $0xc] sm:$0xf] }
  0x10   : > { %235 = vmatpush.bf16.msra.mxu0 %v226_v2  ;;  %265 = vmatpush.bf16.msra.mxu1 %v256_v3  ;;  %v285_v6 = vsel %vm224_vm0, %v640_v4, 0  ;;  %v330_v7 = vsel %vm224_vm0, %v648_v5, 0  ;;  %v654_v8 = vld [vmem:[%s945_s1 + $0x10] sm:$0xf]  ;;  %v664_v9 = vld [vmem:[%s945_s1 + $0x18] sm:$0xf] }
  0x11   : > { %294 = vmatpush.bf16.msra.mxu2 %v285_v6  ;;  %339 = vmatpush.bf16.msra.mxu3 %v330_v7  ;;  %s714_s6 = smul.u32 1456, %s180_s27  ;;  %v363_v10 = vsel %vm224_vm0, %v654_v8, 0  ;;  %v439_v11 = vsel %vm224_vm0, %v664_v9, 0  ;;  %v670_v12 = vld [vmem:[%s945_s1 + $0x1c] sm:$0xf]  ;;  %vm216_vm1 = vcmask 1046528  }
  0x12   : > { %v472_v13 = vsel %vm224_vm0, %v670_v12, 0  ;;  %v656_v14 = vld [vmem:[%s945_s1 + $0x14] sm:$0xf]  ;;  %vm248_vm2 = vcmask 1044480   ;;  %v672_v34 = vld [vmem:[%s945_s1 + $0x20] sm:$0xf] }
  0x13   : > { %s183_s20 = scalar_lea.vmem %s944_s0, %s714_s6  ;;  %v394_v15 = vsel %vm224_vm0, %v656_v14, 0  ;;  %vm220_vm3 = vcmask 64512   ;;  %v503_v45 = vsel %vm224_vm0, %v672_v34, 0  ;;  %s959_s26 = smov (!%p187_p6, %s625_s26), 63 }
  0x14   : > { %372 = vmatpush.bf16.msrb.mxu0 %v363_v10  ;;  %s888_s21 = scalar_lea.vmem %s183_s20, %s571_s28  ;;  %403 = vmatpush.bf16.msrb.mxu1 %v394_v15  ;;  %s626_s12 = sshll.u32 %s959_s26, 2 }
  0x15   : > { %448 = vmatpush.bf16.msrb.mxu2 %v439_v11  ;;  %481 = vmatpush.bf16.msrb.mxu3 %v472_v13  ;;  %v708_v16 = vld [vmem:[%s888_s21 + $0xb0] sm:$0xff]   ;;  %v709_v17 = vld [vmem:[%s888_s21 + $0xb8] sm:$0xff]   ;;  %v676_v18 = vld [vmem:[%s888_s21 + $0xa8] sm:$0xff]  ;;  %s190_s30 = scalar_lea.vmem %s947_s3, %s626_s12 }
  0x16   : > { %v685_v19 = vunpack.c.l.b16 %v709_v17  ;;  %v681_v20 = vunpack.c.l.b16 %v708_v16  ;;  %v682_v21 = vunpack.c.h.b16 %v708_v16  ;;  %v677_v22 = vld [vmem:[%s888_s21 + $0x1f8] sm:$0xff]  ;;  %v710_v23 = vld [vmem:[%s888_s21 + $0x200] sm:$0xff]   ;;  %v217_v24 = vrot.slane %v708_v16, 1  ;;  %v711_v40 = vld [vmem:[%s888_s21 + $0x208] sm:$0xff]  }
  0x17   : > { %v686_v25 = vunpack.c.h.b16 %v709_v17  ;;  %v689_v26 = vunpack.c.l.b16 %v710_v23  ;;  %v249_v29 = vrot.slane %v676_v18, 3  ;;  %v323_v33 = vrot.slane %v677_v22, 3  ;;  %v712_v43 = vld [vmem:[%s888_s21 + $0x350] sm:$0xff]   ;;  %v713_v44 = vld [vmem:[%s888_s21 + $0x358] sm:$0xff]   ;;  %v678_v56 = vld [vmem:[%s888_s21 + $0x348] sm:$0xff] }
  0x18   : > { %v215_v27 = vpack.c.b16 %v685_v19, %v685_v19  ;;  %v247_v28 = vpack.c.b16 %v681_v20, %v681_v20  ;;  %v276_v30 = vpack.c.b16 %v685_v19, %v682_v21  ;;  %v693_v48 = vunpack.c.l.b16 %v711_v40 }
  0x19   : > { %v277_v31 = vpack.c.b16 %v686_v25, %v686_v25  ;;  %v322_v32 = vpack.c.b16 %v689_v26, %v689_v26  ;;  %v690_v49 = vunpack.c.h.b16 %v710_v23  ;;  %v694_v50 = vunpack.c.h.b16 %v711_v40 }
  0x1a   : > { %v218_v35 = vrot.slane %v215_v27, 1  ;;  %v250_v36 = vrot.slane %v247_v28, 3  ;;  %v278_v37 = vrot.slane %v276_v30, 3  ;;  %v697_v51 = vunpack.c.l.b16 %v712_v43 }
  0x1b   : > { %v279_v38 = vrot.slane %v277_v31, 3  ;;  %v324_v39 = vrot.slane %v322_v32, 3  ;;  %v701_v52 = vunpack.c.l.b16 %v713_v44  ;;  %v355_v53 = vpack.c.b16 %v693_v48, %v693_v48 }
  0x1c   : > { %v219_v41 = vsel %vm216_vm1, %v217_v24, %v218_v35  ;;  %v251_v42 = vsel %vm248_vm2, %v249_v29, %v250_v36  ;;  %v385_v54 = vpack.c.b16 %v693_v48, %v690_v49  ;;  %v386_v55 = vpack.c.b16 %v694_v50, %v694_v50 }
  0x1d   : > { %634 = vmatmul.msk.bf16.vlgmr.msra.gmra.mxu0 %vm220_vm3, %v219_v41  ;;  %639 = vmatmul.msk.bf16.vlgmr.msra.gmra.mxu1 %vm220_vm3, %v251_v42  ;;  %v280_v46 = vsel %vm248_vm2, %v278_v37, %v279_v38  ;;  %v325_v47 = vsel %vm248_vm2, %v323_v33, %v324_v39  ;;  %v431_v57 = vpack.c.b16 %v697_v51, %v697_v51  ;;  %v356_v59 = vrot.slane %v710_v23, 1 }
  0x1e   : > { %641 = vmatmul.msk.bf16.vlgmr.msra.gmra.mxu2 %vm220_vm3, %v280_v46  ;;  %653 = vmatmul.msk.bf16.vlgmr.msra.gmra.mxu3 %vm220_vm3, %v325_v47  ;;  %v464_v58 = vpack.c.b16 %v701_v52, %v701_v52  ;;  %v357_v60 = vrot.slane %v355_v53, 1  ;;  %v387_v61 = vrot.slane %v385_v54, 3  ;;  %v388_v62 = vrot.slane %v386_v55, 3 }
  0x1f   : > { %512 = vmatpush.bf16.msra.mxu0 %v503_v45  ;;  %v432_v63 = vrot.slane %v678_v56, 3  ;;  %v433_v0 = vrot.slane %v431_v57, 3  ;;  %v465_v1 = vrot.slane %v712_v43, 1  ;;  %v698_v7 = vunpack.c.h.b16 %v712_v43 }
  0x20   : > { %v466_v2 = vrot.slane %v464_v58, 1  ;;  %v358_v3 = vsel %vm216_vm1, %v356_v59, %v357_v60  ;;  %v389_v4 = vsel %vm248_vm2, %v387_v61, %v388_v62  ;;  %v702_v8 = vunpack.c.h.b16 %v713_v44  ;;  %v755_v44 = vld [vmem:[%s946_s2] ss:$0 sm:$0xff] }
  0x21   : > { %v434_v5 = vsel %vm248_vm2, %v432_v63, %v433_v0  ;;  %v494_v9 = vpack.c.b16 %v701_v52, %v698_v7 }
  0x22   : > { %v467_v6 = vsel %vm216_vm1, %v465_v1, %v466_v2  ;;  %v495_v10 = vpack.c.b16 %v702_v8, %v702_v8 }
  0x23   : > { %v496_v11 = vrot.slane %v494_v9, 3 }
  0x24   : > { %v497_v12 = vrot.slane %v495_v10, 3 }
  0x26   : > { %v498_v13 = vsel %vm248_vm2, %v496_v11, %v497_v12 }
  0x2d   : > { %655 = vmatmul.msk.bf16.vlgmr.msrb.gmra.mxu0 %vm220_vm3, %v358_v3  ;;  %657 = vmatmul.msk.bf16.vlgmr.msrb.gmra.mxu1 %vm220_vm3, %v389_v4 }
  0x2e   : > { %669 = vmatmul.msk.bf16.vlgmr.msrb.gmra.mxu2 %vm220_vm3, %v434_v5  ;;  %671 = vmatmul.msk.bf16.vlgmr.msrb.gmra.mxu3 %vm220_vm3, %v467_v6 }
  0x3d   : > { %673 = vmatmul.msk.bf16.vlgmr.msra.gmra.mxu0 %vm220_vm3, %v498_v13 }
  0x9a   : > { %v237_v14 = vpop.f32.mrf.mxu0  ;;  %v267_v15 = vpop.f32.mrf.mxu1 }
  0x9b   : > { %v268_v22 = vadd.f32 %v267_v15, %v237_v14 }
  0xa1   : > { %v296_v16 = vpop.f32.mrf.mxu2  ;;  %v341_v17 = vpop.f32.mrf.mxu3 }
  0xa2   : > { %v239_v18 = vpop.f32.mrf.mxu0  ;;  %v269_v19 = vpop.f32.mrf.mxu1  ;;  %v301_v24 = vadd.f32 %v296_v16, %v268_v22 }
  0xa3   : > { %v270_v26 = vadd.f32 %v269_v19, %v239_v18 }
  0xa4   : > { %v346_v27 = vadd.f32 %v341_v17, %v301_v24 }
  0xa9   : > { %v298_v20 = vpop.f32.mrf.mxu2  ;;  %v343_v23 = vpop.f32.mrf.mxu3 }
  0xaa   : > { %v374_v21 = vpop.f32.mrf.mxu0  ;;  %v405_v25 = vpop.f32.mrf.mxu1  ;;  %v302_v28 = vadd.f32 %v298_v20, %v270_v26 }
  0xab   : > { %v379_v31 = vadd.f32 %v374_v21, %v346_v27 }
  0xac   : > { %v347_v32 = vadd.f32 %v343_v23, %v302_v28 }
  0xad   : > { %v410_v34 = vadd.f32 %v405_v25, %v379_v31 }
  0xb1   : > { %v450_v29 = vpop.f32.mrf.mxu2  ;;  %v483_v33 = vpop.f32.mrf.mxu3 }
  0xb2   : > { %v376_v30 = vpop.f32.mrf.mxu0  ;;  %v407_v36 = vpop.f32.mrf.mxu1  ;;  %v455_v37 = vadd.f32 %v450_v29, %v410_v34 }
  0xb3   : > { %v380_v35 = vadd.f32 %v376_v30, %v347_v32 }
  0xb4   : > { %v488_v41 = vadd.f32 %v483_v33, %v455_v37 }
  0xb5   : > { %v411_v40 = vadd.f32 %v407_v36, %v380_v35 }
  0xb9   : > { %v452_v38 = vpop.f32.mrf.mxu2  ;;  %v485_v45 = vpop.f32.mrf.mxu3 }
  0xba   : > { %v514_v39 = vpop.f32.mrf.mxu0  ;;  %v456_v42 = vadd.f32 %v452_v38, %v411_v40 }
  0xbb   : > { %v519_v43 = vadd.f32 %v514_v39, %v488_v41 }
  0xbc   : > { %v489_v46 = vadd.f32 %v485_v45, %v456_v42 }
  0xbd   : > { %v525_v48 = vadd.f32 %v755_v44, %v519_v43 }
  0xbf   : > { %v527_v51 = vmax.f32 %v525_v48, 0.0 }
  0xc2   : > { %v516_v47 = vpop.f32.mrf.mxu0 }
  0xc3   : > { %v520_v49 = vadd.f32 %v516_v47, %v489_v46 }
  0xc5   : > { %v526_v50 = vadd.f32 %v755_v44, %v520_v49 }
  0xc7   : > { %v528_v52 = vmax.f32 %v526_v50, 0.0 }
  0xc9   : > { %v706_v53 = vpack.c.bf16 %v528_v52, %v527_v51 }
  0xcb   : > { %707 = vst [vmem:[%s190_s30] sm:$0xff] %v706_v53  }
  0xcc PF: > { %s13_s16 = sadd.s32 1, %s794_s16   ;;  %s948_s12 = smov %s786_s14 }
  0xcd   : > { %p10_p7 = scmp.ge.s32.totalorder %s13_s16, 34   ;;  %s949_s13 = smov %s790_s15 }
  0xce   : > { %s950_s14 = smov %s953_s17  ;;  %s951_s15 = smov %s957_s18 }
  0xcf   :  { %12 = sbr.rel (!%p10_p7) target bundleno = 3 (0x3), region = 73 }

// kernel: aspp_forward.6
= control target key start
LH: loop header
LB: loop body
LE: loop exit
PB: predicated region body
PF: predicated region fallthrough
CT: control target
= control target key end

     0   :  { %s1271_s12 = smov 0   ;;  %s1273_s13 = smov 0   ;;  %s1411_s0 = inlined_call_operand.vmem [shape: bf16[512,128], index: 0, kind: input, shape index: {}]   ;;  %s1412_s1 = inlined_call_operand.vmem [shape: bf16[128,128], index: 1, kind: input, shape index: {}]   ;;  %s1413_s2 = inlined_call_operand.vmem [shape: f32[1,128], index: 2, kind: input, shape index: {}]   ;;  %s1414_s3 = inlined_call_operand.vmem [shape: bf16[512,128], index: 3, kind: output, shape index: {}]  }
   0x1   :  { %s1275_s14 = smov 0  }
   0x2 LB: > { %s32_s15 = sadd.s32 1, %s1245_s13  ;;  %p956_p0 = scmp.ge.s32.totalorder %s1249_s14, 1  ;;  %s1249_s14 = sphi %s1275_s14, %s13_s14   ;;  %s1245_s13 = sphi %s1273_s13, %s1416_s13   ;;  %s1241_s12 = sphi %s1271_s12, %s1415_s12  }
   0x3   : > { %p34_p1 = scmp.ge.s32.totalorder %s32_s15, 2  ;;  %p188_p2 = scmp.lt.s32.totalorder %s1249_s14, 3 }
   0x5   : > { %s1418_s15 = smov (%p34_p1, %s32_s15), 0  ;;  %p189_p3 = pnand %p956_p0, %p188_p2 }
   0x6   : > { %s957_s24 = sshll.u32 (!%p189_p3), %s1241_s12, 5 }
   0x7   : > { %192 = sbr.rel (%p189_p3) target bundleno = 241 (0xf1), region = 32  ;;  %p230_p4 = scmp.lt.s32.totalorder (!%p189_p3), %s957_s24, 63 }
   0xc   : > { %v1082_v0 = vld [vmem:[%s1412_s1 + $0x38] sm:$0xff]  ;;  %v1081_v1 = vld [vmem:[%s1412_s1 + $0x30] sm:$0xff]  ;;  %v1080_v2 = vld [vmem:[%s1412_s1 + $0x28] sm:$0xff]  ;;  %s1420_s24 = smov (!%p230_p4, %s957_s24), 63 }
   0xd   : > { %519 = vmatpush.bf16.msra.mxu0 %v1082_v0  ;;  %1178 = vmatpush.bf16.msra.mxu1 %v1082_v0  ;;  %v1079_v3 = vld [vmem:[%s1412_s1 + $0x20] sm:$0xff]  ;;  %v1078_v4 = vld [vmem:[%s1412_s1 + $0x18] sm:$0xff]  ;;  %v1077_v5 = vld [vmem:[%s1412_s1 + $0x10] sm:$0xff]  ;;  %s958_s4 = sshll.u32 %s1420_s24, 2 }
   0xe   : > { %1179 = vmatpush.bf16.msra.mxu2 %v1082_v0  ;;  %1180 = vmatpush.bf16.msra.mxu3 %v1082_v0  ;;  %v1076_v6 = vld [vmem:[%s1412_s1 + $0x8] sm:$0xff]  ;;  %v1075_v7 = vld [vmem:[%s1412_s1] sm:$0xff]  ;;  %s1324_s9 = scalar_lea.vmem %s1411_s0, %s958_s4  ;;  %s1356_s17 = scalar_lea.vmem %s1414_s3, %s958_s4 }
   0xf   : > { %v1059_v8 = vld [vmem:[%s1324_s9] sm:$0xff]  ;;  %v1060_v12 = vld [vmem:[%s1324_s9 + $0x8] sm:$0xff]  ;;  %v1061_v16 = vld [vmem:[%s1324_s9 + $0x10] sm:$0xff] }
  0x10   : > { %v1063_v9 = vld [vmem:[%s1324_s9 + $0x20] sm:$0xff]  ;;  %v1064_v13 = vld [vmem:[%s1324_s9 + $0x28] sm:$0xff]  ;;  %v1065_v17 = vld [vmem:[%s1324_s9 + $0x30] sm:$0xff] }
  0x11   : > { %520 = vmatpush.bf16.msra.mxu0 %v1081_v1  ;;  %1181 = vmatpush.bf16.msra.mxu1 %v1081_v1  ;;  %v1067_v10 = vld [vmem:[%s1324_s9 + $0x40] sm:$0xff]  ;;  %v1068_v14 = vld [vmem:[%s1324_s9 + $0x48] sm:$0xff]  ;;  %v1069_v18 = vld [vmem:[%s1324_s9 + $0x50] sm:$0xff] }
  0x12   : > { %1182 = vmatpush.bf16.msra.mxu2 %v1081_v1  ;;  %1183 = vmatpush.bf16.msra.mxu3 %v1081_v1  ;;  %v1071_v11 = vld [vmem:[%s1324_s9 + $0x60] sm:$0xff]  ;;  %v1072_v15 = vld [vmem:[%s1324_s9 + $0x68] sm:$0xff]  ;;  %v1073_v19 = vld [vmem:[%s1324_s9 + $0x70] sm:$0xff] }
  0x13   : > { %v1062_v20 = vld [vmem:[%s1324_s9 + $0x18] sm:$0xff]  ;;  %v1345_v26 = vld [vmem:[%s1413_s2] ss:$0 sm:$0xff] }
  0x14   : > { %v1066_v21 = vld [vmem:[%s1324_s9 + $0x38] sm:$0xff] }
  0x15   : > { %521 = vmatpush.bf16.msra.mxu0 %v1080_v2  ;;  %1184 = vmatpush.bf16.msra.mxu1 %v1080_v2  ;;  %v1070_v22 = vld [vmem:[%s1324_s9 + $0x58] sm:$0xff] }
  0x16   : > { %1185 = vmatpush.bf16.msra.mxu2 %v1080_v2  ;;  %1186 = vmatpush.bf16.msra.mxu3 %v1080_v2  ;;  %v1074_v23 = vld [vmem:[%s1324_s9 + $0x78] sm:$0xff] }
  0x19   : > { %522 = vmatpush.bf16.msra.mxu0 %v1079_v3  ;;  %1187 = vmatpush.bf16.msra.mxu1 %v1079_v3 }
  0x1a   : > { %1188 = vmatpush.bf16.msra.mxu2 %v1079_v3  ;;  %1189 = vmatpush.bf16.msra.mxu3 %v1079_v3 }
  0x1d   : > { %523 = vmatpush.bf16.msra.mxu0 %v1078_v4  ;;  %1190 = vmatpush.bf16.msra.mxu1 %v1078_v4 }
  0x1e   : > { %1191 = vmatpush.bf16.msra.mxu2 %v1078_v4  ;;  %1192 = vmatpush.bf16.msra.mxu3 %v1078_v4 }
  0x21   : > { %524 = vmatpush.bf16.msra.mxu0 %v1077_v5  ;;  %1193 = vmatpush.bf16.msra.mxu1 %v1077_v5 }
  0x22   : > { %1194 = vmatpush.bf16.msra.mxu2 %v1077_v5  ;;  %1195 = vmatpush.bf16.msra.mxu3 %v1077_v5 }
  0x25   : > { %525 = vmatpush.bf16.msra.mxu0 %v1076_v6  ;;  %1196 = vmatpush.bf16.msra.mxu1 %v1076_v6 }
  0x26   : > { %1197 = vmatpush.bf16.msra.mxu2 %v1076_v6  ;;  %1198 = vmatpush.bf16.msra.mxu3 %v1076_v6 }
  0x29   : > { %526 = vmatpush.bf16.msra.mxu0 %v1075_v7  ;;  %1199 = vmatpush.bf16.msra.mxu1 %v1075_v7 }
  0x2a   : > { %1200 = vmatpush.bf16.msra.mxu2 %v1075_v7  ;;  %1201 = vmatpush.bf16.msra.mxu3 %v1075_v7 }
  0x2c   : > { %527 = vmatmul.bf16.vlgmr.msra.gmra.mxu0 %v1059_v8  ;;  %547 = vmatmul.bf16.vlgmr.msra.gmra.mxu1 %v1063_v9 }
  0x2d   : > { %567 = vmatmul.bf16.vlgmr.msra.gmra.mxu2 %v1067_v10  ;;  %587 = vmatmul.bf16.vlgmr.msra.gmra.mxu3 %v1071_v11 }
  0x3c   : > { %532 = vmatmul.bf16.gmra.mxu0 %v1060_v12  ;;  %552 = vmatmul.bf16.gmra.mxu1 %v1064_v13 }
  0x3d   : > { %572 = vmatmul.bf16.gmra.mxu2 %v1068_v14  ;;  %592 = vmatmul.bf16.gmra.mxu3 %v1072_v15 }
  0x4c   : > { %537 = vmatmul.bf16.gmra.mxu0 %v1061_v16  ;;  %557 = vmatmul.bf16.gmra.mxu1 %v1065_v17 }
  0x4d   : > { %577 = vmatmul.bf16.gmra.mxu2 %v1069_v18  ;;  %597 = vmatmul.bf16.gmra.mxu3 %v1073_v19 }
  0x5c   : > { %542 = vmatmul.bf16.gmra.mxu0 %v1062_v20  ;;  %562 = vmatmul.bf16.gmra.mxu1 %v1066_v21 }
  0x5d   : > { %582 = vmatmul.bf16.gmra.mxu2 %v1070_v22  ;;  %602 = vmatmul.bf16.gmra.mxu3 %v1074_v23 }
  0xa9   : > { %v528_v24 = vpop.f32.mrf.mxu0  ;;  %v548_v25 = vpop.f32.mrf.mxu1 }
  0xaa   : > { %v711_v27 = vadd.f32 %v1345_v26, %v528_v24  ;;  %v719_v28 = vadd.f32 %v1345_v26, %v548_v25 }
  0xac   : > { %v743_v35 = vmax.f32 %v711_v27, 0.0  ;;  %v751_v36 = vmax.f32 %v719_v28, 0.0 }
  0xb0   : > { %v568_v29 = vpop.f32.mrf.mxu2  ;;  %v588_v30 = vpop.f32.mrf.mxu3 }
  0xb1   : > { %v530_v31 = vpop.f32.mrf.mxu0  ;;  %v550_v32 = vpop.f32.mrf.mxu1  ;;  %v727_v41 = vadd.f32 %v1345_v26, %v568_v29  ;;  %v735_v42 = vadd.f32 %v1345_v26, %v588_v30 }
  0xb2   : > { %v712_v33 = vadd.f32 %v1345_v26, %v530_v31  ;;  %v720_v34 = vadd.f32 %v1345_v26, %v550_v32 }
  0xb3   : > { %v759_v49 = vmax.f32 %v727_v41, 0.0  ;;  %v767_v50 = vmax.f32 %v735_v42, 0.0 }
  0xb4   : > { %v744_v37 = vmax.f32 %v712_v33, 0.0  ;;  %v752_v38 = vmax.f32 %v720_v34, 0.0 }
  0xb6   : > { %v1086_v39 = vpack.c.bf16 %v744_v37, %v743_v35  ;;  %v1106_v40 = vpack.c.bf16 %v752_v38, %v751_v36 }
  0xb8   : > { %1087 = vst [vmem:[%s1356_s17] sm:$0xff] %v1086_v39   ;;  %v570_v43 = vpop.f32.mrf.mxu2  ;;  %v590_v44 = vpop.f32.mrf.mxu3 }
  0xb9   : > { %1166 = vst [vmem:[%s1356_s17 + $0x20] sm:$0xff] %v1106_v40   ;;  %v728_v45 = vadd.f32 %v1345_v26, %v570_v43  ;;  %v736_v46 = vadd.f32 %v1345_v26, %v590_v44  ;;  %v533_v47 = vpop.f32.mrf.mxu0  ;;  %v553_v48 = vpop.f32.mrf.mxu1 }
  0xba   : > { %v713_v55 = vadd.f32 %v1345_v26, %v533_v47  ;;  %v721_v56 = vadd.f32 %v1345_v26, %v553_v48 }
  0xbb   : > { %v760_v51 = vmax.f32 %v728_v45, 0.0  ;;  %v768_v52 = vmax.f32 %v736_v46, 0.0 }
  0xbc   : > { %v745_v63 = vmax.f32 %v713_v55, 0.0  ;;  %v753_v0 = vmax.f32 %v721_v56, 0.0 }
  0xbd   : > { %v1126_v53 = vpack.c.bf16 %v760_v51, %v759_v49  ;;  %v1146_v54 = vpack.c.bf16 %v768_v52, %v767_v50 }
  0xbf   : > { %1170 = vst [vmem:[%s1356_s17 + $0x40] sm:$0xff] %v1126_v53  }
  0xc0   : > { %1174 = vst [vmem:[%s1356_s17 + $0x60] sm:$0xff] %v1146_v54   ;;  %v573_v57 = vpop.f32.mrf.mxu2  ;;  %v593_v58 = vpop.f32.mrf.mxu3 }
  0xc1   : > { %v535_v59 = vpop.f32.mrf.mxu0  ;;  %v555_v60 = vpop.f32.mrf.mxu1  ;;  %v729_v5 = vadd.f32 %v1345_v26, %v573_v57  ;;  %v737_v6 = vadd.f32 %v1345_v26, %v593_v58 }
  0xc2   : > { %v714_v61 = vadd.f32 %v1345_v26, %v535_v59  ;;  %v722_v62 = vadd.f32 %v1345_v26, %v555_v60 }
  0xc3   : > { %v761_v13 = vmax.f32 %v729_v5, 0.0  ;;  %v769_v14 = vmax.f32 %v737_v6, 0.0 }
  0xc4   : > { %v746_v1 = vmax.f32 %v714_v61, 0.0  ;;  %v754_v2 = vmax.f32 %v722_v62, 0.0 }
  0xc6   : > { %v1091_v3 = vpack.c.bf16 %v746_v1, %v745_v63  ;;  %v1111_v4 = vpack.c.bf16 %v754_v2, %v753_v0 }
  0xc8   : > { %1163 = vst [vmem:[%s1356_s17 + $0x8] sm:$0xff] %v1091_v3   ;;  %v575_v7 = vpop.f32.mrf.mxu2  ;;  %v595_v8 = vpop.f32.mrf.mxu3 }
  0xc9   : > { %1167 = vst [vmem:[%s1356_s17 + $0x28] sm:$0xff] %v1111_v4   ;;  %v730_v9 = vadd.f32 %v1345_v26, %v575_v7  ;;  %v738_v10 = vadd.f32 %v1345_v26, %v595_v8  ;;  %v538_v11 = vpop.f32.mrf.mxu0  ;;  %v558_v12 = vpop.f32.mrf.mxu1 }
  0xca   : > { %v715_v19 = vadd.f32 %v1345_v26, %v538_v11  ;;  %v723_v20 = vadd.f32 %v1345_v26, %v558_v12 }
  0xcb   : > { %v762_v15 = vmax.f32 %v730_v9, 0.0  ;;  %v770_v16 = vmax.f32 %v738_v10, 0.0 }
  0xcc   : > { %v747_v28 = vmax.f32 %v715_v19, 0.0  ;;  %v755_v29 = vmax.f32 %v723_v20, 0.0 }
  0xcd   : > { %v1131_v17 = vpack.c.bf16 %v762_v15, %v761_v13  ;;  %v1151_v18 = vpack.c.bf16 %v770_v16, %v769_v14 }
  0xcf   : > { %1171 = vst [vmem:[%s1356_s17 + $0x48] sm:$0xff] %v1131_v17  }
  0xd0   : > { %1175 = vst [vmem:[%s1356_s17 + $0x68] sm:$0xff] %v1151_v18   ;;  %v578_v21 = vpop.f32.mrf.mxu2  ;;  %v598_v22 = vpop.f32.mrf.mxu3 }
  0xd1   : > { %v540_v23 = vpop.f32.mrf.mxu0  ;;  %v560_v24 = vpop.f32.mrf.mxu1  ;;  %v731_v34 = vadd.f32 %v1345_v26, %v578_v21  ;;  %v739_v35 = vadd.f32 %v1345_v26, %v598_v22 }
  0xd2   : > { %v716_v25 = vadd.f32 %v1345_v26, %v540_v23  ;;  %v724_v27 = vadd.f32 %v1345_v26, %v560_v24 }
  0xd3   : > { %v763_v42 = vmax.f32 %v731_v34, 0.0  ;;  %v771_v43 = vmax.f32 %v739_v35, 0.0 }
  0xd4   : > { %v748_v30 = vmax.f32 %v716_v25, 0.0  ;;  %v756_v31 = vmax.f32 %v724_v27, 0.0 }
  0xd6   : > { %v1096_v32 = vpack.c.bf16 %v748_v30, %v747_v28  ;;  %v1116_v33 = vpack.c.bf16 %v756_v31, %v755_v29 }
  0xd8   : > { %1164 = vst [vmem:[%s1356_s17 + $0x10] sm:$0xff] %v1096_v32   ;;  %v580_v36 = vpop.f32.mrf.mxu2  ;;  %v600_v37 = vpop.f32.mrf.mxu3 }
  0xd9   : > { %1168 = vst [vmem:[%s1356_s17 + $0x30] sm:$0xff] %v1116_v33   ;;  %v732_v38 = vadd.f32 %v1345_v26, %v580_v36  ;;  %v740_v39 = vadd.f32 %v1345_v26, %v600_v37  ;;  %v543_v40 = vpop.f32.mrf.mxu0  ;;  %v563_v41 = vpop.f32.mrf.mxu1 }
  0xda   : > { %v717_v48 = vadd.f32 %v1345_v26, %v543_v40  ;;  %v725_v49 = vadd.f32 %v1345_v26, %v563_v41 }
  0xdb   : > { %v764_v44 = vmax.f32 %v732_v38, 0.0  ;;  %v772_v45 = vmax.f32 %v740_v39, 0.0 }
  0xdc   : > { %v749_v56 = vmax.f32 %v717_v48, 0.0  ;;  %v757_v57 = vmax.f32 %v725_v49, 0.0 }
  0xdd   : > { %v1136_v46 = vpack.c.bf16 %v764_v44, %v763_v42  ;;  %v1156_v47 = vpack.c.bf16 %v772_v45, %v771_v43 }
  0xdf   : > { %1172 = vst [vmem:[%s1356_s17 + $0x50] sm:$0xff] %v1136_v46  }
  0xe0   : > { %1176 = vst [vmem:[%s1356_s17 + $0x70] sm:$0xff] %v1156_v47   ;;  %v583_v50 = vpop.f32.mrf.mxu2  ;;  %v603_v51 = vpop.f32.mrf.mxu3 }
  0xe1   : > { %v545_v52 = vpop.f32.mrf.mxu0  ;;  %v565_v53 = vpop.f32.mrf.mxu1  ;;  %v733_v62 = vadd.f32 %v1345_v26, %v583_v50  ;;  %v741_v63 = vadd.f32 %v1345_v26, %v603_v51 }
  0xe2   : > { %v718_v54 = vadd.f32 %v1345_v26, %v545_v52  ;;  %v726_v55 = vadd.f32 %v1345_v26, %v565_v53 }
  0xe3   : > { %v765_v4 = vmax.f32 %v733_v62, 0.0  ;;  %v773_v5 = vmax.f32 %v741_v63, 0.0 }
  0xe4   : > { %v750_v58 = vmax.f32 %v718_v54, 0.0  ;;  %v758_v59 = vmax.f32 %v726_v55, 0.0 }
  0xe6   : > { %v1101_v60 = vpack.c.bf16 %v750_v58, %v749_v56  ;;  %v1121_v61 = vpack.c.bf16 %v758_v59, %v757_v57 }
  0xe8   : > { %1165 = vst [vmem:[%s1356_s17 + $0x18] sm:$0xff] %v1101_v60   ;;  %v585_v0 = vpop.f32.mrf.mxu2  ;;  %v605_v1 = vpop.f32.mrf.mxu3 }
  0xe9   : > { %1169 = vst [vmem:[%s1356_s17 + $0x38] sm:$0xff] %v1121_v61   ;;  %v734_v2 = vadd.f32 %v1345_v26, %v585_v0  ;;  %v742_v3 = vadd.f32 %v1345_v26, %v605_v1 }
  0xeb   : > { %v766_v6 = vmax.f32 %v734_v2, 0.0  ;;  %v774_v7 = vmax.f32 %v742_v3, 0.0 }
  0xed   : > { %v1141_v8 = vpack.c.bf16 %v766_v6, %v765_v4  ;;  %v1161_v9 = vpack.c.bf16 %v774_v7, %v773_v5 }
  0xef   : > { %1173 = vst [vmem:[%s1356_s17 + $0x58] sm:$0xff] %v1141_v8  }
  0xf0   : > { %1177 = vst [vmem:[%s1356_s17 + $0x78] sm:$0xff] %v1161_v9  }
  0xf1 PF: > { %s13_s14 = sadd.s32 1, %s1249_s14   ;;  %s1415_s12 = smov %s1245_s13 }
  0xf2   : > { %p10_p5 = scmp.ge.s32.totalorder %s13_s14, 4   ;;  %s1416_s13 = smov %s1418_s15 }
  0xf4   :  { %12 = sbr.rel (!%p10_p5) target bundleno = 2 (0x2), region = 76 }

// kernel: aspp_forward.9
= control target key start
LH: loop header
LB: loop body
LE: loop exit
PB: predicated region body
PF: predicated region fallthrough
CT: control target
= control target key end

     0   :  { %s809_s12 = smov 0   ;;  %s811_s13 = smov 0   ;;  %s937_s0 = inlined_call_operand.vmem [shape: bf16[2,52,52,8], index: 0, kind: input, shape index: {}]   ;;  %s938_s1 = inlined_call_operand.vmem [shape: bf16[9,8,128], index: 1, kind: input, shape index: {}]   ;;  %s939_s2 = inlined_call_operand.vmem [shape: f32[1,128], index: 2, kind: input, shape index: {}]   ;;  %s940_s3 = inlined_call_operand.vmem [shape: bf16[512,128], index: 3, kind: output, shape index: {}]  }
   0x1   :  { %s813_s14 = smov 0   ;;  %s815_s15 = smov 0  }
   0x2   :  { %s817_s16 = smov 0  }
   0x3 LB: > { %s22_s17 = sadd.s32 1, %s779_s14  ;;  %s25_s18 = sadd.s32 1, %s783_s15  ;;  %s787_s16 = sphi %s817_s16, %s13_s16   ;;  %s783_s15 = sphi %s815_s15, %s944_s15   ;;  %s779_s14 = sphi %s813_s14, %s943_s14   ;;  %s775_s13 = sphi %s811_s13, %s942_s13   ;;  %s771_s12 = sphi %s809_s12, %s941_s12  }
   0x4   : > { %p23_p0 = scmp.ge.s32.totalorder %s22_s17, 16  ;;  %p617_p1 = scmp.ge.s32.totalorder %s787_s16, 1 }
   0x5   : > { %p153_p2 = scmp.lt.s32.totalorder %s787_s16, 33 }
   0x6   : > { %s946_s17 = smov (%p23_p0, %s22_s17), 0  ;;  %s948_s18 = smov (!%p23_p0, %s25_s18), %s783_s15 }
   0x7   : > { %p154_p3 = pnand %p617_p1, %p153_p2  ;;  %p27_p4 = scmp.ge.s32.totalorder %s948_s18, 2 }
   0x8   : > { %p179_p5 = scmp.lt.s32.totalorder (!%p154_p3), %s775_s13, 1  ;;  %s680_s28 = smul.u32 (!%p154_p3), 28, %s771_s12 }
   0x9   : > { %s950_s18 = smov (%p27_p4, %s948_s18), 0  ;;  %157 = sbr.rel (%p154_p3) target bundleno = 204 (0xcc), region = 32 }
   0xa   : > { %s619_s24 = sshll.u32 (!%p154_p3), %s775_s13, 4 }
   0xb   : > { %s185_s25 = sadd.s32 (!%p154_p3), %s771_s12, %s619_s24 }
   0xc   : > { %s620_s26 = sshll.u32 (!%p154_p3), %s185_s25, 1 }
   0xd   : > { %p187_p6 = scmp.lt.s32.totalorder (!%p154_p3), %s620_s26, 63 }
   0xe   : > { %v623_v0 = vld [vmem:[%s938_s1 + $0x4] sm:$0xf]  ;;  %vm224_vm0 = vcmask 1043456   ;;  %v205_v1 = vld [vmem:[%s938_s1] sm:$0xf]  ;;  %s180_s27 = scalar_select %p179_p5, %s775_s13, 1 }
   0xf   : > { %v226_v2 = vsel %vm224_vm0, %v623_v0, 0  ;;  %v251_v3 = vsel %vm224_vm0, %v205_v1, 0  ;;  %v634_v4 = vld [vmem:[%s938_s1 + $0x8] sm:$0xf]  ;;  %v643_v5 = vld [vmem:[%s938_s1 + $0xc] sm:$0xf] }
  0x10   : > { %235 = vmatpush.bf16.msra.mxu0 %v226_v2  ;;  %260 = vmatpush.bf16.msra.mxu1 %v251_v3  ;;  %v283_v6 = vsel %vm224_vm0, %v634_v4, 0  ;;  %v323_v7 = vsel %vm224_vm0, %v643_v5, 0  ;;  %v649_v8 = vld [vmem:[%s938_s1 + $0x10] sm:$0xf]  ;;  %v664_v9 = vld [vmem:[%s938_s1 + $0x18] sm:$0xf] }
  0x11   : > { %292 = vmatpush.bf16.msra.mxu2 %v283_v6  ;;  %332 = vmatpush.bf16.msra.mxu3 %v323_v7  ;;  %s707_s6 = smul.u32 1456, %s180_s27  ;;  %v358_v10 = vsel %vm224_vm0, %v649_v8, 0  ;;  %v431_v11 = vsel %vm224_vm0, %v664_v9, 0  ;;  %v670_v12 = vld [vmem:[%s938_s1 + $0x1c] sm:$0xf]  ;;  %vm220_vm1 = vcmask 64512  }
  0x12   : > { %v466_v13 = vsel %vm224_vm0, %v670_v12, 0  ;;  %v655_v14 = vld [vmem:[%s938_s1 + $0x14] sm:$0xf]  ;;  %vm216_vm2 = vcmask 1046528   ;;  %v676_v26 = vld [vmem:[%s938_s1 + $0x20] sm:$0xf] }
  0x13   : > { %s183_s20 = scalar_lea.vmem %s937_s0, %s707_s6  ;;  %v391_v15 = vsel %vm224_vm0, %v655_v14, 0  ;;  %vm275_vm3 = vcmask 1045504   ;;  %v499_v35 = vsel %vm224_vm0, %v676_v26, 0  ;;  %v748_v26 = vld [vmem:[%s939_s2] ss:$0 sm:$0xff]  ;;  %s952_s26 = smov (!%p187_p6, %s620_s26), 63 }
  0x14   : > { %367 = vmatpush.bf16.msrb.mxu0 %v358_v10  ;;  %s881_s21 = scalar_lea.vmem %s183_s20, %s680_s28  ;;  %400 = vmatpush.bf16.msrb.mxu1 %v391_v15  ;;  %s621_s12 = sshll.u32 %s952_s26, 2 }
  0x15   : > { %440 = vmatpush.bf16.msrb.mxu2 %v431_v11  ;;  %475 = vmatpush.bf16.msrb.mxu3 %v466_v13  ;;  %v682_v16 = vld [vmem:[%s881_s21 + $0x8] sm:$0xff]  ;;  %v704_v17 = vld [vmem:[%s881_s21 + $0x10] sm:$0xff]   ;;  %v681_v18 = vld [vmem:[%s881_s21] sm:$0xff]  ;;  %s190_s30 = scalar_lea.vmem %s940_s3, %s621_s12 }
  0x16   : > { %v689_v19 = vunpack.c.l.b16 %v704_v17  ;;  %v204_v20 = vld [vmem:[%s881_s21 + $0x18] sm:$0x3]  ;;  %633 = vmatmul.msk.bf16.vlgmr.msra.gmra.mxu1 %vm220_vm1, %v681_v18  ;;  %v217_v24 = vrot.slane %v682_v16, 1  ;;  %v706_v25 = vld [vmem:[%s881_s21 + $0x400] sm:$0xff]   ;;  %v642_v27 = vld [vmem:[%s881_s21 + $0x210] sm:$0x3] }
  0x17   : > { %v683_v21 = vld [vmem:[%s881_s21 + $0x1f8] sm:$0xff]  ;;  %v272_v22 = vunpack.c.l.b16 %v204_v20  ;;  %v276_v29 = vrot.slane %v704_v17, 2  ;;  %v697_v30 = vunpack.c.l.b16 %v706_v25  ;;  %v381_v31 = vunpack.c.l.b16 %v642_v27  ;;  %v705_v34 = vld [vmem:[%s881_s21 + $0x208] sm:$0xff]   ;;  %v684_v46 = vld [vmem:[%s881_s21 + $0x200] sm:$0xff] }
  0x18   : > { %v215_v23 = vpack.c.b16 %v689_v19, %v689_v19  ;;  %648 = vmatmul.msk.bf16.vlgmr.msra.gmra.mxu3 %vm220_vm1, %v683_v21  ;;  %v686_v39 = vld [vmem:[%s881_s21 + $0x3f8] sm:$0xff]  ;;  %v693_v41 = vunpack.c.l.b16 %v705_v34  ;;  %v384_v42 = vrot.slane %v705_v34, 2  ;;  %v351_v50 = vrot.slane %v684_v46, 1  ;;  %v685_v53 = vld [vmem:[%s881_s21 + $0x3f0] sm:$0xff]  ;;  %v663_v54 = vld [vmem:[%s881_s21 + $0x408] sm:$0x3] }
  0x19   : > { %v274_v28 = vpack.c.b16 %v272_v22, %v272_v22  ;;  %v383_v37 = vpack.c.b16 %v381_v31, %v381_v31  ;;  %v458_v40 = vpack.c.b16 %v697_v30, %v697_v30  ;;  %v459_v44 = vrot.slane %v686_v39, 1 }
  0x1a   : > { %v218_v32 = vrot.slane %v215_v23, 1  ;;  %v350_v47 = vpack.c.b16 %v693_v41, %v693_v41  ;;  %v489_v55 = vunpack.c.l.b16 %v663_v54  ;;  %v492_v57 = vrot.slane %v706_v25, 2 }
  0x1b   : > { %v277_v33 = vrot.slane %v274_v28, 2  ;;  %v385_v43 = vrot.slane %v383_v37, 2  ;;  %v460_v45 = vrot.slane %v458_v40, 1 }
  0x1c   : > { %v219_v36 = vsel %vm216_vm2, %v217_v24, %v218_v32  ;;  %v352_v51 = vrot.slane %v350_v47, 1  ;;  %v491_v56 = vpack.c.b16 %v489_v55, %v489_v55 }
  0x1d   : > { %628 = vmatmul.msk.bf16.vlgmr.msra.gmra.mxu0 %vm220_vm1, %v219_v36  ;;  %v278_v38 = vsel %vm275_vm3, %v276_v29, %v277_v33  ;;  %v386_v48 = vsel %vm275_vm3, %v384_v42, %v385_v43  ;;  %v461_v49 = vsel %vm216_vm2, %v459_v44, %v460_v45 }
  0x1e   : > { %635 = vmatmul.msk.bf16.vlgmr.msra.gmra.mxu2 %vm220_vm1, %v278_v38  ;;  %508 = vmatpush.bf16.msra.mxu0 %v499_v35  ;;  %v353_v52 = vsel %vm216_vm2, %v351_v50, %v352_v51  ;;  %v493_v58 = vrot.slane %v491_v56, 2 }
  0x20   : > { %v494_v59 = vsel %vm275_vm3, %v492_v57, %v493_v58 }
  0x26   : > { %656 = vmatmul.msk.bf16.vlgmr.msrb.gmra.mxu1 %vm220_vm1, %v386_v48 }
  0x28   : > { %675 = vmatmul.msk.bf16.vlgmr.msrb.gmra.mxu3 %vm220_vm1, %v461_v49 }
  0x2d   : > { %654 = vmatmul.msk.bf16.vlgmr.msrb.gmra.mxu0 %vm220_vm1, %v353_v52 }
  0x2e   : > { %669 = vmatmul.msk.bf16.vlgmr.msrb.gmra.mxu2 %vm220_vm1, %v685_v53 }
  0x3d   : > { %677 = vmatmul.msk.bf16.vlgmr.msra.gmra.mxu0 %vm220_vm1, %v494_v59 }
  0x93   : > { %v262_v61 = vpop.f32.mrf.mxu1 }
  0x9a   : > { %v237_v60 = vpop.f32.mrf.mxu0 }
  0x9b   : > { %v334_v63 = vpop.f32.mrf.mxu3  ;;  %v264_v1 = vpop.f32.mrf.mxu1  ;;  %v263_v4 = vadd.f32 %v262_v61, %v237_v60 }
  0xa1   : > { %v294_v62 = vpop.f32.mrf.mxu2 }
  0xa2   : > { %v239_v0 = vpop.f32.mrf.mxu0  ;;  %v299_v6 = vadd.f32 %v294_v62, %v263_v4 }
  0xa3   : > { %v336_v5 = vpop.f32.mrf.mxu3  ;;  %v402_v7 = vpop.f32.mrf.mxu1  ;;  %v265_v8 = vadd.f32 %v264_v1, %v239_v0 }
  0xa4   : > { %v339_v9 = vadd.f32 %v334_v63, %v299_v6 }
  0xa9   : > { %v296_v2 = vpop.f32.mrf.mxu2 }
  0xaa   : > { %v369_v3 = vpop.f32.mrf.mxu0  ;;  %v300_v10 = vadd.f32 %v296_v2, %v265_v8 }
  0xab   : > { %v374_v13 = vadd.f32 %v369_v3, %v339_v9  ;;  %v477_v15 = vpop.f32.mrf.mxu3  ;;  %v404_v18 = vpop.f32.mrf.mxu1 }
  0xac   : > { %v340_v14 = vadd.f32 %v336_v5, %v300_v10 }
  0xad   : > { %v407_v16 = vadd.f32 %v402_v7, %v374_v13 }
  0xb1   : > { %v442_v11 = vpop.f32.mrf.mxu2 }
  0xb2   : > { %v371_v12 = vpop.f32.mrf.mxu0  ;;  %v447_v19 = vadd.f32 %v442_v11, %v407_v16 }
  0xb3   : > { %v375_v17 = vadd.f32 %v371_v12, %v340_v14  ;;  %v479_v27 = vpop.f32.mrf.mxu3 }
  0xb4   : > { %v482_v23 = vadd.f32 %v477_v15, %v447_v19 }
  0xb5   : > { %v408_v22 = vadd.f32 %v404_v18, %v375_v17 }
  0xb9   : > { %v444_v20 = vpop.f32.mrf.mxu2 }
  0xba   : > { %v510_v21 = vpop.f32.mrf.mxu0  ;;  %v448_v24 = vadd.f32 %v444_v20, %v408_v22 }
  0xbb   : > { %v515_v25 = vadd.f32 %v510_v21, %v482_v23 }
  0xbc   : > { %v483_v28 = vadd.f32 %v479_v27, %v448_v24 }
  0xbd   : > { %v521_v30 = vadd.f32 %v748_v26, %v515_v25 }
  0xbf   : > { %v523_v33 = vmax.f32 %v521_v30, 0.0 }
  0xc2   : > { %v512_v29 = vpop.f32.mrf.mxu0 }
  0xc3   : > { %v516_v31 = vadd.f32 %v512_v29, %v483_v28 }
  0xc5   : > { %v522_v32 = vadd.f32 %v748_v26, %v516_v31 }
  0xc7   : > { %v524_v34 = vmax.f32 %v522_v32, 0.0 }
  0xc9   : > { %v702_v35 = vpack.c.bf16 %v524_v34, %v523_v33 }
  0xcb   : > { %703 = vst [vmem:[%s190_s30] sm:$0xff] %v702_v35  }
  0xcc PF: > { %s13_s16 = sadd.s32 1, %s787_s16   ;;  %s941_s12 = smov %s779_s14 }
  0xcd   : > { %p10_p7 = scmp.ge.s32.totalorder %s13_s16, 34   ;;  %s942_s13 = smov %s783_s15 }
  0xce   : > { %s943_s14 = smov %s946_s17  ;;  %s944_s15 = smov %s950_s18 }
  0xcf   :  { %12 = sbr.rel (!%p10_p7) target bundleno = 3 (0x3), region = 73 }

// kernel: aspp_forward.10
= control target key start
LH: loop header
LB: loop body
LE: loop exit
PB: predicated region body
PF: predicated region fallthrough
CT: control target
= control target key end

     0   :  { %s284_s1 = inlined_call_operand.vmem [shape: bf16[128,128], index: 1, kind: input, shape index: {}]   ;;  %s285_s2 = inlined_call_operand.vmem [shape: f32[1,128], index: 2, kind: input, shape index: {}]   ;;  %s286_s0 = inlined_call_operand.vmem [shape: bf16[32,128], index: 0, kind: input, shape index: {}]   ;;  %s287_s3 = inlined_call_operand.vmem [shape: f32[32,128], index: 3, kind: output, shape index: {}]  }
   0x1   :  { %v209_v0 = vld [vmem:[%s284_s1 + $0x38] sm:$0xff]  ;;  %v208_v1 = vld [vmem:[%s284_s1 + $0x30] sm:$0xff]  ;;  %v207_v2 = vld [vmem:[%s284_s1 + $0x28] sm:$0xff] }
   0x2   :  { %106 = vmatpush.bf16.msra.mxu0 %v209_v0  ;;  %210 = vmatpush.bf16.msra.mxu1 %v209_v0  ;;  %v206_v3 = vld [vmem:[%s284_s1 + $0x20] sm:$0xff]  ;;  %v205_v4 = vld [vmem:[%s284_s1 + $0x18] sm:$0xff]  ;;  %v204_v5 = vld [vmem:[%s284_s1 + $0x10] sm:$0xff] }
   0x3   :  { %v203_v6 = vld [vmem:[%s284_s1 + $0x8] sm:$0xff]  ;;  %v202_v7 = vld [vmem:[%s284_s1] sm:$0xff] }
   0x4   :  { %v200_v8 = vld [vmem:[%s286_s0] sm:$0xff]  ;;  %v201_v9 = vld [vmem:[%s286_s0 + $0x8] sm:$0xff] }
   0x5   :  { %v218_v10 = vld [vmem:[%s285_s2] ss:$0 sm:$0xff] }
   0x6   :  { %107 = vmatpush.bf16.msra.mxu0 %v208_v1  ;;  %211 = vmatpush.bf16.msra.mxu1 %v208_v1 }
   0xa   :  { %108 = vmatpush.bf16.msra.mxu0 %v207_v2  ;;  %212 = vmatpush.bf16.msra.mxu1 %v207_v2 }
   0xe   :  { %109 = vmatpush.bf16.msra.mxu0 %v206_v3  ;;  %213 = vmatpush.bf16.msra.mxu1 %v206_v3 }
  0x12   :  { %110 = vmatpush.bf16.msra.mxu0 %v205_v4  ;;  %214 = vmatpush.bf16.msra.mxu1 %v205_v4 }
  0x16   :  { %111 = vmatpush.bf16.msra.mxu0 %v204_v5  ;;  %215 = vmatpush.bf16.msra.mxu1 %v204_v5 }
  0x1a   :  { %112 = vmatpush.bf16.msra.mxu0 %v203_v6  ;;  %216 = vmatpush.bf16.msra.mxu1 %v203_v6 }
  0x1e   :  { %113 = vmatpush.bf16.msra.mxu0 %v202_v7  ;;  %217 = vmatpush.bf16.msra.mxu1 %v202_v7 }
  0x21   :  { %114 = vmatmul.bf16.vlgmr.msra.gmra.mxu0 %v200_v8  ;;  %119 = vmatmul.bf16.vlgmr.msra.gmra.mxu1 %v201_v9 }
  0x9e   :  { %v115_v11 = vpop.f32.mrf.mxu0  ;;  %v120_v12 = vpop.f32.mrf.mxu1 }
  0x9f   :  { %v144_v13 = vadd.f32 %v218_v10, %v115_v11  ;;  %v146_v14 = vadd.f32 %v218_v10, %v120_v12 }
  0xa1   :  { %v148_v15 = vmax.f32 %v144_v13, 0.0  ;;  %v150_v16 = vmax.f32 %v146_v14, 0.0 }
  0xa3   :  { %152 = vst [vmem:[%s287_s3] sm:$0xff] %v148_v15 }
  0xa4   :  { %154 = vst [vmem:[%s287_s3 + $0x10] sm:$0xff] %v150_v16 }
  0xa6   :  { %v117_v17 = vpop.f32.mrf.mxu0  ;;  %v122_v18 = vpop.f32.mrf.mxu1 }
  0xa7   :  { %v145_v19 = vadd.f32 %v218_v10, %v117_v17  ;;  %v147_v20 = vadd.f32 %v218_v10, %v122_v18 }
  0xa9   :  { %v149_v21 = vmax.f32 %v145_v19, 0.0  ;;  %v151_v22 = vmax.f32 %v147_v20, 0.0 }
  0xab   :  { %153 = vst [vmem:[%s287_s3 + $0x8] sm:$0xff] %v149_v21 }
  0xac   :  { %155 = vst [vmem:[%s287_s3 + $0x18] sm:$0xff] %v151_v22 }

// kernel: aspp_forward.11
= control target key start
LH: loop header
LB: loop body
LE: loop exit
PB: predicated region body
PF: predicated region fallthrough
CT: control target
= control target key end

     0   :  { %s2942_s24 = smov 0   ;;  %s2944_s25 = smov 0   ;;  %s3378_s0 = inlined_call_operand.vmem [shape: bf16[512,128], index: 0, kind: input, shape index: {}]   ;;  %s3379_s1 = inlined_call_operand.vmem [shape: bf16[512,128], index: 1, kind: input, shape index: {}]   ;;  %s3380_s2 = inlined_call_operand.vmem [shape: bf16[512,128], index: 2, kind: input, shape index: {}]   ;;  %s3381_s3 = inlined_call_operand.vmem [shape: bf16[512,128], index: 3, kind: input, shape index: {}]   ;;  %s3382_s4 = inlined_call_operand.vmem [shape: bf16[512,128], index: 4, kind: input, shape index: {}]   ;;  %s3383_s5 = inlined_call_operand.vmem [shape: bf16[5,128,128], index: 5, kind: input, shape index: {}]   ;;  %s3384_s6 = inlined_call_operand.vmem [shape: f32[1,128], index: 6, kind: input, shape index: {}]   ;;  %s3385_s7 = inlined_call_operand.vmem [shape: f32[512,128], index: 7, kind: output, shape index: {}]  }
   0x1   :  { %s2946_s26 = smov 0  }
   0x2 LB: > { %s29_s27 = sadd.s32 1, %s2896_s25  ;;  %p2150_p0 = scmp.ge.s32.totalorder %s2900_s26, 1  ;;  %s2900_s26 = sphi %s2946_s26, %s17_s26   ;;  %s2896_s25 = sphi %s2944_s25, %s3387_s25   ;;  %s2892_s24 = sphi %s2942_s24, %s3386_s24  }
   0x3   : > { %p31_p1 = scmp.ge.s32.totalorder %s29_s27, 2  ;;  %p313_p2 = scmp.lt.s32.totalorder %s2900_s26, 3 }
   0x5   : > { %s3389_s27 = smov (%p31_p1, %s29_s27), 0  ;;  %p314_p3 = pnand %p2150_p0, %p313_p2 }
   0x6   : > { %s2151_s13 = sshll.u32 (!%p314_p3), %s2892_s24, 5 }
   0x7   : > { %317 = sbr.rel (%p314_p3) target bundleno = 497 (0x1f1), region = 48  ;;  %p376_p4 = scmp.lt.s32.totalorder (!%p314_p3), %s2151_s13, 63 }
   0xc   : > { %v2756_v0 = vld [vmem:[%s3383_s5 + $0x78] sm:$0xff]  ;;  %v2755_v1 = vld [vmem:[%s3383_s5 + $0x70] sm:$0xff]  ;;  %v2754_v2 = vld [vmem:[%s3383_s5 + $0x68] sm:$0xff]  ;;  %s3391_s13 = smov (!%p376_p4, %s2151_s13), 63 }
   0xd   : > { %2829 = vmatpush.bf16.msra.mxu1 %v2756_v0  ;;  %2830 = vmatpush.bf16.msra.mxu2 %v2756_v0  ;;  %v2753_v3 = vld [vmem:[%s3383_s5 + $0x60] sm:$0xff]  ;;  %v2752_v4 = vld [vmem:[%s3383_s5 + $0x58] sm:$0xff]  ;;  %v2751_v5 = vld [vmem:[%s3383_s5 + $0x50] sm:$0xff]  ;;  %s2987_s20 = sshll.u32 %s3391_s13, 2 }
   0xe   : > { %2831 = vmatpush.bf16.msra.mxu3 %v2756_v0  ;;  %662 = vmatpush.bf16.msra.mxu0 %v2756_v0  ;;  %v2750_v6 = vld [vmem:[%s3383_s5 + $0x48] sm:$0xff]  ;;  %v2749_v7 = vld [vmem:[%s3383_s5 + $0x40] sm:$0xff]  ;;  %s2996_s28 = scalar_lea.vmem %s3379_s1, %s2987_s20  ;;  %v2780_v8 = vld [vmem:[%s3383_s5 + $0xb8] sm:$0xff]  ;;  %s3114_s23 = scalar_lea.vmem %s3378_s0, %s2987_s20 }
   0xf   : > { %v2804_v9 = vld [vmem:[%s3383_s5 + $0xf8] sm:$0xff]  ;;  %v2737_v10 = vld [vmem:[%s2996_s28 + $0x20] sm:$0xff]  ;;  %v2779_v16 = vld [vmem:[%s3383_s5 + $0xb0] sm:$0xff]  ;;  %s3120_s30 = scalar_lea.vmem %s3380_s2, %s2987_s20  ;;  %s3132_s12 = scalar_lea.vmem %s3382_s4, %s2987_s20 }
  0x10   : > { %v2741_v11 = vld [vmem:[%s2996_s28 + $0x40] sm:$0xff]  ;;  %v2732_v14 = vld [vmem:[%s3383_s5 + $0x38] sm:$0xff]  ;;  %v2803_v17 = vld [vmem:[%s3383_s5 + $0xf0] sm:$0xff] }
  0x11   : > { %2832 = vmatpush.bf16.msra.mxu1 %v2755_v1  ;;  %2833 = vmatpush.bf16.msra.mxu2 %v2755_v1  ;;  %v2745_v12 = vld [vmem:[%s2996_s28 + $0x60] sm:$0xff]  ;;  %v2828_v15 = vld [vmem:[%s3383_s5 + $0x138] sm:$0xff]  ;;  %v2731_v18 = vld [vmem:[%s3383_s5 + $0x30] sm:$0xff] }
  0x12   : > { %2834 = vmatpush.bf16.msra.mxu3 %v2755_v1  ;;  %663 = vmatpush.bf16.msra.mxu0 %v2755_v1  ;;  %v2733_v13 = vld [vmem:[%s2996_s28] sm:$0xff]  ;;  %v2827_v19 = vld [vmem:[%s3383_s5 + $0x130] sm:$0xff]  ;;  %v2778_v20 = vld [vmem:[%s3383_s5 + $0xa8] sm:$0xff] }
  0x13   : > { %v2802_v21 = vld [vmem:[%s3383_s5 + $0xe8] sm:$0xff]  ;;  %v2777_v24 = vld [vmem:[%s3383_s5 + $0xa0] sm:$0xff]  ;;  %v2776_v28 = vld [vmem:[%s3383_s5 + $0x98] sm:$0xff] }
  0x14   : > { %v2730_v22 = vld [vmem:[%s3383_s5 + $0x28] sm:$0xff]  ;;  %v2801_v25 = vld [vmem:[%s3383_s5 + $0xe0] sm:$0xff]  ;;  %v2800_v29 = vld [vmem:[%s3383_s5 + $0xd8] sm:$0xff] }
  0x15   : > { %2835 = vmatpush.bf16.msra.mxu1 %v2754_v2  ;;  %2836 = vmatpush.bf16.msra.mxu2 %v2754_v2  ;;  %v2826_v23 = vld [vmem:[%s3383_s5 + $0x128] sm:$0xff]  ;;  %v2729_v26 = vld [vmem:[%s3383_s5 + $0x20] sm:$0xff]  ;;  %v2728_v34 = vld [vmem:[%s3383_s5 + $0x18] sm:$0xff] }
  0x16   : > { %2837 = vmatpush.bf16.msra.mxu3 %v2754_v2  ;;  %664 = vmatpush.bf16.msra.mxu0 %v2754_v2  ;;  %v2825_v27 = vld [vmem:[%s3383_s5 + $0x120] sm:$0xff]  ;;  %v2738_v30 = vld [vmem:[%s2996_s28 + $0x28] sm:$0xff]  ;;  %v2824_v35 = vld [vmem:[%s3383_s5 + $0x118] sm:$0xff] }
  0x17   : > { %v2742_v31 = vld [vmem:[%s2996_s28 + $0x48] sm:$0xff]  ;;  %v2775_v36 = vld [vmem:[%s3383_s5 + $0x90] sm:$0xff]  ;;  %v2773_v44 = vld [vmem:[%s3383_s5 + $0x80] sm:$0xff] }
  0x18   : > { %v2746_v32 = vld [vmem:[%s2996_s28 + $0x68] sm:$0xff]  ;;  %v2799_v37 = vld [vmem:[%s3383_s5 + $0xd0] sm:$0xff]  ;;  %v2797_v45 = vld [vmem:[%s3383_s5 + $0xc0] sm:$0xff] }
  0x19   : > { %2838 = vmatpush.bf16.msra.mxu1 %v2753_v3  ;;  %2839 = vmatpush.bf16.msra.mxu2 %v2753_v3  ;;  %v2734_v33 = vld [vmem:[%s2996_s28 + $0x8] sm:$0xff]  ;;  %v2727_v38 = vld [vmem:[%s3383_s5 + $0x10] sm:$0xff]  ;;  %v2725_v46 = vld [vmem:[%s3383_s5] sm:$0xff] }
  0x1a   : > { %2840 = vmatpush.bf16.msra.mxu3 %v2753_v3  ;;  %665 = vmatpush.bf16.msra.mxu0 %v2753_v3  ;;  %v2823_v39 = vld [vmem:[%s3383_s5 + $0x110] sm:$0xff]  ;;  %v2774_v40 = vld [vmem:[%s3383_s5 + $0x88] sm:$0xff]  ;;  %v2821_v47 = vld [vmem:[%s3383_s5 + $0x100] sm:$0xff] }
  0x1b   : > { %v2798_v41 = vld [vmem:[%s3383_s5 + $0xc8] sm:$0xff]  ;;  %v2739_v48 = vld [vmem:[%s2996_s28 + $0x30] sm:$0xff]  ;;  %v2740_v52 = vld [vmem:[%s2996_s28 + $0x38] sm:$0xff] }
  0x1c   : > { %v2726_v42 = vld [vmem:[%s3383_s5 + $0x8] sm:$0xff]  ;;  %v2743_v49 = vld [vmem:[%s2996_s28 + $0x50] sm:$0xff]  ;;  %v2744_v53 = vld [vmem:[%s2996_s28 + $0x58] sm:$0xff] }
  0x1d   : > { %2841 = vmatpush.bf16.msra.mxu1 %v2752_v4  ;;  %2842 = vmatpush.bf16.msra.mxu2 %v2752_v4  ;;  %v2822_v43 = vld [vmem:[%s3383_s5 + $0x108] sm:$0xff]  ;;  %v2747_v50 = vld [vmem:[%s2996_s28 + $0x70] sm:$0xff]  ;;  %v2748_v54 = vld [vmem:[%s2996_s28 + $0x78] sm:$0xff] }
  0x1e   : > { %2843 = vmatpush.bf16.msra.mxu3 %v2752_v4  ;;  %666 = vmatpush.bf16.msra.mxu0 %v2752_v4  ;;  %v2735_v51 = vld [vmem:[%s2996_s28 + $0x10] sm:$0xff]  ;;  %v2736_v55 = vld [vmem:[%s2996_s28 + $0x18] sm:$0xff]  ;;  %s3126_s28 = scalar_lea.vmem %s3381_s3, %s2987_s20  ;;  %v2709_v56 = vld [vmem:[%s3114_s23] sm:$0xff]  ;;  %s2162_s20 = sshll.u32 %s3391_s13, 3 }
  0x1f   : > { %v2757_v57 = vld [vmem:[%s3120_s30] sm:$0xff]  ;;  %v2710_v60 = vld [vmem:[%s3114_s23 + $0x8] sm:$0xff]  ;;  %v2711_v0 = vld [vmem:[%s3114_s23 + $0x10] sm:$0xff]  ;;  %s3244_s18 = scalar_lea.vmem %s3385_s7, %s2162_s20 }
  0x20   : > { %v2781_v58 = vld [vmem:[%s3126_s28] sm:$0xff]  ;;  %v2758_v61 = vld [vmem:[%s3120_s30 + $0x8] sm:$0xff]  ;;  %v2759_v1 = vld [vmem:[%s3120_s30 + $0x10] sm:$0xff] }
  0x21   : > { %2844 = vmatpush.bf16.msra.mxu1 %v2751_v5  ;;  %2845 = vmatpush.bf16.msra.mxu2 %v2751_v5  ;;  %v2805_v59 = vld [vmem:[%s3132_s12] sm:$0xff]  ;;  %v2782_v62 = vld [vmem:[%s3126_s28 + $0x8] sm:$0xff]  ;;  %v2783_v2 = vld [vmem:[%s3126_s28 + $0x10] sm:$0xff] }
  0x22   : > { %2846 = vmatpush.bf16.msra.mxu3 %v2751_v5  ;;  %667 = vmatpush.bf16.msra.mxu0 %v2751_v5  ;;  %v2806_v63 = vld [vmem:[%s3132_s12 + $0x8] sm:$0xff]  ;;  %v2807_v3 = vld [vmem:[%s3132_s12 + $0x10] sm:$0xff]  ;;  %v2712_v4 = vld [vmem:[%s3114_s23 + $0x18] sm:$0xff] }
  0x23   : > { %v2760_v5 = vld [vmem:[%s3120_s30 + $0x18] sm:$0xff] }
  0x25   : > { %2847 = vmatpush.bf16.msra.mxu1 %v2750_v6  ;;  %2848 = vmatpush.bf16.msra.mxu2 %v2750_v6 }
  0x26   : > { %2849 = vmatpush.bf16.msra.mxu3 %v2750_v6  ;;  %668 = vmatpush.bf16.msra.mxu0 %v2750_v6  ;;  %v2784_v6 = vld [vmem:[%s3126_s28 + $0x18] sm:$0xff] }
  0x29   : > { %2850 = vmatpush.bf16.msra.mxu1 %v2749_v7  ;;  %2851 = vmatpush.bf16.msra.mxu2 %v2749_v7 }
  0x2a   : > { %2852 = vmatpush.bf16.msra.mxu3 %v2749_v7  ;;  %669 = vmatpush.bf16.msra.mxu0 %v2749_v7  ;;  %v2808_v7 = vld [vmem:[%s3132_s12 + $0x18] sm:$0xff] }
  0x2c   : > { %690 = vmatmul.bf16.vlgmr.msra.gmra.mxu1 %v2737_v10  ;;  %710 = vmatmul.bf16.vlgmr.msra.gmra.mxu2 %v2741_v11  ;;  %v2785_v11 = vld [vmem:[%s3126_s28 + $0x20] sm:$0xff] }
  0x2d   : > { %1177 = vmatpush.bf16.msrb.mxu2 %v2780_v8  ;;  %730 = vmatmul.bf16.vlgmr.msra.gmra.mxu3 %v2745_v12  ;;  %v2713_v8 = vld [vmem:[%s3114_s23 + $0x20] sm:$0xff] }
  0x2e   : > { %1491 = vmatpush.bf16.msrb.mxu3 %v2804_v9  ;;  %670 = vmatmul.bf16.vlgmr.msra.gmra.mxu0 %v2733_v13  ;;  %v2761_v9 = vld [vmem:[%s3120_s30 + $0x20] sm:$0xff] }
  0x2f   : > { %895 = vmatpush.bf16.msrb.mxu1 %v2732_v14  ;;  %1805 = vmatpush.bf16.msrb.mxu0 %v2828_v15  ;;  %v2809_v12 = vld [vmem:[%s3132_s12 + $0x20] sm:$0xff] }
  0x31   : > { %1178 = vmatpush.bf16.msrb.mxu2 %v2779_v16 }
  0x32   : > { %1492 = vmatpush.bf16.msrb.mxu3 %v2803_v17 }
  0x33   : > { %896 = vmatpush.bf16.msrb.mxu1 %v2731_v18  ;;  %1806 = vmatpush.bf16.msrb.mxu0 %v2827_v19 }
  0x35   : > { %1179 = vmatpush.bf16.msrb.mxu2 %v2778_v20  ;;  %v2714_v20 = vld [vmem:[%s3114_s23 + $0x28] sm:$0xff] }
  0x36   : > { %1493 = vmatpush.bf16.msrb.mxu3 %v2802_v21  ;;  %v2762_v21 = vld [vmem:[%s3120_s30 + $0x28] sm:$0xff] }
  0x37   : > { %897 = vmatpush.bf16.msrb.mxu1 %v2730_v22  ;;  %1807 = vmatpush.bf16.msrb.mxu0 %v2826_v23  ;;  %v2786_v23 = vld [vmem:[%s3126_s28 + $0x28] sm:$0xff] }
  0x39   : > { %1180 = vmatpush.bf16.msrb.mxu2 %v2777_v24  ;;  %v2810_v24 = vld [vmem:[%s3132_s12 + $0x28] sm:$0xff] }
  0x3a   : > { %1494 = vmatpush.bf16.msrb.mxu3 %v2801_v25 }
  0x3b   : > { %898 = vmatpush.bf16.msrb.mxu1 %v2729_v26  ;;  %1808 = vmatpush.bf16.msrb.mxu0 %v2825_v27 }
  0x3c   : > { %695 = vmatmul.bf16.gmra.mxu1 %v2738_v30  ;;  %715 = vmatmul.bf16.gmra.mxu2 %v2742_v31 }
  0x3d   : > { %1181 = vmatpush.bf16.msrb.mxu2 %v2776_v28  ;;  %735 = vmatmul.bf16.gmra.mxu3 %v2746_v32  ;;  %v2715_v32 = vld [vmem:[%s3114_s23 + $0x30] sm:$0xff] }
  0x3e   : > { %1495 = vmatpush.bf16.msrb.mxu3 %v2800_v29  ;;  %675 = vmatmul.bf16.gmra.mxu0 %v2734_v33  ;;  %v2763_v33 = vld [vmem:[%s3120_s30 + $0x30] sm:$0xff] }
  0x3f   : > { %899 = vmatpush.bf16.msrb.mxu1 %v2728_v34  ;;  %1809 = vmatpush.bf16.msrb.mxu0 %v2824_v35  ;;  %v2787_v35 = vld [vmem:[%s3126_s28 + $0x30] sm:$0xff] }
  0x41   : > { %1182 = vmatpush.bf16.msrb.mxu2 %v2775_v36  ;;  %v2811_v36 = vld [vmem:[%s3132_s12 + $0x30] sm:$0xff] }
  0x42   : > { %1496 = vmatpush.bf16.msrb.mxu3 %v2799_v37 }
  0x43   : > { %900 = vmatpush.bf16.msrb.mxu1 %v2727_v38  ;;  %1810 = vmatpush.bf16.msrb.mxu0 %v2823_v39 }
  0x45   : > { %1183 = vmatpush.bf16.msrb.mxu2 %v2774_v40 }
  0x46   : > { %1497 = vmatpush.bf16.msrb.mxu3 %v2798_v41 }
  0x47   : > { %901 = vmatpush.bf16.msrb.mxu1 %v2726_v42  ;;  %1811 = vmatpush.bf16.msrb.mxu0 %v2822_v43 }
  0x49   : > { %1184 = vmatpush.bf16.msrb.mxu2 %v2773_v44  ;;  %v2716_v44 = vld [vmem:[%s3114_s23 + $0x38] sm:$0xff] }
  0x4a   : > { %1498 = vmatpush.bf16.msrb.mxu3 %v2797_v45  ;;  %v2764_v45 = vld [vmem:[%s3120_s30 + $0x38] sm:$0xff] }
  0x4b   : > { %902 = vmatpush.bf16.msrb.mxu1 %v2725_v46  ;;  %1812 = vmatpush.bf16.msrb.mxu0 %v2821_v47  ;;  %v2788_v47 = vld [vmem:[%s3126_s28 + $0x38] sm:$0xff] }
  0x4c   : > { %700 = vmatmul.bf16.gmra.mxu1 %v2739_v48  ;;  %720 = vmatmul.bf16.gmra.mxu2 %v2743_v49  ;;  %v2812_v48 = vld [vmem:[%s3132_s12 + $0x38] sm:$0xff] }
  0x4d   : > { %740 = vmatmul.bf16.gmra.mxu3 %v2747_v50 }
  0x4e   : > { %680 = vmatmul.bf16.gmra.mxu0 %v2735_v51 }
  0x5c   : > { %705 = vmatmul.bf16.gmra.mxu1 %v2740_v52  ;;  %725 = vmatmul.bf16.gmra.mxu2 %v2744_v53 }
  0x5d   : > { %745 = vmatmul.bf16.gmra.mxu3 %v2748_v54 }
  0x5e   : > { %685 = vmatmul.bf16.gmra.mxu0 %v2736_v55 }
  0x6c   : > { %903 = vmatmul.bf16.vlgmr.msrb.gmra.mxu1 %v2709_v56  ;;  %1185 = vmatmul.bf16.vlgmr.msrb.gmra.mxu2 %v2757_v57  ;;  %v2717_v56 = vld [vmem:[%s3114_s23 + $0x40] sm:$0xff] }
  0x6d   : > { %1499 = vmatmul.bf16.vlgmr.msrb.gmra.mxu3 %v2781_v58  ;;  %v2765_v57 = vld [vmem:[%s3120_s30 + $0x40] sm:$0xff] }
  0x6e   : > { %1813 = vmatmul.bf16.vlgmr.msrb.gmra.mxu0 %v2805_v59  ;;  %v2789_v59 = vld [vmem:[%s3126_s28 + $0x40] sm:$0xff] }
  0x7c   : > { %908 = vmatmul.bf16.gmra.mxu1 %v2710_v60  ;;  %1190 = vmatmul.bf16.gmra.mxu2 %v2758_v61  ;;  %v2813_v60 = vld [vmem:[%s3132_s12 + $0x40] sm:$0xff] }
  0x7d   : > { %1504 = vmatmul.bf16.gmra.mxu3 %v2782_v62 }
  0x7e   : > { %1818 = vmatmul.bf16.gmra.mxu0 %v2806_v63 }
  0x8c   : > { %913 = vmatmul.bf16.gmra.mxu1 %v2711_v0  ;;  %1195 = vmatmul.bf16.gmra.mxu2 %v2759_v1 }
  0x8d   : > { %1509 = vmatmul.bf16.gmra.mxu3 %v2783_v2 }
  0x8e   : > { %1823 = vmatmul.bf16.gmra.mxu0 %v2807_v3 }
  0x9c   : > { %918 = vmatmul.bf16.gmra.mxu1 %v2712_v4  ;;  %1200 = vmatmul.bf16.gmra.mxu2 %v2760_v5  ;;  %v3239_v4 = vld [vmem:[%s3384_s6] ss:$0 sm:$0xff] }
  0x9d   : > { %1514 = vmatmul.bf16.gmra.mxu3 %v2784_v6 }
  0x9e   : > { %1828 = vmatmul.bf16.gmra.mxu0 %v2808_v7 }
  0xa9   : > { %v3152_v10 = vpop.f32.mrf.mxu1 }
  0xab   : > { %v3156_v13 = vpop.f32.mrf.mxu0 }
  0xac   : > { %923 = vmatmul.bf16.gmra.mxu1 %v2713_v8  ;;  %1205 = vmatmul.bf16.gmra.mxu2 %v2761_v9 }
  0xad   : > { %1519 = vmatmul.bf16.gmra.mxu3 %v2785_v11 }
  0xae   : > { %1833 = vmatmul.bf16.gmra.mxu0 %v2809_v12 }
  0xaf   : > { %v3158_v14 = vpop.f32.mrf.mxu2 }
  0xb0   : > { %v3160_v15 = vpop.f32.mrf.mxu3 }
  0xb1   : > { %v3162_v16 = vpop.f32.mrf.mxu1 }
  0xb3   : > { %v3164_v17 = vpop.f32.mrf.mxu0 }
  0xb7   : > { %v3166_v18 = vpop.f32.mrf.mxu2 }
  0xb8   : > { %v3168_v19 = vpop.f32.mrf.mxu3 }
  0xb9   : > { %v3172_v22 = vpop.f32.mrf.mxu1 }
  0xbb   : > { %v3176_v25 = vpop.f32.mrf.mxu0 }
  0xbc   : > { %928 = vmatmul.bf16.gmra.mxu1 %v2714_v20  ;;  %1210 = vmatmul.bf16.gmra.mxu2 %v2762_v21  ;;  %v2766_v20 = vld [vmem:[%s3120_s30 + $0x48] sm:$0xff] }
  0xbd   : > { %1524 = vmatmul.bf16.gmra.mxu3 %v2786_v23  ;;  %v2790_v23 = vld [vmem:[%s3126_s28 + $0x48] sm:$0xff] }
  0xbe   : > { %1838 = vmatmul.bf16.gmra.mxu0 %v2810_v24  ;;  %v2814_v24 = vld [vmem:[%s3132_s12 + $0x48] sm:$0xff] }
  0xbf   : > { %v3178_v26 = vpop.f32.mrf.mxu2 }
  0xc0   : > { %v3180_v27 = vpop.f32.mrf.mxu3 }
  0xc1   : > { %v3182_v28 = vpop.f32.mrf.mxu1 }
  0xc3   : > { %v3184_v29 = vpop.f32.mrf.mxu0 }
  0xc7   : > { %v3186_v30 = vpop.f32.mrf.mxu2 }
  0xc8   : > { %v3188_v31 = vpop.f32.mrf.mxu3 }
  0xc9   : > { %v3192_v34 = vpop.f32.mrf.mxu1 }
  0xcb   : > { %v3196_v37 = vpop.f32.mrf.mxu0 }
  0xcc   : > { %933 = vmatmul.bf16.gmra.mxu1 %v2715_v32  ;;  %1215 = vmatmul.bf16.gmra.mxu2 %v2763_v33 }
  0xcd   : > { %1529 = vmatmul.bf16.gmra.mxu3 %v2787_v35 }
  0xce   : > { %1843 = vmatmul.bf16.gmra.mxu0 %v2811_v36 }
  0xcf   : > { %v3198_v38 = vpop.f32.mrf.mxu2 }
  0xd0   : > { %v3200_v39 = vpop.f32.mrf.mxu3 }
  0xd1   : > { %v3202_v40 = vpop.f32.mrf.mxu1 }
  0xd3   : > { %v3204_v41 = vpop.f32.mrf.mxu0 }
  0xd7   : > { %v3206_v42 = vpop.f32.mrf.mxu2 }
  0xd8   : > { %v3208_v43 = vpop.f32.mrf.mxu3 }
  0xd9   : > { %v3212_v46 = vpop.f32.mrf.mxu1 }
  0xdb   : > { %v3216_v49 = vpop.f32.mrf.mxu0 }
  0xdc   : > { %938 = vmatmul.bf16.gmra.mxu1 %v2716_v44  ;;  %1220 = vmatmul.bf16.gmra.mxu2 %v2764_v45 }
  0xdd   : > { %1534 = vmatmul.bf16.gmra.mxu3 %v2788_v47 }
  0xde   : > { %1848 = vmatmul.bf16.gmra.mxu0 %v2812_v48 }
  0xdf   : > { %v3218_v50 = vpop.f32.mrf.mxu2 }
  0xe0   : > { %v3220_v51 = vpop.f32.mrf.mxu3 }
  0xe1   : > { %v3222_v52 = vpop.f32.mrf.mxu1 }
  0xe3   : > { %v3224_v53 = vpop.f32.mrf.mxu0 }
  0xe7   : > { %v3226_v54 = vpop.f32.mrf.mxu2 }
  0xe8   : > { %v3228_v55 = vpop.f32.mrf.mxu3 }
  0xe9   : > { %v904_v58 = vpop.f32.mrf.mxu1 }
  0xea   : > { %v905_v62 = vadd.f32 %v904_v58, %v3156_v13  ;;  %v2718_v13 = vld [vmem:[%s3114_s23 + $0x48] sm:$0xff] }
  0xeb   : > { %v1814_v61 = vpop.f32.mrf.mxu0 }
  0xec   : > { %943 = vmatmul.bf16.gmra.mxu1 %v2717_v56  ;;  %1225 = vmatmul.bf16.gmra.mxu2 %v2765_v57 }
  0xed   : > { %1539 = vmatmul.bf16.gmra.mxu3 %v2789_v59 }
  0xee   : > { %1853 = vmatmul.bf16.gmra.mxu0 %v2813_v60 }
  0xef   : > { %v1186_v63 = vpop.f32.mrf.mxu2 }
  0xf0   : > { %v1266_v0 = vadd.f32 %v1186_v63, %v905_v62  ;;  %v1500_v1 = vpop.f32.mrf.mxu3 }
  0xf1   : > { %v906_v2 = vpop.f32.mrf.mxu1 }
  0xf2   : > { %v1580_v3 = vadd.f32 %v1500_v1, %v1266_v0  ;;  %v907_v8 = vadd.f32 %v906_v2, %v3164_v17  ;;  %v2767_v0 = vld [vmem:[%s3120_s30 + $0x50] sm:$0xff] }
  0xf3   : > { %v1816_v5 = vpop.f32.mrf.mxu0  ;;  %v2791_v2 = vld [vmem:[%s3126_s28 + $0x50] sm:$0xff] }
  0xf4   : > { %v1894_v6 = vadd.f32 %v1814_v61, %v1580_v3  ;;  %v2815_v3 = vld [vmem:[%s3132_s12 + $0x50] sm:$0xff] }
  0xf6   : > { %v1930_v7 = vadd.f32 %v3239_v4, %v1894_v6 }
  0xf7   : > { %v1188_v9 = vpop.f32.mrf.mxu2 }
  0xf8   : > { %1962 = vst [vmem:[%s3244_s18] sm:$0xff] %v1930_v7  ;;  %v1267_v11 = vadd.f32 %v1188_v9, %v907_v8  ;;  %v1502_v12 = vpop.f32.mrf.mxu3 }
  0xf9   : > { %v909_v21 = vpop.f32.mrf.mxu1 }
  0xfa   : > { %v1581_v32 = vadd.f32 %v1502_v12, %v1267_v11  ;;  %v910_v36 = vadd.f32 %v909_v21, %v3176_v25  ;;  %v2719_v25 = vld [vmem:[%s3114_s23 + $0x50] sm:$0xff] }
  0xfb   : > { %v1819_v33 = vpop.f32.mrf.mxu0 }
  0xfc   : > { %v1895_v35 = vadd.f32 %v1816_v5, %v1581_v32  ;;  %948 = vmatmul.bf16.gmra.mxu1 %v2718_v13  ;;  %1230 = vmatmul.bf16.gmra.mxu2 %v2766_v20 }
  0xfd   : > { %1544 = vmatmul.bf16.gmra.mxu3 %v2790_v23 }
  0xfe   : > { %1858 = vmatmul.bf16.gmra.mxu0 %v2814_v24  ;;  %v1931_v17 = vadd.f32 %v3239_v4, %v1895_v35 }
  0xff   : > { %v1191_v44 = vpop.f32.mrf.mxu2 }
 0x100   : > { %1963 = vst [vmem:[%s3244_s18 + $0x8] sm:$0xff] %v1931_v17  ;;  %v1268_v45 = vadd.f32 %v1191_v44, %v910_v36  ;;  %v1505_v47 = vpop.f32.mrf.mxu3  ;;  %v2768_v36 = vld [vmem:[%s3120_s30 + $0x58] sm:$0xff] }
 0x101   : > { %v911_v48 = vpop.f32.mrf.mxu1 }
 0x102   : > { %v1582_v56 = vadd.f32 %v1505_v47, %v1268_v45  ;;  %v912_v60 = vadd.f32 %v911_v48, %v3184_v29  ;;  %v2792_v45 = vld [vmem:[%s3126_s28 + $0x58] sm:$0xff] }
 0x103   : > { %v1821_v57 = vpop.f32.mrf.mxu0  ;;  %v2816_v47 = vld [vmem:[%s3132_s12 + $0x58] sm:$0xff] }
 0x104   : > { %v1896_v58 = vadd.f32 %v1819_v33, %v1582_v56 }
 0x106   : > { %v1932_v59 = vadd.f32 %v3239_v4, %v1896_v58 }
 0x107   : > { %v1193_v61 = vpop.f32.mrf.mxu2 }
 0x108   : > { %1964 = vst [vmem:[%s3244_s18 + $0x10] sm:$0xff] %v1932_v59  ;;  %v1269_v62 = vadd.f32 %v1193_v61, %v912_v60  ;;  %v1507_v63 = vpop.f32.mrf.mxu3 }
 0x109   : > { %v914_v1 = vpop.f32.mrf.mxu1 }
 0x10a   : > { %v1583_v5 = vadd.f32 %v1507_v63, %v1269_v62  ;;  %v915_v8 = vadd.f32 %v914_v1, %v3196_v37  ;;  %v2720_v37 = vld [vmem:[%s3114_s23 + $0x58] sm:$0xff] }
 0x10b   : > { %v1824_v6 = vpop.f32.mrf.mxu0 }
 0x10c   : > { %v1897_v7 = vadd.f32 %v1821_v57, %v1583_v5  ;;  %953 = vmatmul.bf16.gmra.mxu1 %v2719_v25  ;;  %1235 = vmatmul.bf16.gmra.mxu2 %v2767_v0 }
 0x10d   : > { %1549 = vmatmul.bf16.gmra.mxu3 %v2791_v2 }
 0x10e   : > { %1863 = vmatmul.bf16.gmra.mxu0 %v2815_v3  ;;  %v1933_v29 = vadd.f32 %v3239_v4, %v1897_v7  ;;  %v2769_v7 = vld [vmem:[%s3120_s30 + $0x60] sm:$0xff] }
 0x10f   : > { %v1196_v9 = vpop.f32.mrf.mxu2 }
 0x110   : > { %1965 = vst [vmem:[%s3244_s18 + $0x18] sm:$0xff] %v1933_v29  ;;  %v1270_v11 = vadd.f32 %v1196_v9, %v915_v8  ;;  %v1510_v12 = vpop.f32.mrf.mxu3  ;;  %v2793_v8 = vld [vmem:[%s3126_s28 + $0x60] sm:$0xff] }
 0x111   : > { %v916_v13 = vpop.f32.mrf.mxu1  ;;  %v2817_v9 = vld [vmem:[%s3132_s12 + $0x60] sm:$0xff] }
 0x112   : > { %v1584_v20 = vadd.f32 %v1510_v12, %v1270_v11  ;;  %v917_v32 = vadd.f32 %v916_v13, %v3204_v41 }
 0x113   : > { %v1826_v21 = vpop.f32.mrf.mxu0 }
 0x114   : > { %v1898_v23 = vadd.f32 %v1824_v6, %v1584_v20 }
 0x116   : > { %v1934_v24 = vadd.f32 %v3239_v4, %v1898_v23 }
 0x117   : > { %v1198_v33 = vpop.f32.mrf.mxu2 }
 0x118   : > { %1966 = vst [vmem:[%s3244_s18 + $0x20] sm:$0xff] %v1934_v24  ;;  %v1271_v35 = vadd.f32 %v1198_v33, %v917_v32  ;;  %v1512_v17 = vpop.f32.mrf.mxu3 }
 0x119   : > { %v919_v44 = vpop.f32.mrf.mxu1 }
 0x11a   : > { %v1585_v48 = vadd.f32 %v1512_v17, %v1271_v35  ;;  %v920_v58 = vadd.f32 %v919_v44, %v3216_v49  ;;  %v2721_v49 = vld [vmem:[%s3114_s23 + $0x60] sm:$0xff] }
 0x11b   : > { %v1829_v56 = vpop.f32.mrf.mxu0 }
 0x11c   : > { %v1899_v57 = vadd.f32 %v1826_v21, %v1585_v48  ;;  %958 = vmatmul.bf16.gmra.mxu1 %v2720_v37  ;;  %1240 = vmatmul.bf16.gmra.mxu2 %v2768_v36  ;;  %v2770_v48 = vld [vmem:[%s3120_s30 + $0x68] sm:$0xff] }
 0x11d   : > { %1554 = vmatmul.bf16.gmra.mxu3 %v2792_v45 }
 0x11e   : > { %1868 = vmatmul.bf16.gmra.mxu0 %v2816_v47  ;;  %v1935_v41 = vadd.f32 %v3239_v4, %v1899_v57  ;;  %v2794_v57 = vld [vmem:[%s3126_s28 + $0x68] sm:$0xff] }
 0x11f   : > { %v1201_v59 = vpop.f32.mrf.mxu2 }
 0x120   : > { %1967 = vst [vmem:[%s3244_s18 + $0x28] sm:$0xff] %v1935_v41  ;;  %v1272_v60 = vadd.f32 %v1201_v59, %v920_v58  ;;  %v1515_v61 = vpop.f32.mrf.mxu3  ;;  %v2818_v41 = vld [vmem:[%s3132_s12 + $0x68] sm:$0xff] }
 0x121   : > { %v921_v62 = vpop.f32.mrf.mxu1 }
 0x122   : > { %v1586_v63 = vadd.f32 %v1515_v61, %v1272_v60  ;;  %v922_v2 = vadd.f32 %v921_v62, %v3224_v53 }
 0x123   : > { %v1831_v25 = vpop.f32.mrf.mxu0 }
 0x124   : > { %v1900_v0 = vadd.f32 %v1829_v56, %v1586_v63 }
 0x126   : > { %v1936_v1 = vadd.f32 %v3239_v4, %v1900_v0 }
 0x127   : > { %v1203_v3 = vpop.f32.mrf.mxu2 }
 0x128   : > { %1968 = vst [vmem:[%s3244_s18 + $0x30] sm:$0xff] %v1936_v1  ;;  %v1273_v5 = vadd.f32 %v1203_v3, %v922_v2  ;;  %v1517_v6 = vpop.f32.mrf.mxu3 }
 0x129   : > { %v924_v29 = vpop.f32.mrf.mxu1 }
 0x12a   : > { %v1587_v11 = vadd.f32 %v1517_v6, %v1273_v5  ;;  %v925_v20 = vadd.f32 %v924_v29, %v3152_v10  ;;  %v2722_v10 = vld [vmem:[%s3114_s23 + $0x68] sm:$0xff] }
 0x12b   : > { %v1834_v12 = vpop.f32.mrf.mxu0 }
 0x12c   : > { %v1901_v13 = vadd.f32 %v1831_v25, %v1587_v11  ;;  %963 = vmatmul.bf16.gmra.mxu1 %v2721_v49  ;;  %1245 = vmatmul.bf16.gmra.mxu2 %v2769_v7  ;;  %v2795_v11 = vld [vmem:[%s3126_s28 + $0x70] sm:$0xff] }
 0x12d   : > { %1559 = vmatmul.bf16.gmra.mxu3 %v2793_v8  ;;  %v2771_v8 = vld [vmem:[%s3120_s30 + $0x70] sm:$0xff] }
 0x12e   : > { %1873 = vmatmul.bf16.gmra.mxu0 %v2817_v9  ;;  %v1937_v53 = vadd.f32 %v3239_v4, %v1901_v13 }
 0x12f   : > { %v1206_v21 = vpop.f32.mrf.mxu2 }
 0x130   : > { %1969 = vst [vmem:[%s3244_s18 + $0x38] sm:$0xff] %v1937_v53  ;;  %v1274_v23 = vadd.f32 %v1206_v21, %v925_v20  ;;  %v1520_v24 = vpop.f32.mrf.mxu3 }
 0x131   : > { %v926_v32 = vpop.f32.mrf.mxu1 }
 0x132   : > { %v1588_v33 = vadd.f32 %v1520_v24, %v1274_v23  ;;  %v927_v36 = vadd.f32 %v926_v32, %v3162_v16 }
 0x133   : > { %v1836_v35 = vpop.f32.mrf.mxu0 }
 0x134   : > { %v1902_v17 = vadd.f32 %v1834_v12, %v1588_v33  ;;  %v2819_v12 = vld [vmem:[%s3132_s12 + $0x70] sm:$0xff] }
 0x136   : > { %v1938_v37 = vadd.f32 %v3239_v4, %v1902_v17 }
 0x137   : > { %v1208_v44 = vpop.f32.mrf.mxu2 }
 0x138   : > { %1970 = vst [vmem:[%s3244_s18 + $0x40] sm:$0xff] %v1938_v37  ;;  %v1275_v45 = vadd.f32 %v1208_v44, %v927_v36  ;;  %v1522_v47 = vpop.f32.mrf.mxu3 }
 0x139   : > { %v929_v56 = vpop.f32.mrf.mxu1 }
 0x13a   : > { %v1589_v58 = vadd.f32 %v1522_v47, %v1275_v45  ;;  %v930_v61 = vadd.f32 %v929_v56, %v3172_v22  ;;  %v2723_v22 = vld [vmem:[%s3114_s23 + $0x70] sm:$0xff] }
 0x13b   : > { %v1839_v59 = vpop.f32.mrf.mxu0 }
 0x13c   : > { %v1903_v60 = vadd.f32 %v1836_v35, %v1589_v58  ;;  %968 = vmatmul.bf16.gmra.mxu1 %v2722_v10  ;;  %1250 = vmatmul.bf16.gmra.mxu2 %v2770_v48  ;;  %v2772_v48 = vld [vmem:[%s3120_s30 + $0x78] sm:$0xff] }
 0x13d   : > { %1564 = vmatmul.bf16.gmra.mxu3 %v2794_v57  ;;  %v2796_v57 = vld [vmem:[%s3126_s28 + $0x78] sm:$0xff] }
 0x13e   : > { %1878 = vmatmul.bf16.gmra.mxu0 %v2818_v41  ;;  %v1939_v16 = vadd.f32 %v3239_v4, %v1903_v60  ;;  %v2820_v41 = vld [vmem:[%s3132_s12 + $0x78] sm:$0xff] }
 0x13f   : > { %v1211_v62 = vpop.f32.mrf.mxu2 }
 0x140   : > { %1971 = vst [vmem:[%s3244_s18 + $0x48] sm:$0xff] %v1939_v16  ;;  %v1276_v63 = vadd.f32 %v1211_v62, %v930_v61  ;;  %v1525_v25 = vpop.f32.mrf.mxu3 }
 0x141   : > { %v931_v0 = vpop.f32.mrf.mxu1 }
 0x142   : > { %v1590_v1 = vadd.f32 %v1525_v25, %v1276_v63  ;;  %v932_v6 = vadd.f32 %v931_v0, %v3182_v28 }
 0x143   : > { %v1841_v2 = vpop.f32.mrf.mxu0 }
 0x144   : > { %v1904_v3 = vadd.f32 %v1839_v59, %v1590_v1 }
 0x146   : > { %v1940_v5 = vadd.f32 %v3239_v4, %v1904_v3 }
 0x147   : > { %v1213_v49 = vpop.f32.mrf.mxu2 }
 0x148   : > { %1972 = vst [vmem:[%s3244_s18 + $0x50] sm:$0xff] %v1940_v5  ;;  %v1277_v7 = vadd.f32 %v1213_v49, %v932_v6  ;;  %v1527_v29 = vpop.f32.mrf.mxu3 }
 0x149   : > { %v934_v9 = vpop.f32.mrf.mxu1 }
 0x14a   : > { %v1591_v13 = vadd.f32 %v1527_v29, %v1277_v7  ;;  %v935_v21 = vadd.f32 %v934_v9, %v3192_v34  ;;  %v2724_v34 = vld [vmem:[%s3114_s23 + $0x78] sm:$0xff] }
 0x14b   : > { %v1844_v53 = vpop.f32.mrf.mxu0 }
 0x14c   : > { %v1905_v20 = vadd.f32 %v1841_v2, %v1591_v13  ;;  %973 = vmatmul.bf16.gmra.mxu1 %v2723_v22  ;;  %1255 = vmatmul.bf16.gmra.mxu2 %v2771_v8 }
 0x14d   : > { %1569 = vmatmul.bf16.gmra.mxu3 %v2795_v11 }
 0x14e   : > { %1883 = vmatmul.bf16.gmra.mxu0 %v2819_v12  ;;  %v1941_v28 = vadd.f32 %v3239_v4, %v1905_v20 }
 0x14f   : > { %v1216_v23 = vpop.f32.mrf.mxu2 }
 0x150   : > { %1973 = vst [vmem:[%s3244_s18 + $0x58] sm:$0xff] %v1941_v28  ;;  %v1278_v24 = vadd.f32 %v1216_v23, %v935_v21  ;;  %v1530_v32 = vpop.f32.mrf.mxu3 }
 0x151   : > { %v936_v33 = vpop.f32.mrf.mxu1 }
 0x152   : > { %v1592_v35 = vadd.f32 %v1530_v32, %v1278_v24  ;;  %v937_v44 = vadd.f32 %v936_v33, %v3202_v40 }
 0x153   : > { %v1846_v17 = vpop.f32.mrf.mxu0 }
 0x154   : > { %v1906_v37 = vadd.f32 %v1844_v53, %v1592_v35 }
 0x156   : > { %v1942_v36 = vadd.f32 %v3239_v4, %v1906_v37 }
 0x157   : > { %v1218_v45 = vpop.f32.mrf.mxu2 }
 0x158   : > { %1974 = vst [vmem:[%s3244_s18 + $0x60] sm:$0xff] %v1942_v36  ;;  %v1279_v47 = vadd.f32 %v1218_v45, %v937_v44  ;;  %v1532_v10 = vpop.f32.mrf.mxu3 }
 0x159   : > { %v939_v56 = vpop.f32.mrf.mxu1 }
 0x15a   : > { %v1593_v58 = vadd.f32 %v1532_v10, %v1279_v47  ;;  %v940_v16 = vadd.f32 %v939_v56, %v3212_v46 }
 0x15b   : > { %v1849_v59 = vpop.f32.mrf.mxu0 }
 0x15c   : > { %v1907_v60 = vadd.f32 %v1846_v17, %v1593_v58  ;;  %978 = vmatmul.bf16.gmra.mxu1 %v2724_v34  ;;  %1260 = vmatmul.bf16.gmra.mxu2 %v2772_v48 }
 0x15d   : > { %1574 = vmatmul.bf16.gmra.mxu3 %v2796_v57 }
 0x15e   : > { %1888 = vmatmul.bf16.gmra.mxu0 %v2820_v41  ;;  %v1943_v40 = vadd.f32 %v3239_v4, %v1907_v60 }
 0x15f   : > { %v1221_v61 = vpop.f32.mrf.mxu2 }
 0x160   : > { %1975 = vst [vmem:[%s3244_s18 + $0x68] sm:$0xff] %v1943_v40  ;;  %v1280_v62 = vadd.f32 %v1221_v61, %v940_v16  ;;  %v1535_v63 = vpop.f32.mrf.mxu3 }
 0x161   : > { %v941_v25 = vpop.f32.mrf.mxu1 }
 0x162   : > { %v1594_v0 = vadd.f32 %v1535_v63, %v1280_v62  ;;  %v942_v5 = vadd.f32 %v941_v25, %v3222_v52 }
 0x163   : > { %v1851_v1 = vpop.f32.mrf.mxu0 }
 0x164   : > { %v1908_v2 = vadd.f32 %v1849_v59, %v1594_v0 }
 0x166   : > { %v1944_v3 = vadd.f32 %v3239_v4, %v1908_v2 }
 0x167   : > { %v1223_v6 = vpop.f32.mrf.mxu2 }
 0x168   : > { %1976 = vst [vmem:[%s3244_s18 + $0x70] sm:$0xff] %v1944_v3  ;;  %v1281_v49 = vadd.f32 %v1223_v6, %v942_v5  ;;  %v1537_v7 = vpop.f32.mrf.mxu3 }
 0x169   : > { %v944_v29 = vpop.f32.mrf.mxu1 }
 0x16a   : > { %v1595_v22 = vadd.f32 %v1537_v7, %v1281_v49  ;;  %v945_v11 = vadd.f32 %v944_v29, %v3158_v14 }
 0x16b   : > { %v1854_v46 = vpop.f32.mrf.mxu0 }
 0x16c   : > { %v1909_v8 = vadd.f32 %v1851_v1, %v1595_v22 }
 0x16e   : > { %v1945_v9 = vadd.f32 %v3239_v4, %v1909_v8 }
 0x16f   : > { %v1226_v12 = vpop.f32.mrf.mxu2 }
 0x170   : > { %1977 = vst [vmem:[%s3244_s18 + $0x78] sm:$0xff] %v1945_v9  ;;  %v1282_v13 = vadd.f32 %v1226_v12, %v945_v11  ;;  %v1540_v53 = vpop.f32.mrf.mxu3 }
 0x171   : > { %v946_v20 = vpop.f32.mrf.mxu1 }
 0x172   : > { %v1596_v28 = vadd.f32 %v1540_v53, %v1282_v13  ;;  %v947_v24 = vadd.f32 %v946_v20, %v3166_v18 }
 0x173   : > { %v1856_v52 = vpop.f32.mrf.mxu0 }
 0x174   : > { %v1910_v21 = vadd.f32 %v1854_v46, %v1596_v28 }
 0x176   : > { %v1946_v23 = vadd.f32 %v3239_v4, %v1910_v21 }
 0x177   : > { %v1228_v32 = vpop.f32.mrf.mxu2 }
 0x178   : > { %1978 = vst [vmem:[%s3244_s18 + $0x80] sm:$0xff] %v1946_v23  ;;  %v1283_v33 = vadd.f32 %v1228_v32, %v947_v24  ;;  %v1542_v35 = vpop.f32.mrf.mxu3 }
 0x179   : > { %v949_v17 = vpop.f32.mrf.mxu1 }
 0x17a   : > { %v1597_v37 = vadd.f32 %v1542_v35, %v1283_v33  ;;  %v950_v45 = vadd.f32 %v949_v17, %v3178_v26 }
 0x17b   : > { %v1859_v14 = vpop.f32.mrf.mxu0 }
 0x17c   : > { %v1911_v36 = vadd.f32 %v1856_v52, %v1597_v37 }
 0x17e   : > { %v1947_v44 = vadd.f32 %v3239_v4, %v1911_v36 }
 0x17f   : > { %v1231_v47 = vpop.f32.mrf.mxu2 }
 0x180   : > { %1979 = vst [vmem:[%s3244_s18 + $0x88] sm:$0xff] %v1947_v44  ;;  %v1284_v10 = vadd.f32 %v1231_v47, %v950_v45  ;;  %v1545_v34 = vpop.f32.mrf.mxu3 }
 0x181   : > { %v951_v48 = vpop.f32.mrf.mxu1 }
 0x182   : > { %v1598_v56 = vadd.f32 %v1545_v34, %v1284_v10  ;;  %v952_v58 = vadd.f32 %v951_v48, %v3186_v30 }
 0x183   : > { %v1861_v18 = vpop.f32.mrf.mxu0 }
 0x184   : > { %v1912_v57 = vadd.f32 %v1859_v14, %v1598_v56 }
 0x186   : > { %v1948_v41 = vadd.f32 %v3239_v4, %v1912_v57 }
 0x187   : > { %v1233_v59 = vpop.f32.mrf.mxu2 }
 0x188   : > { %1980 = vst [vmem:[%s3244_s18 + $0x90] sm:$0xff] %v1948_v41  ;;  %v1285_v60 = vadd.f32 %v1233_v59, %v952_v58  ;;  %v1547_v40 = vpop.f32.mrf.mxu3 }
 0x189   : > { %v954_v16 = vpop.f32.mrf.mxu1 }
 0x18a   : > { %v1599_v61 = vadd.f32 %v1547_v40, %v1285_v60  ;;  %v955_v25 = vadd.f32 %v954_v16, %v3198_v38 }
 0x18b   : > { %v1864_v26 = vpop.f32.mrf.mxu0 }
 0x18c   : > { %v1913_v62 = vadd.f32 %v1861_v18, %v1599_v61 }
 0x18e   : > { %v1949_v63 = vadd.f32 %v3239_v4, %v1913_v62 }
 0x18f   : > { %v1236_v0 = vpop.f32.mrf.mxu2 }
 0x190   : > { %1981 = vst [vmem:[%s3244_s18 + $0x98] sm:$0xff] %v1949_v63  ;;  %v1286_v1 = vadd.f32 %v1236_v0, %v955_v25  ;;  %v1550_v2 = vpop.f32.mrf.mxu3 }
 0x191   : > { %v956_v3 = vpop.f32.mrf.mxu1 }
 0x192   : > { %v1600_v5 = vadd.f32 %v1550_v2, %v1286_v1  ;;  %v957_v7 = vadd.f32 %v956_v3, %v3206_v42 }
 0x193   : > { %v1866_v30 = vpop.f32.mrf.mxu0 }
 0x194   : > { %v1914_v6 = vadd.f32 %v1864_v26, %v1600_v5 }
 0x196   : > { %v1950_v49 = vadd.f32 %v3239_v4, %v1914_v6 }
 0x197   : > { %v1238_v29 = vpop.f32.mrf.mxu2 }
 0x198   : > { %1982 = vst [vmem:[%s3244_s18 + $0xa0] sm:$0xff] %v1950_v49  ;;  %v1287_v22 = vadd.f32 %v1238_v29, %v957_v7  ;;  %v1552_v46 = vpop.f32.mrf.mxu3 }
 0x199   : > { %v959_v8 = vpop.f32.mrf.mxu1 }
 0x19a   : > { %v1601_v9 = vadd.f32 %v1552_v46, %v1287_v22  ;;  %v960_v13 = vadd.f32 %v959_v8, %v3218_v50 }
 0x19b   : > { %v1869_v38 = vpop.f32.mrf.mxu0 }
 0x19c   : > { %v1915_v11 = vadd.f32 %v1866_v30, %v1601_v9 }
 0x19e   : > { %v1951_v12 = vadd.f32 %v3239_v4, %v1915_v11 }
 0x19f   : > { %v1241_v53 = vpop.f32.mrf.mxu2 }
 0x1a0   : > { %1983 = vst [vmem:[%s3244_s18 + $0xa8] sm:$0xff] %v1951_v12  ;;  %v1288_v20 = vadd.f32 %v1241_v53, %v960_v13  ;;  %v1555_v28 = vpop.f32.mrf.mxu3 }
 0x1a1   : > { %v961_v52 = vpop.f32.mrf.mxu1 }
 0x1a2   : > { %v1602_v21 = vadd.f32 %v1555_v28, %v1288_v20  ;;  %v962_v32 = vadd.f32 %v961_v52, %v3226_v54 }
 0x1a3   : > { %v1871_v42 = vpop.f32.mrf.mxu0 }
 0x1a4   : > { %v1916_v23 = vadd.f32 %v1869_v38, %v1602_v21 }
 0x1a6   : > { %v1952_v24 = vadd.f32 %v3239_v4, %v1916_v23 }
 0x1a7   : > { %v1243_v33 = vpop.f32.mrf.mxu2 }
 0x1a8   : > { %1984 = vst [vmem:[%s3244_s18 + $0xb0] sm:$0xff] %v1952_v24  ;;  %v1289_v35 = vadd.f32 %v1243_v33, %v962_v32  ;;  %v1557_v17 = vpop.f32.mrf.mxu3 }
 0x1a9   : > { %v964_v37 = vpop.f32.mrf.mxu1 }
 0x1aa   : > { %v1603_v14 = vadd.f32 %v1557_v17, %v1289_v35  ;;  %v965_v45 = vadd.f32 %v964_v37, %v3160_v15 }
 0x1ab   : > { %v1874_v50 = vpop.f32.mrf.mxu0 }
 0x1ac   : > { %v1917_v36 = vadd.f32 %v1871_v42, %v1603_v14 }
 0x1ae   : > { %v1953_v44 = vadd.f32 %v3239_v4, %v1917_v36 }
 0x1af   : > { %v1246_v47 = vpop.f32.mrf.mxu2 }
 0x1b0   : > { %1985 = vst [vmem:[%s3244_s18 + $0xb8] sm:$0xff] %v1953_v44  ;;  %v1290_v10 = vadd.f32 %v1246_v47, %v965_v45  ;;  %v1560_v34 = vpop.f32.mrf.mxu3 }
 0x1b1   : > { %v966_v48 = vpop.f32.mrf.mxu1 }
 0x1b2   : > { %v1604_v56 = vadd.f32 %v1560_v34, %v1290_v10  ;;  %v967_v41 = vadd.f32 %v966_v48, %v3168_v19 }
 0x1b3   : > { %v1876_v54 = vpop.f32.mrf.mxu0 }
 0x1b4   : > { %v1918_v18 = vadd.f32 %v1874_v50, %v1604_v56 }
 0x1b6   : > { %v1954_v57 = vadd.f32 %v3239_v4, %v1918_v18 }
 0x1b7   : > { %v1248_v58 = vpop.f32.mrf.mxu2 }
 0x1b8   : > { %1986 = vst [vmem:[%s3244_s18 + $0xc0] sm:$0xff] %v1954_v57  ;;  %v1291_v59 = vadd.f32 %v1248_v58, %v967_v41  ;;  %v1562_v60 = vpop.f32.mrf.mxu3 }
 0x1b9   : > { %v969_v40 = vpop.f32.mrf.mxu1 }
 0x1ba   : > { %v1605_v16 = vadd.f32 %v1562_v60, %v1291_v59  ;;  %v970_v62 = vadd.f32 %v969_v40, %v3180_v27 }
 0x1bb   : > { %v1879_v15 = vpop.f32.mrf.mxu0 }
 0x1bc   : > { %v1919_v61 = vadd.f32 %v1876_v54, %v1605_v16 }
 0x1be   : > { %v1955_v26 = vadd.f32 %v3239_v4, %v1919_v61 }
 0x1bf   : > { %v1251_v63 = vpop.f32.mrf.mxu2 }
 0x1c0   : > { %1987 = vst [vmem:[%s3244_s18 + $0xc8] sm:$0xff] %v1955_v26  ;;  %v1292_v25 = vadd.f32 %v1251_v63, %v970_v62  ;;  %v1565_v0 = vpop.f32.mrf.mxu3 }
 0x1c1   : > { %v971_v1 = vpop.f32.mrf.mxu1 }
 0x1c2   : > { %v1606_v2 = vadd.f32 %v1565_v0, %v1292_v25  ;;  %v972_v30 = vadd.f32 %v971_v1, %v3188_v31 }
 0x1c3   : > { %v1881_v19 = vpop.f32.mrf.mxu0 }
 0x1c4   : > { %v1920_v3 = vadd.f32 %v1879_v15, %v1606_v2 }
 0x1c6   : > { %v1956_v5 = vadd.f32 %v3239_v4, %v1920_v3 }
 0x1c7   : > { %v1253_v6 = vpop.f32.mrf.mxu2 }
 0x1c8   : > { %1988 = vst [vmem:[%s3244_s18 + $0xd0] sm:$0xff] %v1956_v5  ;;  %v1293_v49 = vadd.f32 %v1253_v6, %v972_v30  ;;  %v1567_v7 = vpop.f32.mrf.mxu3 }
 0x1c9   : > { %v974_v29 = vpop.f32.mrf.mxu1 }
 0x1ca   : > { %v1607_v22 = vadd.f32 %v1567_v7, %v1293_v49  ;;  %v975_v9 = vadd.f32 %v974_v29, %v3200_v39 }
 0x1cb   : > { %v1884_v46 = vpop.f32.mrf.mxu0 }
 0x1cc   : > { %v1921_v27 = vadd.f32 %v1881_v19, %v1607_v22 }
 0x1ce   : > { %v1957_v8 = vadd.f32 %v3239_v4, %v1921_v27 }
 0x1cf   : > { %v1256_v38 = vpop.f32.mrf.mxu2 }
 0x1d0   : > { %1989 = vst [vmem:[%s3244_s18 + $0xd8] sm:$0xff] %v1957_v8  ;;  %v1294_v11 = vadd.f32 %v1256_v38, %v975_v9  ;;  %v1570_v12 = vpop.f32.mrf.mxu3 }
 0x1d1   : > { %v976_v13 = vpop.f32.mrf.mxu1 }
 0x1d2   : > { %v1608_v31 = vadd.f32 %v1570_v12, %v1294_v11  ;;  %v977_v28 = vadd.f32 %v976_v13, %v3208_v43 }
 0x1d3   : > { %v1886_v52 = vpop.f32.mrf.mxu0 }
 0x1d4   : > { %v1922_v53 = vadd.f32 %v1884_v46, %v1608_v31 }
 0x1d6   : > { %v1958_v20 = vadd.f32 %v3239_v4, %v1922_v53 }
 0x1d7   : > { %v1258_v21 = vpop.f32.mrf.mxu2 }
 0x1d8   : > { %1990 = vst [vmem:[%s3244_s18 + $0xe0] sm:$0xff] %v1958_v20  ;;  %v1295_v42 = vadd.f32 %v1258_v21, %v977_v28  ;;  %v1572_v23 = vpop.f32.mrf.mxu3 }
 0x1d9   : > { %v979_v24 = vpop.f32.mrf.mxu1 }
 0x1da   : > { %v1609_v39 = vadd.f32 %v1572_v23, %v1295_v42  ;;  %v980_v35 = vadd.f32 %v979_v24, %v3220_v51 }
 0x1db   : > { %v1889_v50 = vpop.f32.mrf.mxu0 }
 0x1dc   : > { %v1923_v32 = vadd.f32 %v1886_v52, %v1609_v39 }
 0x1de   : > { %v1959_v33 = vadd.f32 %v3239_v4, %v1923_v32 }
 0x1df   : > { %v1261_v17 = vpop.f32.mrf.mxu2 }
 0x1e0   : > { %1991 = vst [vmem:[%s3244_s18 + $0xe8] sm:$0xff] %v1959_v33  ;;  %v1296_v37 = vadd.f32 %v1261_v17, %v980_v35  ;;  %v1575_v14 = vpop.f32.mrf.mxu3 }
 0x1e1   : > { %v981_v36 = vpop.f32.mrf.mxu1 }
 0x1e2   : > { %v1610_v43 = vadd.f32 %v1575_v14, %v1296_v37  ;;  %v982_v47 = vadd.f32 %v981_v36, %v3228_v55 }
 0x1e3   : > { %v1891_v54 = vpop.f32.mrf.mxu0 }
 0x1e4   : > { %v1924_v44 = vadd.f32 %v1889_v50, %v1610_v43 }
 0x1e6   : > { %v1960_v45 = vadd.f32 %v3239_v4, %v1924_v44 }
 0x1e7   : > { %v1263_v10 = vpop.f32.mrf.mxu2 }
 0x1e8   : > { %1992 = vst [vmem:[%s3244_s18 + $0xf0] sm:$0xff] %v1960_v45  ;;  %v1297_v34 = vadd.f32 %v1263_v10, %v982_v47  ;;  %v1577_v48 = vpop.f32.mrf.mxu3 }
 0x1ea   : > { %v1611_v56 = vadd.f32 %v1577_v48, %v1297_v34 }
 0x1ec   : > { %v1925_v51 = vadd.f32 %v1891_v54, %v1611_v56 }
 0x1ee   : > { %v1961_v18 = vadd.f32 %v3239_v4, %v1925_v51 }
 0x1f0   : > { %1993 = vst [vmem:[%s3244_s18 + $0xf8] sm:$0xff] %v1961_v18 }
 0x1f1 PF: > { %s17_s26 = sadd.s32 1, %s2900_s26   ;;  %s3386_s24 = smov %s2896_s25 }
 0x1f2   : > { %p14_p5 = scmp.ge.s32.totalorder %s17_s26, 4   ;;  %s3387_s25 = smov %s3389_s27 }
 0x1f4   :  { %16 = sbr.rel (!%p14_p5) target bundleno = 2 (0x2), region = 100 }

</bundles_post_ra>
